<compile_context>
chip_gen: v5e
topology: v5e:2x2
jax: 0.10.0
libtpu: 0.0.40
codegen_flags: <defaults>
</compile_context>

<pallas_src>
import functools

import jax
import jax.numpy as jnp
import numpy as np
from jax.experimental import pallas as pl
from jax.experimental.pallas import tpu as pltpu

_TAPS = [(dy, dx) for dy in (-1, 0, 1) for dx in (-1, 0, 1)]  # 3x3 kernel, row-major


def conv_embed_kernel(x_ref, maskr_ref, w1_ref, b1_ref, w2_ref, b2_ref,
                      o_ref, h1_ref, *, H, W):
    """Fused conv(1->C1, 3x3, pad=1) + ReLU + conv(C1->1, 3x3, pad=1).

    One grid block = a contiguous group of whole images flattened onto Qb lanes.

    x_ref     : (1, Qb)   pixels on lanes (several images back to back)
    maskr_ref : (9, Qb)   mirrored-tap validity masks (0./1.), row t = tap (-dy,-dx)
    w1_ref    : (C1, 9)   conv1 weights  [out_channel, tap]
    b1_ref    : (C1, 1)   conv1 bias
    w2_ref    : (9, C1)   conv2 weights  [tap, in_channel]
    b2_ref    : (1, 1)    conv2 bias
    o_ref     : (1, Qb)   output, pixels on lanes
    h1_ref    : (C1, Qb)  VMEM scratch bounding the conv1-output live range
    """
    Qb = x_ref.shape[1]
    shifts = [dy * W + dx for dy, dx in _TAPS]

    x = x_ref[...]                       # (1, Qb)
    maskr = maskr_ref[...]               # (9, Qb)

    # --- conv1 im2col --------------------------------------------------------
    # Pre-mask with the mirrored-tap masks in ONE full-width multiply; each tap
    # plane is then a lane-roll of the corresponding pre-masked row.  Rolled-in
    # values from neighbouring images / block wraparound land only on positions
    # the mask has already zeroed, so no padding buffers are needed.
    xm = x * maskr                                        # (9, Qb)
    taps = []
    for t in range(9):
        row = xm[t:t + 1, :]
        s = shifts[t] % Qb
        if s != 0:
            row = pltpu.roll(row, shift=(-shifts[t]) % Qb, axis=1)
        taps.append(row)
    xs = jnp.concatenate(taps, axis=0)                    # (9, Qb)

    # --- conv1 (1 -> C1 channels): one MXU matmul over the 9 taps ------------
    h1_ref[...] = jnp.maximum(
        jnp.dot(w1_ref[...], xs, preferred_element_type=jnp.float32)
        + b1_ref[...], 0.0)                               # (C1, Qb)

    # --- conv2 (C1 -> 1 channel): contract channels first, then combine taps -
    g = jnp.dot(w2_ref[...], h1_ref[...],
                preferred_element_type=jnp.float32)       # (9, Qb)
    gm = g * maskr                                        # one full-width multiply
    out = gm[4:5, :]                                      # center tap (shift 0)
    for t in range(9):
        if t == 4:
            continue
        out = out + pltpu.roll(gm[t:t + 1, :],
                               shift=(-shifts[t]) % Qb, axis=1)

    o_ref[...] = (out + b2_ref[...]).astype(o_ref.dtype)


def _pick_images_per_block(n_img, G, target_lanes=2048):
    """Largest divisor of n_img whose lane extent stays <= target_lanes."""
    best = 1
    for d in range(1, n_img + 1):
        if n_img % d == 0 and d * G <= target_lanes:
            best = d
    return best


def _mirrored_tap_masks(H, W, img_blk):
    """(9, img_blk*H*W) float masks; row t holds the validity of tap (-dy,-dx)."""
    G = H * W
    ys = np.arange(G) // W
    xs = np.arange(G) % W
    m = np.zeros((9, G), np.float32)
    for t, (dy, dx) in enumerate(_TAPS):
        valid = ((ys - dy >= 0) & (ys - dy < H) &
                 (xs - dx >= 0) & (xs - dx < W))
        m[t] = valid.astype(np.float32)
    return jnp.asarray(np.tile(m, (1, img_blk)))


def conv_embed_forward(x, w1, b1, w2, b2, lcd_h, lcd_w, *, target_block_lanes=2048):
    """ConvEmbed forward.  x: (BS, LEN, G) with G == lcd_h * lcd_w.
    Weights in PyTorch Conv2d layout: w1 (C1,1,3,3), b1 (C1,), w2 (1,C1,3,3), b2 (1,)."""
    BS, LEN, G = x.shape
    assert G == lcd_h * lcd_w
    C1 = w1.shape[0]
    n_img = BS * LEN
    Q = n_img * G

    img_blk = _pick_images_per_block(n_img, G, target_block_lanes)
    if (img_blk * G) % 128 != 0:       # fall back to one full block (always legal)
        img_blk = n_img
    Qb = img_blk * G
    n_blocks = n_img // img_blk

    # Layout plumbing outside the kernel (free).
    x_flat = x.reshape(1, Q).astype(jnp.float32)
    w1_k = w1.reshape(C1, 9).astype(jnp.float32)          # [out_channel, tap]
    b1_k = b1.reshape(C1, 1).astype(jnp.float32)
    w2_k = w2.reshape(C1, 9).T.astype(jnp.float32)        # [tap, in_channel]
    b2_k = b2.reshape(1, 1).astype(jnp.float32)
    maskr = _mirrored_tap_masks(lcd_h, lcd_w, img_blk)     # (9, Qb)

    out_flat = pl.pallas_call(
        functools.partial(conv_embed_kernel, H=lcd_h, W=lcd_w),
        out_shape=jax.ShapeDtypeStruct((1, Q), jnp.float32),
        grid_spec=pltpu.PrefetchScalarGridSpec(
            num_scalar_prefetch=0,
            grid=(n_blocks,),
            in_specs=[
                pl.BlockSpec((1, Qb), lambda i: (0, i)),    # x block
                pl.BlockSpec((9, Qb), lambda i: (0, 0)),    # masks (fetched once)
                pl.BlockSpec((C1, 9), lambda i: (0, 0)),
                pl.BlockSpec((C1, 1), lambda i: (0, 0)),
                pl.BlockSpec((9, C1), lambda i: (0, 0)),
                pl.BlockSpec((1, 1), lambda i: (0, 0)),
            ],
            out_specs=pl.BlockSpec((1, Qb), lambda i: (0, i)),
            scratch_shapes=[
                pltpu.VMEM((C1, Qb), jnp.float32),          # explicit h1 staging
            ],
        ),
        compiler_params=pltpu.CompilerParams(
            dimension_semantics=("parallel",),              # blocks independent (2 TCs on v7x)
            vmem_limit_bytes=32 * 1024 * 1024),
    )(x_flat, maskr, w1_k, b1_k, w2_k, b2_k)

    return out_flat.reshape(BS, LEN, G)


# ---------------------------------------------------------------------------
# Pure-JAX reference mirroring the PyTorch forward exactly.
# ---------------------------------------------------------------------------
def reference(x, w1, b1, w2, b2, lcd_h, lcd_w):
    BS, LEN, G = x.shape
    xi = x.reshape(BS * LEN, 1, lcd_h, lcd_w)
    dn = ('NCHW', 'OIHW', 'NCHW')
    y = jax.lax.conv_general_dilated(xi, w1, (1, 1), ((1, 1), (1, 1)),
                                     dimension_numbers=dn,
                                     precision=jax.lax.Precision.HIGHEST)
    y = jnp.maximum(y + b1.reshape(1, -1, 1, 1), 0.0)
    y = jax.lax.conv_general_dilated(y, w2, (1, 1), ((1, 1), (1, 1)),
                                     dimension_numbers=dn,
                                     precision=jax.lax.Precision.HIGHEST)
    y = y + b2.reshape(1, -1, 1, 1)
    return y.reshape(BS, LEN, -1)


# ---------------------------------------------------------------------------
if __name__ == "__main__":
    BS, LEN = 2, 8
    LCD_H = LCD_W = 16
    G = LCD_H * LCD_W            # 256
    C1 = 64

    key = jax.random.PRNGKey(0)
    ks = jax.random.split(key, 5)
    x = jax.random.normal(ks[0], (BS, LEN, G), dtype=jnp.float32)
    w1 = jax.random.normal(ks[1], (C1, 1, 3, 3), dtype=jnp.float32) * 0.1
    b1 = jax.random.normal(ks[2], (C1,), dtype=jnp.float32) * 0.1
    w2 = jax.random.normal(ks[3], (1, C1, 3, 3), dtype=jnp.float32) * 0.1
    b2 = jax.random.normal(ks[4], (1,), dtype=jnp.float32) * 0.1

    out = conv_embed_forward(x, w1, b1, w2, b2, LCD_H, LCD_W)
    out = jax.block_until_ready(out)

    ref = reference(x, w1, b1, w2, b2, LCD_H, LCD_W)
    np.testing.assert_allclose(np.asarray(out), np.asarray(ref),
                               rtol=1e-3, atol=1e-3)
    print("KERNEL_OK")
</pallas_src>

<mosaic_0001>
module attributes {stable_mosaic.version = 11 : i64} {
  func.func @conv_embed_kernel(%arg0: i32, %arg1: memref<1x2048xf32, #tpu.memory_space<vmem>>, %arg2: memref<9x2048xf32, #tpu.memory_space<vmem>>, %arg3: memref<64x9xf32, #tpu.memory_space<vmem>>, %arg4: memref<64x1xf32, #tpu.memory_space<vmem>>, %arg5: memref<9x64xf32, #tpu.memory_space<vmem>>, %arg6: memref<1x1xf32, #tpu.memory_space<vmem>>, %arg7: memref<1x2048xf32, #tpu.memory_space<vmem>>, %arg8: memref<64x2048xf32, #tpu.memory_space<vmem>>) attributes {dimension_semantics = [#tpu.dimension_semantics<parallel>], iteration_bounds = array<i64: 2>, scalar_prefetch = 0 : i64, scratch_operands = 1 : i64, tpu.core_type = #tpu.core_type<tc>, window_params = [{transform_indices = @transform_0, window_bounds = array<i64: 1, 2048>}, {pipeline_mode = #tpu.pipeline_mode<synchronous>, transform_indices = @transform_1, window_bounds = array<i64: 9, 2048>}, {pipeline_mode = #tpu.pipeline_mode<synchronous>, transform_indices = @transform_2, window_bounds = array<i64: 64, 9>}, {pipeline_mode = #tpu.pipeline_mode<synchronous>, transform_indices = @transform_3, window_bounds = array<i64: 64, 1>}, {pipeline_mode = #tpu.pipeline_mode<synchronous>, transform_indices = @transform_4, window_bounds = array<i64: 9, 64>}, {pipeline_mode = #tpu.pipeline_mode<synchronous>, transform_indices = @transform_5, window_bounds = array<i64: 1, 1>}, {transform_indices = @transform_6, window_bounds = array<i64: 1, 2048>}]} {
    %c0 = arith.constant 0 : index
    %c0_0 = arith.constant 0 : index
    %0 = vector.load %arg1[%c0, %c0_0] : memref<1x2048xf32, #tpu.memory_space<vmem>>, vector<1x2048xf32>
    %c0_1 = arith.constant 0 : index
    %c0_2 = arith.constant 0 : index
    %1 = vector.load %arg2[%c0_1, %c0_2] : memref<9x2048xf32, #tpu.memory_space<vmem>>, vector<9x2048xf32>
    %2 = vector.broadcast %0 : vector<1x2048xf32> to vector<9x2048xf32>
    %3 = arith.mulf %2, %1 : vector<9x2048xf32>
    %4 = vector.extract_strided_slice %3 {offsets = [0, 0], sizes = [1, 2048], strides = [1, 1]} : vector<9x2048xf32> to vector<1x2048xf32>
    %c17_i32 = arith.constant 17 : i32
    %5 = tpu.dynamic_rotate %4 by %c17_i32 dim 1 : vector<1x2048xf32>, i32 -> vector<1x2048xf32>
    %6 = vector.extract_strided_slice %3 {offsets = [1, 0], sizes = [1, 2048], strides = [1, 1]} : vector<9x2048xf32> to vector<1x2048xf32>
    %c16_i32 = arith.constant 16 : i32
    %7 = tpu.dynamic_rotate %6 by %c16_i32 dim 1 : vector<1x2048xf32>, i32 -> vector<1x2048xf32>
    %8 = vector.extract_strided_slice %3 {offsets = [2, 0], sizes = [1, 2048], strides = [1, 1]} : vector<9x2048xf32> to vector<1x2048xf32>
    %c15_i32 = arith.constant 15 : i32
    %9 = tpu.dynamic_rotate %8 by %c15_i32 dim 1 : vector<1x2048xf32>, i32 -> vector<1x2048xf32>
    %10 = vector.extract_strided_slice %3 {offsets = [3, 0], sizes = [1, 2048], strides = [1, 1]} : vector<9x2048xf32> to vector<1x2048xf32>
    %c1_i32 = arith.constant 1 : i32
    %11 = tpu.dynamic_rotate %10 by %c1_i32 dim 1 : vector<1x2048xf32>, i32 -> vector<1x2048xf32>
    %12 = vector.extract_strided_slice %3 {offsets = [4, 0], sizes = [1, 2048], strides = [1, 1]} : vector<9x2048xf32> to vector<1x2048xf32>
    %13 = vector.extract_strided_slice %3 {offsets = [5, 0], sizes = [1, 2048], strides = [1, 1]} : vector<9x2048xf32> to vector<1x2048xf32>
    %c2047_i32 = arith.constant 2047 : i32
    %14 = tpu.dynamic_rotate %13 by %c2047_i32 dim 1 : vector<1x2048xf32>, i32 -> vector<1x2048xf32>
    %15 = vector.extract_strided_slice %3 {offsets = [6, 0], sizes = [1, 2048], strides = [1, 1]} : vector<9x2048xf32> to vector<1x2048xf32>
    %c2033_i32 = arith.constant 2033 : i32
    %16 = tpu.dynamic_rotate %15 by %c2033_i32 dim 1 : vector<1x2048xf32>, i32 -> vector<1x2048xf32>
    %17 = vector.extract_strided_slice %3 {offsets = [7, 0], sizes = [1, 2048], strides = [1, 1]} : vector<9x2048xf32> to vector<1x2048xf32>
    %c2032_i32 = arith.constant 2032 : i32
    %18 = tpu.dynamic_rotate %17 by %c2032_i32 dim 1 : vector<1x2048xf32>, i32 -> vector<1x2048xf32>
    %19 = vector.extract_strided_slice %3 {offsets = [8, 0], sizes = [1, 2048], strides = [1, 1]} : vector<9x2048xf32> to vector<1x2048xf32>
    %c2031_i32 = arith.constant 2031 : i32
    %20 = tpu.dynamic_rotate %19 by %c2031_i32 dim 1 : vector<1x2048xf32>, i32 -> vector<1x2048xf32>
    %21 = tpu.concatenate %5, %7, %9, %11, %12, %14, %16, %18, %20 in 0 : vector<1x2048xf32>, vector<1x2048xf32>, vector<1x2048xf32>, vector<1x2048xf32>, vector<1x2048xf32>, vector<1x2048xf32>, vector<1x2048xf32>, vector<1x2048xf32>, vector<1x2048xf32> -> vector<9x2048xf32>
    %c0_3 = arith.constant 0 : index
    %c0_4 = arith.constant 0 : index
    %22 = vector.load %arg3[%c0_3, %c0_4] : memref<64x9xf32, #tpu.memory_space<vmem>>, vector<64x9xf32>
    %cst = arith.constant dense<0.000000e+00> : vector<64x2048xf32>
    %23 = tpu.matmul %22, %21, %cst {dimension_numbers = #tpu.dot_dimension_numbers<[1], [0], [0], [1], [0, 0, 1, 1], [], []>} : vector<64x9xf32>, vector<9x2048xf32>, vector<64x2048xf32> -> vector<64x2048xf32>
    %c0_5 = arith.constant 0 : index
    %c0_6 = arith.constant 0 : index
    %24 = vector.load %arg4[%c0_5, %c0_6] : memref<64x1xf32, #tpu.memory_space<vmem>>, vector<64x1xf32>
    %25 = vector.broadcast %24 : vector<64x1xf32> to vector<64x2048xf32>
    %26 = arith.addf %23, %25 : vector<64x2048xf32>
    %cst_7 = arith.constant 0.000000e+00 : f32
    %27 = vector.broadcast %cst_7 : f32 to vector<64x2048xf32>
    %28 = arith.maximumf %26, %27 : vector<64x2048xf32>
    %c0_8 = arith.constant 0 : index
    %c0_9 = arith.constant 0 : index
    %29 = vector.load %arg8[%c0_8, %c0_9] : memref<64x2048xf32, #tpu.memory_space<vmem>>, vector<64x2048xf32>
    tpu.vector_store %arg8[%c0_8, %c0_9], %28 {strides = array<i32>} : memref<64x2048xf32, #tpu.memory_space<vmem>>, vector<64x2048xf32>,
    %c0_10 = arith.constant 0 : index
    %c0_11 = arith.constant 0 : index
    %30 = vector.load %arg5[%c0_10, %c0_11] : memref<9x64xf32, #tpu.memory_space<vmem>>, vector<9x64xf32>
    %c0_12 = arith.constant 0 : index
    %c0_13 = arith.constant 0 : index
    %31 = vector.load %arg8[%c0_12, %c0_13] : memref<64x2048xf32, #tpu.memory_space<vmem>>, vector<64x2048xf32>
    %cst_14 = arith.constant dense<0.000000e+00> : vector<9x2048xf32>
    %32 = tpu.matmul %30, %31, %cst_14 {dimension_numbers = #tpu.dot_dimension_numbers<[1], [0], [0], [1], [0, 0, 1, 1], [], []>} : vector<9x64xf32>, vector<64x2048xf32>, vector<9x2048xf32> -> vector<9x2048xf32>
    %33 = arith.mulf %32, %1 : vector<9x2048xf32>
    %34 = vector.extract_strided_slice %33 {offsets = [4, 0], sizes = [1, 2048], strides = [1, 1]} : vector<9x2048xf32> to vector<1x2048xf32>
    %35 = vector.extract_strided_slice %33 {offsets = [0, 0], sizes = [1, 2048], strides = [1, 1]} : vector<9x2048xf32> to vector<1x2048xf32>
    %c17_i32_15 = arith.constant 17 : i32
    %36 = tpu.dynamic_rotate %35 by %c17_i32_15 dim 1 : vector<1x2048xf32>, i32 -> vector<1x2048xf32>
    %37 = arith.addf %34, %36 : vector<1x2048xf32>
    %38 = vector.extract_strided_slice %33 {offsets = [1, 0], sizes = [1, 2048], strides = [1, 1]} : vector<9x2048xf32> to vector<1x2048xf32>
    %c16_i32_16 = arith.constant 16 : i32
    %39 = tpu.dynamic_rotate %38 by %c16_i32_16 dim 1 : vector<1x2048xf32>, i32 -> vector<1x2048xf32>
    %40 = arith.addf %37, %39 : vector<1x2048xf32>
    %41 = vector.extract_strided_slice %33 {offsets = [2, 0], sizes = [1, 2048], strides = [1, 1]} : vector<9x2048xf32> to vector<1x2048xf32>
    %c15_i32_17 = arith.constant 15 : i32
    %42 = tpu.dynamic_rotate %41 by %c15_i32_17 dim 1 : vector<1x2048xf32>, i32 -> vector<1x2048xf32>
    %43 = arith.addf %40, %42 : vector<1x2048xf32>
    %44 = vector.extract_strided_slice %33 {offsets = [3, 0], sizes = [1, 2048], strides = [1, 1]} : vector<9x2048xf32> to vector<1x2048xf32>
    %c1_i32_18 = arith.constant 1 : i32
    %45 = tpu.dynamic_rotate %44 by %c1_i32_18 dim 1 : vector<1x2048xf32>, i32 -> vector<1x2048xf32>
    %46 = arith.addf %43, %45 : vector<1x2048xf32>
    %47 = vector.extract_strided_slice %33 {offsets = [5, 0], sizes = [1, 2048], strides = [1, 1]} : vector<9x2048xf32> to vector<1x2048xf32>
    %c2047_i32_19 = arith.constant 2047 : i32
    %48 = tpu.dynamic_rotate %47 by %c2047_i32_19 dim 1 : vector<1x2048xf32>, i32 -> vector<1x2048xf32>
    %49 = arith.addf %46, %48 : vector<1x2048xf32>
    %50 = vector.extract_strided_slice %33 {offsets = [6, 0], sizes = [1, 2048], strides = [1, 1]} : vector<9x2048xf32> to vector<1x2048xf32>
    %c2033_i32_20 = arith.constant 2033 : i32
    %51 = tpu.dynamic_rotate %50 by %c2033_i32_20 dim 1 : vector<1x2048xf32>, i32 -> vector<1x2048xf32>
    %52 = arith.addf %49, %51 : vector<1x2048xf32>
    %53 = vector.extract_strided_slice %33 {offsets = [7, 0], sizes = [1, 2048], strides = [1, 1]} : vector<9x2048xf32> to vector<1x2048xf32>
    %c2032_i32_21 = arith.constant 2032 : i32
    %54 = tpu.dynamic_rotate %53 by %c2032_i32_21 dim 1 : vector<1x2048xf32>, i32 -> vector<1x2048xf32>
    %55 = arith.addf %52, %54 : vector<1x2048xf32>
    %56 = vector.extract_strided_slice %33 {offsets = [8, 0], sizes = [1, 2048], strides = [1, 1]} : vector<9x2048xf32> to vector<1x2048xf32>
    %c2031_i32_22 = arith.constant 2031 : i32
    %57 = tpu.dynamic_rotate %56 by %c2031_i32_22 dim 1 : vector<1x2048xf32>, i32 -> vector<1x2048xf32>
    %58 = arith.addf %55, %57 : vector<1x2048xf32>
    %c0_23 = arith.constant 0 : index
    %c0_24 = arith.constant 0 : index
    %59 = vector.load %arg6[%c0_23, %c0_24] : memref<1x1xf32, #tpu.memory_space<vmem>>, vector<1x1xf32>
    %60 = vector.broadcast %59 : vector<1x1xf32> to vector<1x2048xf32>
    %61 = arith.addf %58, %60 : vector<1x2048xf32>
    %c0_25 = arith.constant 0 : index
    %c0_26 = arith.constant 0 : index
    %62 = vector.load %arg7[%c0_25, %c0_26] : memref<1x2048xf32, #tpu.memory_space<vmem>>, vector<1x2048xf32>
    tpu.vector_store %arg7[%c0_25, %c0_26], %61 {strides = array<i32>} : memref<1x2048xf32, #tpu.memory_space<vmem>>, vector<1x2048xf32>,
    return
  }
  func.func @transform_0(%arg0: i32) -> (i32, i32) {
    %c0_i32 = arith.constant 0 : i32
    %c0_i32_0 = arith.constant 0 : i32
    return %c0_i32, %arg0 : i32, i32
  }
  func.func @transform_1(%arg0: i32) -> (i32, i32) {
    %c0_i32 = arith.constant 0 : i32
    %c0_i32_0 = arith.constant 0 : i32
    %c0_i32_1 = arith.constant 0 : i32
    return %c0_i32, %c0_i32_0 : i32, i32
  }
  func.func @transform_2(%arg0: i32) -> (i32, i32) {
    %c0_i32 = arith.constant 0 : i32
    %c0_i32_0 = arith.constant 0 : i32
    %c0_i32_1 = arith.constant 0 : i32
    return %c0_i32, %c0_i32_0 : i32, i32
  }
  func.func @transform_3(%arg0: i32) -> (i32, i32) {
    %c0_i32 = arith.constant 0 : i32
    %c0_i32_0 = arith.constant 0 : i32
    %c0_i32_1 = arith.constant 0 : i32
    return %c0_i32, %c0_i32_0 : i32, i32
  }
  func.func @transform_4(%arg0: i32) -> (i32, i32) {
    %c0_i32 = arith.constant 0 : i32
    %c0_i32_0 = arith.constant 0 : i32
    %c0_i32_1 = arith.constant 0 : i32
    return %c0_i32, %c0_i32_0 : i32, i32
  }
  func.func @transform_5(%arg0: i32) -> (i32, i32) {
    %c0_i32 = arith.constant 0 : i32
    %c0_i32_0 = arith.constant 0 : i32
    %c0_i32_1 = arith.constant 0 : i32
    return %c0_i32, %c0_i32_0 : i32, i32
  }
  func.func @transform_6(%arg0: i32) -> (i32, i32) {
    %c0_i32 = arith.constant 0 : i32
    %c0_i32_0 = arith.constant 0 : i32
    return %c0_i32, %arg0 : i32, i32
  }
}

</mosaic_0001>

<bundles_post_ra>
// kernel: tpu_custom_call.1
= control target key start
LH: loop header
LB: loop body
LE: loop exit
PB: predicated region body
PF: predicated region fallthrough
CT: control target
= control target key end

     0   :  { %s7825_s0 = inlined_call_operand.vmem [shape: f32[1,4096], index: 0, kind: input, shape index: {}]   ;;  %s7826_s1 = inlined_call_operand.hbm [shape: f32[9,2048], index: 1, kind: input, shape index: {}]   ;;  %s7827_s2 = inlined_call_operand.vmem [shape: f32[64,9], index: 2, kind: input, shape index: {}]   ;;  %s7828_s3 = inlined_call_operand.vmem [shape: f32[64,1], index: 3, kind: input, shape index: {}]   ;;  %s7829_s4 = inlined_call_operand.vmem [shape: f32[9,64], index: 4, kind: input, shape index: {}]   ;;  %s7830_s5 = inlined_call_operand.<no memory space> [shape: f32[1,1], index: 5, kind: input, shape index: {}]   ;;  %s7831_s6 = inlined_call_operand.hbm [shape: f32[1,4096], index: 6, kind: output, shape index: {}]  }
   0x1   :  { %v11_v0 = vstv %s7830_s5 }
   0x2   :  { %12 = vst [vmem:[#allocation3] sm:$0x1] %v11_v0 }
   0x3   :  { %13 = vsyncpa [#allocation5], 0 }
   0x4   :  { %14 = vsyncpa [#allocation6], 0 }
   0x5   :  { %16 = vsyncpa [#allocation6 + $0x1], 0  ;;  %s4891_s23 = smov 0   ;;  %s4893_s24 = smov 0  }
   0x6   :  { %s4895_s25 = smov 0   ;;  %s4897_s26 = smov 0  }
   0x7 LB: > { %s4912_s5 = sadd.s32 4294967295, %s4839_s26   ;;  %s4206_s27 = sadd.s32 4294967294, %s4839_s26   ;;  %s4839_s26 = sphi %s4897_s26, %s7975_s26   ;;  %s4835_s25 = sphi %s4895_s25, %s7974_s25   ;;  %s4831_s24 = sphi %s4893_s24, %s7973_s24   ;;  %s4827_s23 = sphi %s4891_s23, %s7972_s23  }
   0x8   : > { %s4916_s28 = sadd.s32 1, %s4839_s26   ;;  %s160_s29 = sadd.s32 1, %s4835_s25 }
   0x9   : > { %s157_s30 = ssub.s32 %s4839_s26, %s4916_s28  ;;  %p170_p0 = scmp.ne.s32.totalorder %s4835_s25, %s4831_s24 }
   0xa   : > { %p158_p1 = scmp.eq.s32.totalorder %s157_s30, 0  ;;  %p171_p2 = scmp.eq.s32.totalorder %s4912_s5, 1 }
   0xb   : > { %p176_p3 = scmp.ne.s32.totalorder %s4831_s24, %s4827_s23  ;;  %p177_p4 = scmp.eq.s32.totalorder %s4206_s27, 1 }
   0xc   : > { %s4927_s7 = scalar_select %p158_p1, %s4835_s25, %s160_s29  }
   0xd   : > { %p4929_p5 = por %p171_p2, %p170_p0  ;;  %p4933_p6 = por %p177_p4, %p176_p3 }
   0xe   : > { %p4207_p7 = scmp.ge.s32.totalorder %s4839_s26, 1  ;;  %p184_p8 = scmp.lt.s32.totalorder %s4839_s26, 3 }
   0xf   : > { %p4408_p9 = scmp.eq.s32.totalorder %s4912_s5, 0  ;;  %s195_s12 = sshll.u32 %s7826_s1, 4  ;;  %s196_s12 = int_to_ptr.hbm [resolvable:$true] %s195_s12 }
  0x10   : > { %p185_p10 = pnand %p4207_p7, %p184_p8  ;;  %s4841_s13 = smov [#allocation4]  }
  0x11   : > { %s197_s14 = sshll.u32 %s4841_s13, 4  ;;  %s4842_s15 = smov 2048   ;;  %s198_s14 = int_to_ptr.vmem [resolvable:$true] %s197_s14 }
  0x12   : > { %p4400_p11 = pneg %p185_p10  ;;  %s4843_s16 = smov 128  }
  0x13   : > { %233 = sbr.rel (%p185_p10) target bundleno = 1128 (0x468), region = 44 }
  0x14   : > { %p4401_p12 = pnand %p4408_p9, %p4400_p11 }
  0x16   : > { %4403 = dma.hbm_to_vmem [thread:$0]  (!%p4401_p12), %s196_s12, 4096, %s198_s14, [#allocation5], %s4842_s15, %s4842_s15, %s4843_s16  }
  0x18   : > { %4818 = dma.done.wait (%p4408_p9), [#allocation5], 4096  }
  0x19   : > { %4820 = vsyncadd (%p4408_p9), [#allocation5], 4294963200  ;;  %s4950_s17 = sshll.u32 %s4912_s5, 4  ;;  %v279_v2 = vld [vmem:[#allocation4 + $0x40] sm:$0xff]  ;;  %v280_v3 = vld [vmem:[#allocation4 + $0x48] sm:$0xff]  ;;  %s4844_s22 = smov 17  }
  0x1a   : > { %p264_p13 = scmp.lt.s32.totalorder %s4950_s17, 31  ;;  %v275_v7 = vld [vmem:[#allocation4 + $0x20] sm:$0xff]  ;;  %v276_v8 = vld [vmem:[#allocation4 + $0x28] sm:$0xff]  ;;  %v281_v24 = vld [vmem:[#allocation4 + $0x50] sm:$0xff]  ;;  %s4845_s5 = smov 16   ;;  %vm1259_vm3 = vcmask 1040384  }
  0x1b   : > { %v271_v12 = vld [vmem:[#allocation4] sm:$0xff]  ;;  %v272_v13 = vld [vmem:[#allocation4 + $0x8] sm:$0xff]  ;;  %v282_v25 = vld [vmem:[#allocation4 + $0x58] sm:$0xff]  ;;  %s4846_s27 = smov 15   ;;  %s4847_s29 = smov 1   ;;  %vm1276_vm4 = vcmask 1041408  }
  0x1c   : > { %s265_s18 = scalar_select %p264_p13, %s4950_s17, 31  ;;  %v277_v27 = vld [vmem:[#allocation4 + $0x30] sm:$0xff]  ;;  %v278_v28 = vld [vmem:[#allocation4 + $0x38] sm:$0xff]  ;;  %v283_v51 = vld [vmem:[#allocation4 + $0x60] sm:$0xff]  ;;  %vm1293_vm8 = vcmask 1042432   ;;  %vm1310_vm10 = vcmask 1043456  }
  0x1d   : > { %v273_v30 = vld [vmem:[#allocation4 + $0x10] sm:$0xff]  ;;  %v274_v33 = vld [vmem:[#allocation4 + $0x18] sm:$0xff]  ;;  %v284_v52 = vld [vmem:[#allocation4 + $0x68] sm:$0xff]  ;;  %s4848_s30 = smov 113   ;;  %s4849_s10 = smov 127   ;;  %vm1327_vm11 = vcmask 1044480  }
  0x1e   : > { %s266_s21 = scalar_lea.vmem %s7825_s0, %s265_s18  ;;  %v285_v47 = vld [vmem:[#allocation4 + $0x70] sm:$0xff]  ;;  %v286_v50 = vld [vmem:[#allocation4 + $0x78] sm:$0xff]  ;;  %s4850_s11 = smov 111   ;;  %vm1344_vm13 = vcmask 1045504   ;;  %vm1361_vm14 = vcmask 1046528   ;;  %vm1434_vm15 = vcmask 72704  }
  0x1f   : > { %v4957_v1 = vld [vmem:[%s266_s21 + $0x8] sm:$0xff]  ;;  %v4961_v6 = vld [vmem:[%s266_s21] sm:$0xff]  ;;  %s4851_s12 = smov 112  }
  0x20   : > { %v313_v4 = vperm.slane %v4957_v1, 0  ;;  %v314_v5 = vperm.slane %v4957_v1, 1  ;;  %v315_v9 = vperm.slane %v4957_v1, 2  ;;  %v309_v10 = vperm.slane %v4961_v6, 4 }
  0x21   : > { %v310_v11 = vperm.slane %v4961_v6, 5  ;;  %v305_v14 = vperm.slane %v4961_v6, 0  ;;  %v306_v15 = vperm.slane %v4961_v6, 1  ;;  %v316_v18 = vperm.slane %v4957_v1, 3 }
  0x22   : > { %v4970_v16 = vmul.f32 %v313_v4, %v279_v2  ;;  %v4974_v17 = vmul.f32 %v314_v5, %v280_v3  ;;  %v311_v19 = vperm.slane %v4961_v6, 6  ;;  %v4980_v20 = vmul.f32 %v309_v10, %v275_v7 }
  0x23   : > { %v4984_v21 = vmul.f32 %v310_v11, %v276_v8  ;;  %v4988_v22 = vmul.f32 %v305_v14, %v271_v12  ;;  %v4992_v23 = vmul.f32 %v306_v15, %v272_v13  ;;  %v312_v29 = vperm.slane %v4961_v6, 7 }
  0x24   : > { %7882 = vst [vmem:[#allocation10_spill] sm:$0xff] %v4970_v16  ;;  %v4475_v26 = vpack.i.bf16 %v4974_v17, %v4970_v16  ;;  %v307_v34 = vperm.slane %v4961_v6, 2  ;;  %v5005_v35 = vmul.f32 %v315_v9, %v281_v24  ;;  %v5009_v36 = vmul.f32 %v316_v18, %v282_v25 }
  0x25   : > { %7883 = vst [vmem:[#allocation11_spill] sm:$0xff] %v4974_v17  ;;  %v4465_v31 = vpack.i.bf16 %v4984_v21, %v4980_v20  ;;  %v4455_v32 = vpack.i.bf16 %v4992_v23, %v4988_v22  ;;  %v308_v37 = vperm.slane %v4961_v6, 3  ;;  %v5016_v38 = vmul.f32 %v311_v19, %v277_v27 }
  0x26   : > { %4476 = vrot.lane.b32.xlu2 %v4475_v26, %s4844_s22  ;;  %7884 = vst [vmem:[#allocation12_spill] sm:$0xff] %v5005_v35  ;;  %v5020_v39 = vmul.f32 %v312_v29, %v278_v28  ;;  %v5024_v40 = vmul.f32 %v307_v34, %v273_v30  ;;  %v4480_v42 = vpack.i.bf16 %v5009_v36, %v5005_v35  ;;  %v7839_v43 = vperm.slane %v4957_v1, 6 }
  0x27   : > { %4466 = vrot.lane.b32.xlu1 %v4465_v31, %s4844_s22  ;;  %4456 = vrot.lane.b32.xlu0 %v4455_v32, %s4844_s22  ;;  %v5028_v41 = vmul.f32 %v308_v37, %v274_v33  ;;  %v7840_v44 = vperm.slane %v4957_v1, 7  ;;  %v317_v48 = vperm.slane %v4957_v1, 4  ;;  %v7838_v49 = vperm.slane %v4957_v1, 5 }
  0x28   : > { %v4470_v45 = vpack.i.bf16 %v5020_v39, %v5016_v38  ;;  %v5043_v53 = vmul.f32 %v7839_v43, %v285_v47  ;;  %v436_v54 = vrot.slane %v4988_v22, 1  ;;  %v437_v55 = vrot.slane %v4992_v23, 1 }
  0x29   : > { %v4460_v46 = vpack.i.bf16 %v5028_v41, %v5024_v40  ;;  %v5051_v56 = vmul.f32 %v7840_v44, %v286_v50  ;;  %v5055_v57 = vmul.f32 %v317_v48, %v283_v51  ;;  %v5059_v58 = vmul.f32 %v7838_v49, %v284_v52 }
  0x2a   : > { %7885 = vst [vmem:[#allocation13_spill] sm:$0xff] %v5043_v53  ;;  %v4495_v59 = vpack.i.bf16 %v437_v55, %v436_v54  ;;  %v442_v62 = vrot.slane %v5016_v38, 1  ;;  %v443_v63 = vrot.slane %v5020_v39, 1  ;;  %v440_v0 = vrot.slane %v4980_v20, 1 }
  0x2b   : > { %7886 = vst [vmem:[#allocation14_spill] sm:$0xff] %v5051_v56  ;;  %v4490_v60 = vpack.i.bf16 %v5051_v56, %v5043_v53  ;;  %v4485_v61 = vpack.i.bf16 %v5059_v58, %v5055_v57  ;;  %v441_v2 = vrot.slane %v4984_v21, 1  ;;  %v438_v3 = vrot.slane %v5024_v40, 1 }
  0x2c   : > { %7887 = vst [vmem:[#allocation15_spill] sm:$0xff] %v5055_v57  ;;  %v439_v7 = vrot.slane %v5028_v41, 1  ;;  %v4510_v8 = vpack.i.bf16 %v443_v63, %v442_v62  ;;  %v448_v24 = vrot.slane %v5055_v57, 1  ;;  %v449_v25 = vrot.slane %v5059_v58, 1 }
  0x2d   : > { %7888 = vst [vmem:[#allocation16_spill] sm:$0xff] %v5059_v58  ;;  %v4505_v12 = vpack.i.bf16 %v441_v2, %v440_v0  ;;  %v446_v26 = vrot.slane %v5005_v35, 1  ;;  %v447_v27 = vrot.slane %v5009_v36, 1  ;;  %v444_v28 = vrot.slane %v4970_v16, 1 }
  0x2e   : > { %4481 = vrot.lane.b32.xlu2 %v4480_v42, %s4844_s22  ;;  %v4500_v13 = vpack.i.bf16 %v439_v7, %v438_v3  ;;  %v445_v30 = vrot.slane %v4974_v17, 1  ;;  %v4525_v31 = vpack.i.bf16 %v449_v25, %v448_v24  ;;  %v519_v42 = vrot.slane %v5024_v40, 2 }
  0x2f   : > { %4471 = vrot.lane.b32.xlu1 %v4470_v45, %s4844_s22  ;;  %4461 = vrot.lane.b32.xlu0 %v4460_v46, %s4844_s22  ;;  %v4520_v32 = vpack.i.bf16 %v447_v27, %v446_v26  ;;  %v520_v45 = vrot.slane %v5028_v41, 2  ;;  %v450_v46 = vrot.slane %v5043_v53, 1  ;;  %v451_v47 = vrot.slane %v5051_v56, 1 }
  0x30   : > { %v4515_v33 = vpack.i.bf16 %v445_v30, %v444_v28  ;;  %v517_v50 = vrot.slane %v4988_v22, 2  ;;  %v518_v51 = vrot.slane %v4992_v23, 2  ;;  %v522_v62 = vrot.slane %v4984_v21, 2 }
  0x31   : > { %v4540_v52 = vpack.i.bf16 %v520_v45, %v519_v42  ;;  %v4530_v54 = vpack.i.bf16 %v451_v47, %v450_v46  ;;  %v523_v63 = vrot.slane %v5016_v38, 2  ;;  %v524_v0 = vrot.slane %v5020_v39, 2 }
  0x32   : > { %v4535_v55 = vpack.i.bf16 %v518_v51, %v517_v50  ;;  %v528_v24 = vrot.slane %v5009_v36, 2  ;;  %v529_v25 = vrot.slane %v5055_v57, 2  ;;  %v530_v26 = vrot.slane %v5059_v58, 2 }
  0x33   : > { %v4550_v7 = vpack.i.bf16 %v524_v0, %v523_v63  ;;  %v599_v42 = vrot.slane %v4992_v23, 3  ;;  %v600_v45 = vrot.slane %v5024_v40, 3  ;;  %v601_v46 = vrot.slane %v5028_v41, 3 }
  0x34   : > { %v4565_v30 = vpack.i.bf16 %v530_v26, %v529_v25  ;;  %v679_v25 = vrot.slane %v4988_v22, 5  ;;  %v681_v26 = vrot.slane %v5024_v40, 5  ;;  %v691_v6 = vrot.slane %v5055_v57, 5 }
  0x35   : > { %v4580_v51 = vpack.i.bf16 %v601_v46, %v600_v45  ;;  %v613_v45 = vrot.slane %v5051_v56, 3  ;;  %v841_v46 = vrot.slane %v4988_v22, 7 }
  0x36   : > { %4496 = vrot.lane.b32.xlu2 %v4495_v59, %s4845_s5  ;;  %v525_v59 = vrot.slane %v4970_v16, 2 }
  0x37   : > { %4491 = vrot.lane.b32.xlu1 %v4490_v60, %s4844_s22  ;;  %4486 = vrot.lane.b32.xlu0 %v4485_v61, %s4844_s22  ;;  %v526_v60 = vrot.slane %v4974_v17, 2  ;;  %v521_v61 = vrot.slane %v4980_v20, 2 }
  0x39   : > { %v4555_v2 = vpack.i.bf16 %v526_v60, %v525_v59  ;;  %v4545_v3 = vpack.i.bf16 %v522_v62, %v521_v61  ;;  %v605_v59 = vrot.slane %v5020_v39, 3  ;;  %v682_v60 = vrot.slane %v5028_v41, 5 }
  0x3a   : > { %v683_v61 = vrot.slane %v4980_v20, 5 }
  0x3c   : > { %v4595_v0 = vpack.i.bf16 %v683_v61, %v682_v60  ;;  %v686_v60 = vrot.slane %v5020_v39, 5  ;;  %v687_v61 = vrot.slane %v4970_v16, 5 }
  0x3e   : > { %4511 = vrot.lane.b32.xlu2 %v4510_v8, %s4845_s5  ;;  %v531_v8 = vrot.slane %v5043_v53, 2 }
  0x3f   : > { %4506 = vrot.lane.b32.xlu1 %v4505_v12, %s4845_s5  ;;  %4501 = vrot.lane.b32.xlu0 %v4500_v13, %s4845_s5  ;;  %v532_v12 = vrot.slane %v5051_v56, 2  ;;  %v527_v13 = vrot.slane %v5005_v35, 2 }
  0x41   : > { %v4570_v27 = vpack.i.bf16 %v532_v12, %v531_v8  ;;  %v4560_v28 = vpack.i.bf16 %v528_v24, %v527_v13  ;;  %v290_v8 = vld [vmem:[#allocation4 + $0x98] sm:$0x1] }
  0x42   : > { %v356_v24 = vmul.f32 %v308_v37, %v290_v8  ;;  %v295_v8 = vld [vmem:[#allocation4 + $0xc0] sm:$0x1] }
  0x46   : > { %4526 = vrot.lane.b32.xlu2 %v4525_v31, %s4845_s5  ;;  %v602_v31 = vrot.slane %v4980_v20, 3 }
  0x47   : > { %4521 = vrot.lane.b32.xlu1 %v4520_v32, %s4845_s5  ;;  %4516 = vrot.lane.b32.xlu0 %v4515_v33, %s4845_s5  ;;  %v603_v32 = vrot.slane %v4984_v21, 3  ;;  %v598_v33 = vrot.slane %v4988_v22, 3 }
  0x49   : > { %v4585_v47 = vpack.i.bf16 %v603_v32, %v602_v31  ;;  %v4575_v50 = vpack.i.bf16 %v599_v42, %v598_v33  ;;  %v289_v32 = vld [vmem:[#allocation4 + $0x90] sm:$0x1]  ;;  %v680_v33 = vrot.slane %v4992_v23, 5 }
  0x4a   : > { %v355_v42 = vmul.f32 %v307_v34, %v289_v32  ;;  %v761_v34 = vrot.slane %v4992_v23, 6 }
  0x4e   : > { %4541 = vrot.lane.b32.xlu2 %v4540_v52, %s4846_s27  ;;  %v763_v52 = vrot.slane %v5028_v41, 6 }
  0x4f   : > { %4531 = vrot.lane.b32.xlu0 %v4530_v54, %s4845_s5  ;;  %4536 = vrot.lane.b32.xlu1 %v4535_v55, %s4846_s27  ;;  %v764_v54 = vrot.slane %v4980_v20, 6  ;;  %v604_v55 = vrot.slane %v5016_v38, 3 }
  0x51   : > { %v4600_v62 = vpack.i.bf16 %v764_v54, %v763_v52  ;;  %v4590_v63 = vpack.i.bf16 %v605_v59, %v604_v55  ;;  %v767_v55 = vrot.slane %v5020_v39, 6  ;;  %v768_v59 = vrot.slane %v4970_v16, 6 }
  0x56   : > { %4556 = vrot.lane.b32.xlu2 %v4555_v2, %s4846_s27  ;;  %v844_v2 = vrot.slane %v5028_v41, 7 }
  0x57   : > { %4546 = vrot.lane.b32.xlu0 %v4545_v3, %s4846_s27  ;;  %4551 = vrot.lane.b32.xlu1 %v4550_v7, %s4846_s27  ;;  %v845_v3 = vrot.slane %v4980_v20, 7  ;;  %v291_v7 = vld [vmem:[#allocation4 + $0xa0] sm:$0x1] }
  0x58   : > { %v357_v12 = vmul.f32 %v309_v10, %v291_v7  ;;  %v762_v10 = vrot.slane %v5024_v40, 6  ;;  %v849_v7 = vrot.slane %v4970_v16, 7 }
  0x59   : > { %v4605_v13 = vpack.i.bf16 %v845_v3, %v844_v2  ;;  %v4625_v2 = vpack.i.bf16 %v687_v61, %v686_v60  ;;  %v848_v3 = vrot.slane %v5020_v39, 7  ;;  %v607_v60 = vrot.slane %v4974_v17, 3 }
  0x5e   : > { %4571 = vrot.lane.b32.xlu2 %v4570_v27, %s4846_s27  ;;  %v760_v27 = vrot.slane %v4988_v22, 6 }
  0x5f   : > { %4561 = vrot.lane.b32.xlu0 %v4560_v28, %s4846_s27  ;;  %4566 = vrot.lane.b32.xlu1 %v4565_v30, %s4846_s27  ;;  %v843_v28 = vrot.slane %v5024_v40, 7  ;;  %v4610_v30 = vpack.i.bf16 %v679_v25, %v681_v26  ;;  %v4635_v26 = vpack.i.bf16 %v849_v7, %v848_v3  ;;  %v771_v7 = vrot.slane %v5009_v36, 6 }
  0x60   : > { %v4615_v37 = vpack.i.bf16 %v760_v27, %v762_v10  ;;  %v684_v10 = vrot.slane %v4984_v21, 5 }
  0x66   : > { %4586 = vrot.lane.b32.xlu2 %v4585_v47, %s4847_s29  ;;  %v842_v47 = vrot.slane %v4992_v23, 7 }
  0x67   : > { %4576 = vrot.lane.b32.xlu0 %v4575_v50, %s4847_s29  ;;  %4581 = vrot.lane.b32.xlu1 %v4580_v51, %s4847_s29  ;;  %v287_v50 = vld [vmem:[#allocation4 + $0x80] sm:$0x1] }
  0x68   : > { %v353_v52 = vmul.f32 %v305_v14, %v287_v50  ;;  %v4620_v54 = vpack.i.bf16 %v842_v47, %v841_v46  ;;  %v288_v14 = vld [vmem:[#allocation4 + $0x88] sm:$0x1]  ;;  %v846_v50 = vrot.slane %v4984_v21, 7 }
  0x6e   : > { %4601 = vrot.lane.b32.xlu2 %v4600_v62, %s4848_s30 }
  0x6f   : > { %4591 = vrot.lane.b32.xlu0 %v4590_v63, %s4847_s29  ;;  %4596 = vrot.lane.b32.xlu1 %v4595_v0, %s4849_s10  ;;  %v4630_v63 = vpack.i.bf16 %v768_v59, %v767_v55  ;;  %v354_v0 = vmul.f32 %v306_v15, %v288_v14  ;;  %v361_v15 = vmul.f32 %v313_v4, %v295_v8  ;;  %v847_v4 = vrot.slane %v5016_v38, 7  ;;  %v292_v14 = vld [vmem:[#allocation4 + $0xa8] sm:$0x1] }
  0x70   : > { %v609_v55 = vrot.slane %v5009_v36, 3  ;;  %v606_v59 = vrot.slane %v4970_v16, 3  ;;  %v772_v8 = vrot.slane %v5055_v57, 6 }
  0x72   : > { %v4645_v3 = vpack.i.bf16 %v607_v60, %v606_v59  ;;  %v401_v59 = vlaneseq }
  0x76   : > { %930 = vrot.lane.b32.xlu2 %v357_v12, %s4850_s11 }
  0x77   : > { %4606 = vrot.lane.b32.xlu0 %v4605_v13, %s4851_s12  ;;  %928 = vrot.lane.b32.xlu1 %v356_v24, %s4850_s11  ;;  %v294_v13 = vld [vmem:[#allocation4 + $0xb8] sm:$0x1] }
  0x78   : > { %v360_v27 = vmul.f32 %v312_v29, %v294_v13  ;;  %v766_v29 = vrot.slane %v5016_v38, 6  ;;  %v610_v13 = vrot.slane %v5055_v57, 3 }
  0x7e   : > { %877 = vrot.lane.b32.xlu2 %v843_v28, %s4851_s12  ;;  %v685_v28 = vrot.slane %v5016_v38, 5 }
  0x7f   : > { %4611 = vrot.lane.b32.xlu0 %v4610_v30, %s4849_s10  ;;  %4616 = vrot.lane.b32.xlu1 %v4615_v37, %s4848_s30 }
  0x80   : > { %v5148_v31 = vpop.permute.xlu2 %4476 }
  0x86   : > { %713 = vrot.lane.b32.xlu2 %v680_v33, %s4849_s10  ;;  %v4640_v33 = vpack.i.bf16 %v684_v10, %v685_v28  ;;  %v4665_v28 = vpack.i.bf16 %v772_v8, %v771_v7  ;;  %v689_v7 = vrot.slane %v5005_v35, 5  ;;  %v769_v8 = vrot.slane %v4974_v17, 6 }
  0x87   : > { %926 = vrot.lane.b32.xlu0 %v355_v42, %s4850_s11  ;;  %660 = vrot.lane.b32.xlu1 %v613_v45, %s4847_s29  ;;  %v293_v45 = vld [vmem:[#allocation4 + $0xb0] sm:$0x1] }
  0x88   : > { %v5159_v51 = vpop.permute.xlu2 %4481 }
  0x8e   : > { %922 = vrot.lane.b32.xlu2 %v353_v52, %s4850_s11  ;;  %v359_v52 = vmul.f32 %v311_v19, %v293_v45  ;;  %v853_v45 = vrot.slane %v5055_v57, 7 }
  0x8f   : > { %794 = vrot.lane.b32.xlu0 %v761_v34, %s4848_s30  ;;  %4621 = vrot.lane.b32.xlu1 %v4620_v54, %s4851_s12  ;;  %v765_v34 = vrot.slane %v4984_v21, 6  ;;  %v608_v54 = vrot.slane %v5005_v35, 3 }
  0x90   : > { %v5171_v62 = vpop.permute.xlu2 %4496 }
  0x96   : > { %4631 = vrot.lane.b32.xlu2 %v4630_v63, %s4848_s30 }
  0x97   : > { %924 = vrot.lane.b32.xlu0 %v354_v0, %s4850_s11  ;;  %4626 = vrot.lane.b32.xlu1 %v4625_v2, %s4849_s10  ;;  %v4650_v0 = vpack.i.bf16 %v609_v55, %v608_v54  ;;  %v358_v2 = vmul.f32 %v310_v11, %v292_v14 }
  0x98   : > { %v5180_v12 = vpop.permute.xlu2 %4511 }
  0x99   : > { %v5182_v24 = vpop.permute.xlu1 %4466  ;;  %v5184_v25 = vpop.permute.xlu0 %4456 }
  0x9e   : > { %938 = vrot.lane.b32.xlu2 %v361_v15, %s4850_s11  ;;  %v611_v15 = vrot.slane %v5059_v58, 3 }
  0x9f   : > { %4636 = vrot.lane.b32.xlu0 %v4635_v26, %s4851_s12  ;;  %936 = vrot.lane.b32.xlu1 %v360_v27, %s4850_s11  ;;  %v690_v26 = vrot.slane %v5009_v36, 5 }
  0xa0   : > { %v5195_v30 = vpop.permute.xlu2 %4526 }
  0xa1   : > { %7889 = vst [vmem:[#allocation17_spill] sm:$0xff] %v5195_v30  ;;  %v5197_v37 = vpop.permute.xlu1 %4471  ;;  %v5199_v32 = vpop.permute.xlu0 %4461 }
  0xa2   : > { %v7851_v49 = vunpack.i.h.bf16 %v5199_v32  ;;  %v7852_v43 = vunpack.i.l.bf16 %v5199_v32 }
  0xa6   : > { %885 = vrot.lane.b32.xlu2 %v847_v4, %s4851_s12  ;;  %v4655_v4 = vpack.i.bf16 %v611_v15, %v610_v13 }
  0xa7   : > { %4641 = vrot.lane.b32.xlu0 %v4640_v33, %s4849_s10  ;;  %804 = vrot.lane.b32.xlu1 %v766_v29, %s4848_s30  ;;  %v4660_v33 = vpack.i.bf16 %v691_v6, %v690_v26  ;;  %v852_v29 = vrot.slane %v5009_v36, 7 }
  0xa8   : > { %v5206_v42 = vpop.permute.xlu2 %4541 }
  0xa9   : > { %v5208_v46 = vpop.permute.xlu1 %4491  ;;  %v5210_v47 = vpop.permute.xlu0 %4486  ;;  %v4670_v14 = vpack.i.bf16 %v853_v45, %v852_v29 }
  0xaa   : > { %7890 = vst [vmem:[#allocation18_spill] sm:$0xff] %v5208_v46 }
  0xab   : > { %7891 = vst [vmem:[#allocation19_spill] sm:$0xff] %v5210_v47 }
  0xae   : > { %883 = vrot.lane.b32.xlu2 %v846_v50, %s4851_s12  ;;  %v299_v50 = vld [vmem:[#allocation4 + $0xe0] sm:$0x1] }
  0xaf   : > { %934 = vrot.lane.b32.xlu0 %v359_v52, %s4850_s11  ;;  %802 = vrot.lane.b32.xlu1 %v765_v34, %s4848_s30  ;;  %v298_v34 = vld [vmem:[#allocation4 + $0xd8] sm:$0x1]  ;;  %v365_v60 = vmul.f32 %v317_v48, %v299_v50  ;;  %v770_v48 = vrot.slane %v5005_v35, 6 }
  0xb0   : > { %v5223_v61 = vpop.permute.xlu2 %4556 }
  0xb1   : > { %v5225_v19 = vpop.permute.xlu1 %4506  ;;  %v5227_v63 = vpop.permute.xlu0 %4501 }
  0xb6   : > { %4651 = vrot.lane.b32.xlu2 %v4650_v0, %s4847_s29  ;;  %v364_v0 = vmul.f32 %v316_v18, %v298_v34 }
  0xb7   : > { %932 = vrot.lane.b32.xlu0 %v358_v2, %s4850_s11  ;;  %4646 = vrot.lane.b32.xlu1 %v4645_v3, %s4847_s29  ;;  %v5261_v2 = vand.u32 127, %v401_v59  ;;  %v688_v3 = vrot.slane %v4974_v17, 5  ;;  %v296_v59 = vld [vmem:[#allocation4 + $0xc8] sm:$0x1] }
  0xb8   : > { %v5240_v11 = vpop.permute.xlu2 %4571 }
  0xb9   : > { %7892 = vst [vmem:[#allocation20_spill] sm:$0xff] %v5240_v11  ;;  %v5242_v27 = vpop.permute.xlu1 %4521  ;;  %v5244_v10 = vpop.permute.xlu0 %4516  ;;  %vm500_vm0 = vcmp.lt.s32.totalorder %v5261_v2, 16  ;;  %v7834_v45 = vunpack.i.h.bf16 %v5240_v11  ;;  %v7832_v50 = vunpack.i.l.bf16 %v5240_v11  ;;  %vm581_vm1 = vcmp.lt.s32.totalorder %v5261_v2, 15 }
  0xba   : > { %vm403_vm2 = vcmp.lt.s32.totalorder %v5261_v2, 17  ;;  %vm662_vm5 = vcmp.lt.s32.totalorder %v5261_v2, 1  ;;  %vm743_vm6 = vcmp.lt.s32.totalorder %v5261_v2, 127  ;;  %vm824_vm7 = vcmp.lt.s32.totalorder %v5261_v2, 113 }
  0xbb   : > { %vm954_vm9 = vcmp.lt.s32.totalorder %v5261_v2, 111  ;;  %vm905_vm12 = vcmp.lt.s32.totalorder %v5261_v2, 112 }
  0xbe   : > { %4666 = vrot.lane.b32.xlu2 %v4665_v28, %s4848_s30  ;;  %v851_v28 = vrot.slane %v5005_v35, 7 }
  0xbf   : > { %4656 = vrot.lane.b32.xlu0 %v4655_v4, %s4847_s29  ;;  %4661 = vrot.lane.b32.xlu1 %v4660_v33, %s4849_s10  ;;  %v4675_v4 = vpack.i.bf16 %v688_v3, %v689_v7  ;;  %v4680_v33 = vpack.i.bf16 %v769_v8, %v770_v48  ;;  %v297_v3 = vld [vmem:[#allocation4 + $0xd0] sm:$0x1]  ;;  %v582_v7 = vsel %vm581_vm1, %v7832_v50, %v7834_v45  ;;  %v7842_v45 = vunpack.i.h.bf16 %v5227_v63 }
  0xc0   : > { %v5251_v52 = vpop.permute.xlu2 %4586 }
  0xc1   : > { %v5253_v54 = vpop.permute.xlu0 %4531  ;;  %v5255_v55 = vpop.permute.xlu1 %4536 }
  0xc2   : > { %7893 = vst [vmem:[#allocation21_spill] sm:$0xff] %v5253_v54  ;;  %v7835_v13 = vunpack.i.h.bf16 %v5253_v54  ;;  %v7833_v18 = vunpack.i.l.bf16 %v5253_v54 }
  0xc4   : > { %v501_v29 = vsel %vm500_vm0, %v7833_v18, %v7835_v13  ;;  %v1050_v18 = vrot.slane %v582_v7, 6  ;;  %v4503_v13 = vunpack.i.l.bf16 %v5227_v63  ;;  %v4543_v7 = vunpack.i.l.bf16 %v5206_v42 }
  0xc5   : > { %v1002_v34 = vrot.slane %v501_v29, 7  ;;  %v850_v29 = vrot.slane %v4974_v17, 7 }
  0xc6   : > { %946 = vrot.lane.b32.xlu2 %v365_v60, %s4850_s11  ;;  %v7837_v60 = vunpack.i.h.bf16 %v5208_v46 }
  0xc7   : > { %4671 = vrot.lane.b32.xlu0 %v4670_v14, %s4851_s12  ;;  %944 = vrot.lane.b32.xlu1 %v364_v0, %s4850_s11  ;;  %v7836_v14 = vunpack.i.l.bf16 %v5208_v46 }
  0xc8   : > { %v5272_v15 = vpop.permute.xlu2 %4601 }
  0xc9   : > { %v5274_v26 = vpop.permute.xlu0 %4546  ;;  %v5276_v6 = vpop.permute.xlu1 %4551  ;;  %v7857_v17 = vunpack.i.l.bf16 %v5272_v15 }
  0xce   : > { %893 = vrot.lane.b32.xlu2 %v851_v28, %s4851_s12  ;;  %v404_v28 = vsel %vm403_vm2, %v7836_v14, %v7837_v60 }
  0xcf   : > { %4676 = vrot.lane.b32.xlu0 %v4675_v4, %s4849_s10  ;;  %4681 = vrot.lane.b32.xlu1 %v4680_v33, %s4848_s30  ;;  %v362_v4 = vmul.f32 %v314_v5, %v296_v59  ;;  %v363_v33 = vmul.f32 %v315_v9, %v297_v3  ;;  %v1275_v50 = vsel %vm1259_vm3, %v404_v28, %v1002_v34  ;;  %v692_v5 = vrot.slane %v5059_v58, 5 }
  0xd0   : > { %v5294_v0 = vpop.permute.xlu2 %930  ;;  %v693_v9 = vrot.slane %v5043_v53, 5  ;;  %v5329_v34 = vsel %vm1276_vm4, %v1275_v50, %v1050_v18  ;;  %v7843_v3 = vunpack.i.h.bf16 %v5206_v42  ;;  %v612_v50 = vrot.slane %v5043_v53, 3  ;;  %v302_v18 = vld [vmem:[#allocation4 + $0xf8] sm:$0x1] }
  0xd1   : > { %v5303_v8 = vpop.permute.xlu0 %4561  ;;  %v5305_v48 = vpop.permute.xlu1 %4566  ;;  %7895 = vst [vmem:[#allocation23_spill] sm:$0xff] %v5329_v34  ;;  %v416_v34 = vsel %vm403_vm2, %v7852_v43, %v7851_v49 }
  0xd2   : > { %7894 = vst [vmem:[#allocation22_spill] sm:$0xff] %v5305_v48  ;;  %v4685_v60 = vpack.i.bf16 %v693_v9, %v692_v5  ;;  %v594_v44 = vsel %vm581_vm1, %v4543_v7, %v7843_v3  ;;  %v855_v3 = vrot.slane %v5043_v53, 7 }
  0xd3   : > { %v1038_v47 = vrot.slane %v594_v44, 6 }
  0xd6   : > { %940 = vrot.lane.b32.xlu2 %v362_v4, %s4850_s11 }
  0xd7   : > { %942 = vrot.lane.b32.xlu0 %v363_v33, %s4850_s11  ;;  %891 = vrot.lane.b32.xlu1 %v850_v29, %s4851_s12  ;;  %v513_v33 = vsel %vm500_vm0, %v4503_v13, %v7842_v45  ;;  %v694_v29 = vrot.slane %v5051_v56, 5  ;;  %v773_v45 = vrot.slane %v5059_v58, 6 }
  0xd8   : > { %v5326_v59 = vpop.permute.xlu2 %877  ;;  %v990_v57 = vrot.slane %v513_v33, 7  ;;  %v775_v33 = vrot.slane %v5051_v56, 6 }
  0xd9   : > { %v5333_v28 = vpop.permute.xlu0 %4576  ;;  %v5335_v4 = vpop.permute.xlu1 %4581 }
  0xda   : > { %v7846_v14 = vunpack.i.h.bf16 %v5335_v4  ;;  %v7896_v5 = vunpack.i.l.bf16 %v5335_v4  ;;  %v4690_v43 = vpack.i.bf16 %v775_v33, %v773_v45 }
  0xdc   : > { %v675_v9 = vsel %vm662_vm5, %v7896_v5, %v7846_v14 }
  0xdd   : > { %v1086_v16 = vrot.slane %v675_v9, 5  ;;  %v7856_v9 = vunpack.i.h.bf16 %v5171_v62 }
  0xde   : > { %741 = vrot.lane.b32.xlu2 %v694_v29, %s4849_s10  ;;  %v856_v29 = vrot.slane %v5051_v56, 7  ;;  %v7897_v56 = vperm.slane %v4957_v1, 7 }
  0xdf   : > { %658 = vrot.lane.b32.xlu0 %v612_v50, %s4847_s29  ;;  %4686 = vrot.lane.b32.xlu1 %v4685_v60, %s4849_s10  ;;  %v1263_v50 = vsel %vm1259_vm3, %v416_v34, %v990_v57  ;;  %v7853_v60 = vunpack.i.h.bf16 %v5272_v15 }
  0xe0   : > { %v5371_v48 = vpop.permute.xlu2 %713  ;;  %v368_v30 = vmul.f32 %v7897_v56, %v302_v18  ;;  %v4695_v57 = vpack.i.bf16 %v855_v3, %v856_v29  ;;  %v7855_v56 = vunpack.i.h.bf16 %v5255_v55  ;;  %v1280_v18 = vsel %vm1276_vm4, %v1263_v50, %v1038_v47  ;;  %v301_v50 = vld [vmem:[#allocation4 + $0xf0] sm:$0x1] }
  0xe1   : > { %v5375_v5 = vpop.permute.xlu0 %4591  ;;  %v5378_v14 = vpop.permute.xlu1 %4596  ;;  %v836_v45 = vsel %vm824_vm7, %v7857_v17, %v7853_v60  ;;  %v1297_v3 = vsel %vm1293_vm8, %v1280_v18, %v1086_v16  ;;  %v7862_v47 = vunpack.i.h.bf16 %v5333_v28 }
  0xe2   : > { %v7854_v44 = vunpack.i.h.bf16 %v5378_v14  ;;  %v7858_v49 = vunpack.i.l.bf16 %v5378_v14  ;;  %v595_v16 = vsel %vm581_vm1, %v7855_v56, %v4543_v7  ;;  %v854_v7 = vrot.slane %v5059_v58, 7 }
  0xe3   : > { %v774_v56 = vrot.slane %v5043_v53, 6  ;;  %v4578_v53 = vunpack.i.l.bf16 %v5333_v28 }
  0xe4   : > { %v755_v34 = vsel %vm743_vm6, %v7858_v49, %v7854_v44 }
  0xe5   : > { %v1134_v33 = vrot.slane %v755_v34, 3  ;;  %v1182_v34 = vrot.slane %v836_v45, 2 }
  0xe6   : > { %952 = vrot.lane.b32.xlu2 %v368_v30, %s4850_s11  ;;  %v514_v30 = vsel %vm500_vm0, %v7856_v9, %v4503_v13  ;;  %v1314_v13 = vsel %vm1310_vm10, %v1297_v3, %v5028_v41  ;;  %v7898_v41 = vperm.slane %v4957_v1, 6  ;;  %v7899_v9 = vunpack.i.l.bf16 %v5335_v4 }
  0xe7   : > { %4691 = vrot.lane.b32.xlu0 %v4690_v43, %s4848_s30  ;;  %4696 = vrot.lane.b32.xlu1 %v4695_v57, %s4851_s12  ;;  %v1331_v45 = vsel %vm1327_vm11, %v1314_v13, %v1134_v33  ;;  %v989_v49 = vrot.slane %v514_v30, 7  ;;  %v7861_v33 = vunpack.i.h.bf16 %v5184_v25  ;;  %v1037_v13 = vrot.slane %v595_v16, 6 }
  0xe8   : > { %v5411_v29 = vpop.permute.xlu2 %922  ;;  %v367_v3 = vmul.f32 %v7898_v41, %v301_v50  ;;  %v676_v17 = vsel %vm662_vm5, %v7862_v47, %v7899_v9  ;;  %v1348_v50 = vsel %vm1344_vm13, %v1331_v45, %v1182_v34  ;;  %v5451_v41 = vld [vmem:[%s7827_s2] sm:$0xff]  ;;  %v7900_v30 = vunpack.i.l.bf16 %v5199_v32  ;;  %v300_v45 = vld [vmem:[#allocation4 + $0xe8] sm:$0x1] }
  0xe9   : > { %v5417_v43 = vpop.permute.xlu0 %4606  ;;  %v5419_v57 = vpop.permute.xlu1 %928  ;;  %v1085_v9 = vrot.slane %v676_v17, 5  ;;  %v7905_v47 = vunpack.i.l.bf16 %v5272_v15 }
  0xea   : > { %v7860_v18 = vunpack.i.h.bf16 %v5417_v43  ;;  %v4608_v60 = vunpack.i.l.bf16 %v5417_v43  ;;  %v966_v44 = vsel %vm954_vm9, %v5419_v57, %v5294_v0  ;;  %v417_v16 = vsel %vm403_vm2, %v7861_v33, %v7900_v30 }
  0xeb   : > { %4241 = vmatpush.msk.msra.mxu3 %vm1259_vm3, %v966_v44 }
  0xec   : > { %v917_v44 = vsel %vm905_vm12, %v4608_v60, %v7860_v18 }
  0xed   : > { %v1230_v58 = vrot.slane %v917_v44, 1 }
  0xee   : > { %899 = vrot.lane.b32.xlu2 %v854_v7, %s4851_s12  ;;  %v1262_v7 = vsel %vm1259_vm3, %v417_v16, %v989_v49  ;;  %v4498_v49 = vunpack.i.l.bf16 %v5171_v62  ;;  %v7904_v16 = vunpack.i.l.bf16 %v5378_v14 }
  0xef   : > { %820 = vrot.lane.b32.xlu0 %v774_v56, %s4848_s30  ;;  %v1365_v18 = vsel %vm1361_vm14, %v1348_v50, %v1230_v58  ;;  %950 = vrot.lane.b32.xlu1 %v367_v3, %s4850_s11  ;;  %v1279_v44 = vsel %vm1276_vm4, %v1262_v7, %v1037_v13  ;;  %v7906_v7 = vunpack.i.h.bf16 %v5253_v54 }
  0xf0   : > { %1645 = vmatpush.msra.mxu3 %v1365_v18  ;;  %v5463_v34 = vpop.permute.xlu2 %4631  ;;  %v7903_v18 = vperm.slane %v4957_v1, 5  ;;  %v1296_v30 = vsel %vm1293_vm8, %v1279_v44, %v1085_v9  ;;  %v4538_v1 = vunpack.i.l.bf16 %v5255_v55 }
  0xf1   : > { %v5466_v17 = vpop.permute.xlu0 %4611  ;;  %v5468_v56 = vpop.permute.xlu1 %4616  ;;  %4242 = vmatmul.msk.f32.vlgmr.msra.gmra.mxu3 %vm1434_vm15, %v5451_v41  ;;  %v516_v44 = vsel %vm500_vm0, %v7906_v7, %v4498_v49  ;;  %v7907_v7 = vunpack.i.h.bf16 %v5240_v11 }
  0xf2   : > { %7901 = vst [vmem:[#allocation24_spill] sm:$0xff] %v5466_v17  ;;  %v7864_v58 = vunpack.i.l.bf16 %v5466_v17  ;;  %v7863_v3 = vunpack.i.l.bf16 %v5468_v56  ;;  %v366_v50 = vmul.f32 %v7903_v18, %v300_v45  ;;  %v5499_v18 = vld [vmem:[%s7827_s2 + $0x8] sm:$0xff] }
  0xf3   : > { %7902 = vst [vmem:[#allocation25_spill] sm:$0xff] %v5468_v56 }
  0xf4   : > { %v756_v33 = vsel %vm743_vm6, %v7864_v58, %v7904_v16  ;;  %v837_v13 = vsel %vm824_vm7, %v7863_v3, %v7905_v47  ;;  %v1313_v16 = vsel %vm1310_vm10, %v1296_v30, %v5024_v40  ;;  %v918_v47 = vsel %vm905_vm12, %v5326_v59, %v4608_v60 }
  0xf5   : > { %v1133_v45 = vrot.slane %v756_v33, 3  ;;  %v1181_v9 = vrot.slane %v837_v13, 2  ;;  %v987_v3 = vrot.slane %v516_v44, 7  ;;  %v597_v58 = vsel %vm581_vm1, %v7907_v7, %v4538_v1 }
  0xf6   : > { %v7909_v44 = vunpack.i.h.bf16 %v5171_v62  ;;  %v7911_v62 = vunpack.i.h.bf16 %v5255_v55  ;;  %v5556_v55 = vld [vmem:[%s7827_s2 + $0x10] sm:$0xff] }
  0xf7   : > { %948 = vrot.lane.b32.xlu0 %v366_v50, %s4850_s11  ;;  %v1330_v33 = vsel %vm1327_vm11, %v1313_v16, %v1133_v45  ;;  %v4458_v50 = vunpack.i.l.bf16 %v5184_v25  ;;  %v1229_v45 = vrot.slane %v918_v47, 1  ;;  %v1035_v47 = vrot.slane %v597_v58, 6 }
  0xf8   : > { %v5508_v13 = vpop.permute.xlu2 %938  ;;  %v1347_v60 = vsel %vm1344_vm13, %v1330_v33, %v1181_v9  ;;  %v515_v16 = vsel %vm500_vm0, %v4498_v49, %v7909_v44  ;;  %v7910_v33 = vunpack.i.h.bf16 %v5208_v46  ;;  %v596_v49 = vsel %vm581_vm1, %v4538_v1, %v7911_v62 }
  0xf9   : > { %v5515_v54 = vpop.permute.xlu0 %926  ;;  %v5517_v40 = vpop.permute.xlu1 %660  ;;  %4243 = vmatmul.msk.f32.gmra.mxu3 %vm1434_vm15, %v5499_v18  ;;  %v1364_v44 = vsel %vm1361_vm14, %v1347_v60, %v1229_v45  ;;  %v988_v7 = vrot.slane %v515_v16, 7  ;;  %v7913_v58 = vunpack.i.h.bf16 %v5184_v25  ;;  %v7914_v1 = vunpack.i.h.bf16 %v5180_v12 }
  0xfa   : > { %7908 = vst [vmem:[#allocation26_spill] sm:$0xff] %v5517_v40  ;;  %v967_v30 = vsel %vm954_vm9, %v5515_v54, %v5419_v57  ;;  %v678_v9 = vsel %vm662_vm5, %v5517_v40, %v4578_v53  ;;  %v419_v57 = vsel %vm403_vm2, %v7910_v33, %v4458_v50  ;;  %v7912_v40 = vunpack.i.h.bf16 %v5333_v28 }
  0xfb   : > { %4232 = vmatpush.msk.msra.mxu2 %vm1259_vm3, %v967_v30  ;;  %v1260_v11 = vsel %vm1259_vm3, %v419_v57, %v987_v3  ;;  %v1083_v46 = vrot.slane %v678_v9, 5  ;;  %v418_v3 = vsel %vm403_vm2, %v4458_v50, %v7913_v58  ;;  %v7915_v28 = vunpack.i.l.bf16 %v5180_v12 }
  0xfc   : > { %v677_v30 = vsel %vm662_vm5, %v4578_v53, %v7912_v40  ;;  %v1036_v40 = vrot.slane %v596_v49, 6  ;;  %v1277_v25 = vsel %vm1276_vm4, %v1260_v11, %v1035_v47  ;;  %v7870_v62 = vunpack.i.h.bf16 %v5468_v56  ;;  %v1386_v11 = vld [vmem:[%s7828_s3] sm:$0xff] }
  0xfd   : > { %1604 = vmatpush.msra.mxu2 %v1364_v44  ;;  %v5568_v53 = vsel %vm500_vm0, %v7915_v28, %v7914_v1  ;;  %v1084_v50 = vrot.slane %v677_v30, 5  ;;  %v4852_v49 = vmov 0   ;;  %v7917_v47 = vunpack.i.l.bf16 %v5466_v17 }
  0xfe   : > { %4233 = vmatmul.msk.f32.vlgmr.msra.gmra.mxu2 %vm1434_vm15, %v5451_v41  ;;  %4700 = vset.pattern.permute.xlu1 %v4852_v49  ;;  %v1294_v1 = vsel %vm1293_vm8, %v1277_v25, %v1083_v46  ;;  %v1261_v33 = vsel %vm1259_vm3, %v418_v3, %v988_v7  ;;  %v7918_v45 = vunpack.i.l.bf16 %v5468_v56  ;;  %v7921_v3 = vunpack.i.h.bf16 %v5466_v17 }
  0xff   : > { %v757_v30 = vsel %vm743_vm6, %v5371_v48, %v7917_v47  ;;  %1396 = vperm.xlu1 %4700, %v1386_v11   ;;  %4702 = vset.pattern.permute.xlu0 %v4852_v49  ;;  %v7919_v11 = vunpack.i.h.bf16 %v5276_v6  ;;  %v7920_v47 = vunpack.i.l.bf16 %v5276_v6  ;;  %v1278_v16 = vsel %vm1276_vm4, %v1261_v33, %v1036_v40 }
 0x100   : > { %v5574_v9 = vpop.permute.xlu2 %885  ;;  %4701 = vset.pattern.permute.xlu2 %v4852_v49  ;;  %v7923_v49 = vunpack.i.l.bf16 %v5375_v5  ;;  %v1132_v25 = vrot.slane %v757_v30, 3  ;;  %v1311_v57 = vsel %vm1310_vm10, %v1294_v1, %v4988_v22  ;;  %v7926_v30 = vunpack.i.l.bf16 %v5197_v37 }
 0x101   : > { %v795_v44 = vpop.permute.xlu0 %794  ;;  %v5579_v58 = vpop.permute.xlu1 %4621  ;;  %4244 = vmatmul.msk.f32.gmra.mxu3 %vm1434_vm15, %v5556_v55  ;;  %v590_v7 = vsel %vm581_vm1, %v7920_v47, %v7919_v11  ;;  %v1295_v11 = vsel %vm1293_vm8, %v1278_v16, %v1084_v50  ;;  %v994_v16 = vrot.slane %v5568_v53, 7  ;;  %v7925_v50 = vunpack.i.h.bf16 %v5197_v37 }
 0x102   : > { %7916 = vst [vmem:[#allocation27_spill] sm:$0xff] %v5579_v58  ;;  %v4624_v28 = vunpack.i.h.bf16 %v5579_v58  ;;  %v838_v60 = vsel %vm824_vm7, %v795_v44, %v7918_v45  ;;  %v839_v46 = vsel %vm824_vm7, %v7870_v62, %v795_v44  ;;  %v758_v45 = vsel %vm743_vm6, %v7921_v3, %v5371_v48  ;;  %v5631_v48 = vld [vmem:[%s7827_s2 + $0x18] sm:$0xff] }
 0x103   : > { %v7922_v44 = vunpack.i.h.bf16 %v5375_v5  ;;  %v1179_v47 = vrot.slane %v839_v46, 2  ;;  %v1180_v56 = vrot.slane %v838_v60, 2  ;;  %v7924_v40 = vunpack.i.l.bf16 %v5579_v58 }
 0x104   : > { %v919_v22 = vsel %vm905_vm12, %v4624_v28, %v5326_v59  ;;  %v1131_v60 = vrot.slane %v758_v45, 3  ;;  %v412_v1 = vsel %vm403_vm2, %v7926_v30, %v7925_v50  ;;  %v1042_v46 = vrot.slane %v590_v7, 6 }
 0x105   : > { %v671_v62 = vsel %vm662_vm5, %v7923_v49, %v7922_v44  ;;  %v920_v33 = vsel %vm905_vm12, %v7924_v40, %v4624_v28  ;;  %v1312_v49 = vsel %vm1310_vm10, %v1295_v11, %v4992_v23  ;;  %v1228_v28 = vrot.slane %v919_v22, 1 }
 0x106   : > { %4234 = vmatmul.msk.f32.gmra.mxu2 %vm1434_vm15, %v5499_v18  ;;  %v1090_v3 = vrot.slane %v671_v62, 5  ;;  %v1227_v59 = vrot.slane %v920_v33, 1  ;;  %v1328_v53 = vsel %vm1327_vm11, %v1311_v57, %v1131_v60  ;;  %v1329_v45 = vsel %vm1327_vm11, %v1312_v49, %v1132_v25 }
 0x107   : > { %v1345_v50 = vsel %vm1344_vm13, %v1328_v53, %v1179_v47  ;;  %v1346_v23 = vsel %vm1344_vm13, %v1329_v45, %v1180_v56  ;;  %v7873_v11 = vunpack.i.h.bf16 %v5463_v34  ;;  %v4633_v30 = vunpack.i.l.bf16 %v5463_v34 }
 0x108   : > { %v5647_v44 = vpop.permute.xlu2 %883  ;;  %v1267_v25 = vsel %vm1259_vm3, %v412_v1, %v994_v16  ;;  %v4509_v47 = vunpack.i.h.bf16 %v5225_v19  ;;  %v1362_v22 = vsel %vm1361_vm14, %v1345_v50, %v1227_v59  ;;  %v1363_v60 = vsel %vm1361_vm14, %v1346_v23, %v1228_v28  ;;  %v5685_v16 = vld [vmem:[%s7827_s2 + $0x20] sm:$0xff] }
 0x109   : > { %v925_v40 = vpop.permute.xlu0 %924  ;;  %v5651_v58 = vpop.permute.xlu1 %4626  ;;  %4245 = vmatmul.msk.f32.gmra.mxu3 %vm1434_vm15, %v5631_v48  ;;  %v4549_v49 = vunpack.i.h.bf16 %v5274_v26  ;;  %v7927_v59 = vunpack.i.l.bf16 %v5180_v12  ;;  %v4589_v28 = vunpack.i.h.bf16 %v5251_v52 }
 0x10a   : > { %v7874_v7 = vunpack.i.h.bf16 %v5651_v58  ;;  %v7875_v62 = vunpack.i.l.bf16 %v5651_v58  ;;  %v969_v33 = vsel %vm954_vm9, %v5411_v29, %v925_v40  ;;  %v968_v57 = vsel %vm954_vm9, %v925_v40, %v5515_v54 }
 0x10b   : > { %4214 = vmatpush.msk.msra.mxu0 %vm1259_vm3, %v969_v33  ;;  %4223 = vmatpush.msk.msra.mxu1 %vm1259_vm3, %v968_v57  ;;  %v1284_v54 = vsel %vm1276_vm4, %v1267_v25, %v1042_v46  ;;  %v832_v46 = vsel %vm824_vm7, %v4633_v30, %v7873_v11  ;;  %v510_v53 = vsel %vm500_vm0, %v4509_v47, %v7927_v59  ;;  %v1388_v33 = vld [vmem:[%s7828_s3 + $0x10] sm:$0xff]  ;;  %v7930_v59 = vunpack.i.l.bf16 %v5375_v5 }
 0x10c   : > { %v751_v56 = vsel %vm743_vm6, %v7875_v62, %v7874_v7  ;;  %v1301_v1 = vsel %vm1293_vm8, %v1284_v54, %v1090_v3  ;;  %1406 = vperm.xlu0 %4702, %v1388_v33   ;;  %v993_v33 = vrot.slane %v510_v53, 7  ;;  %v4548_v7 = vunpack.i.l.bf16 %v5274_v26 }
 0x10d   : > { %1522 = vmatpush.msra.mxu0 %v1362_v22  ;;  %1563 = vmatpush.msra.mxu1 %v1363_v60  ;;  %v1138_v40 = vrot.slane %v751_v56, 3  ;;  %v1318_v23 = vsel %vm1310_vm10, %v1301_v1, %v5020_v39  ;;  %v1186_v22 = vrot.slane %v832_v46, 2  ;;  %v7929_v60 = vunpack.i.l.bf16 %v5276_v6 }
 0x10e   : > { %4215 = vmatmul.msk.f32.vlgmr.msra.gmra.mxu0 %vm1434_vm15, %v5451_v41  ;;  %4224 = vmatmul.msk.f32.vlgmr.msra.gmra.mxu1 %vm1434_vm15, %v5451_v41  ;;  %v4508_v1 = vunpack.i.l.bf16 %v5225_v19  ;;  %v672_v11 = vsel %vm662_vm5, %v4589_v28, %v7930_v59  ;;  %v5746_v19 = vld [vmem:[%s7827_s2 + $0x28] sm:$0xff]  ;;  %v7931_v53 = vunpack.i.l.bf16 %v5197_v37 }
 0x10f   : > { %4235 = vmatmul.msk.f32.gmra.mxu2 %vm1434_vm15, %v5556_v55  ;;  %v591_v39 = vsel %vm581_vm1, %v4549_v49, %v7929_v60  ;;  %v1335_v54 = vsel %vm1327_vm11, %v1318_v23, %v1138_v40  ;;  %v4588_v23 = vunpack.i.l.bf16 %v5251_v52  ;;  %v1089_v59 = vrot.slane %v672_v11, 5 }
 0x110   : > { %v5701_v3 = vpop.permute.xlu2 %4651  ;;  %v1041_v62 = vrot.slane %v591_v39, 6  ;;  %v1352_v40 = vsel %vm1344_vm13, %v1335_v54, %v1186_v22  ;;  %v511_v39 = vsel %vm500_vm0, %v4508_v1, %v4509_v47  ;;  %v592_v54 = vsel %vm581_vm1, %v4548_v7, %v4549_v49  ;;  %v1389_v47 = vld [vmem:[%s7828_s3 + $0x18] sm:$0xff] }
 0x111   : > { %v5708_v45 = vpop.permute.xlu0 %4636  ;;  %v5710_v50 = vpop.permute.xlu1 %936  ;;  %4246 = vmatmul.msk.f32.gmra.mxu3 %vm1434_vm15, %v5685_v16  ;;  %1411 = vperm.xlu1 %4700, %v1389_v47   ;;  %v992_v49 = vrot.slane %v511_v39, 7  ;;  %v673_v17 = vsel %vm662_vm5, %v4588_v23, %v4589_v28 }
 0x112   : > { %7928 = vst [vmem:[#allocation28_spill] sm:$0xff] %v5708_v45  ;;  %v7876_v57 = vunpack.i.h.bf16 %v5708_v45  ;;  %v4638_v25 = vunpack.i.l.bf16 %v5708_v45  ;;  %v962_v56 = vsel %vm954_vm9, %v5710_v50, %v5508_v13  ;;  %v7933_v45 = vunpack.i.h.bf16 %v5206_v42 }
 0x113   : > { %4277 = vmatpush.msk.msrb.mxu3 %vm1259_vm3, %v962_v56  ;;  %v4469_v56 = vunpack.i.h.bf16 %v5182_v24 }
 0x114   : > { %v913_v46 = vsel %vm905_vm12, %v4638_v25, %v7876_v57  ;;  %v593_v35 = vsel %vm581_vm1, %v7933_v45, %v4548_v7  ;;  %v914_v42 = vsel %vm905_vm12, %v5574_v9, %v4638_v25 }
 0x115   : > { %v1234_v60 = vrot.slane %v913_v46, 1  ;;  %v413_v22 = vsel %vm403_vm2, %v4469_v56, %v7931_v53 }
 0x116   : > { %4216 = vmatmul.msk.f32.gmra.mxu0 %vm1434_vm15, %v5499_v18  ;;  %4225 = vmatmul.msk.f32.gmra.mxu1 %vm1434_vm15, %v5499_v18  ;;  %v1266_v11 = vsel %vm1259_vm3, %v413_v22, %v993_v33  ;;  %v7932_v22 = vunpack.i.h.bf16 %v5227_v63  ;;  %v7935_v63 = vunpack.i.l.bf16 %v5651_v58 }
 0x117   : > { %v1369_v26 = vsel %vm1361_vm14, %v1352_v40, %v1234_v60  ;;  %4236 = vmatmul.msk.f32.gmra.mxu2 %vm1434_vm15, %v5631_v48  ;;  %v4468_v40 = vunpack.i.l.bf16 %v5182_v24 }
 0x118   : > { %1809 = vmatpush.msrb.mxu3 %v1369_v26  ;;  %v5762_v52 = vpop.permute.xlu2 %4666  ;;  %v1283_v26 = vsel %vm1276_vm4, %v1266_v11, %v1041_v62  ;;  %v512_v57 = vsel %vm500_vm0, %v7932_v22, %v4508_v1  ;;  %v7934_v62 = vunpack.i.h.bf16 %v5335_v4  ;;  %v5805_v4 = vld [vmem:[%s7827_s2 + $0x30] sm:$0xff] }
 0x119   : > { %v4642_v46 = vpop.permute.xlu0 %4641  ;;  %v805_v60 = vpop.permute.xlu1 %804  ;;  %4247 = vmatmul.msk.f32.gmra.mxu3 %vm1434_vm15, %v5746_v19  ;;  %v1300_v24 = vsel %vm1293_vm8, %v1283_v26, %v1089_v59  ;;  %v414_v7 = vsel %vm403_vm2, %v4468_v40, %v4469_v56  ;;  %v991_v45 = vrot.slane %v512_v57, 7 }
 0x11a   : > { %v4643_v53 = vunpack.i.l.bf16 %v4642_v46  ;;  %v833_v33 = vsel %vm824_vm7, %v805_v60, %v4633_v30  ;;  %v1040_v30 = vrot.slane %v592_v54, 6  ;;  %v674_v39 = vsel %vm662_vm5, %v7934_v62, %v4588_v23 }
 0x11b   : > { %v4644_v11 = vunpack.i.h.bf16 %v4642_v46  ;;  %v1185_v47 = vrot.slane %v833_v33, 2  ;;  %v1317_v23 = vsel %vm1310_vm10, %v1300_v24, %v5016_v38  ;;  %v1265_v59 = vsel %vm1259_vm3, %v414_v7, %v992_v49 }
 0x11c   : > { %v752_v1 = vsel %vm743_vm6, %v4643_v53, %v7935_v63  ;;  %v1088_v54 = vrot.slane %v673_v17, 5  ;;  %v1039_v46 = vrot.slane %v593_v35, 6  ;;  %v1087_v25 = vrot.slane %v674_v39, 5  ;;  %v1393_v63 = vld [vmem:[%s7828_s3 + $0x38] sm:$0xff] }
 0x11d   : > { %v1137_v28 = vrot.slane %v752_v1, 3  ;;  %v1233_v33 = vrot.slane %v914_v42, 1  ;;  %v1282_v38 = vsel %vm1276_vm4, %v1265_v59, %v1040_v30  ;;  %v7936_v17 = vunpack.i.h.bf16 %v5199_v32  ;;  %1431 = vperm.xlu0 %4702, %v1393_v63  }
 0x11e   : > { %4217 = vmatmul.msk.f32.gmra.mxu0 %vm1434_vm15, %v5556_v55  ;;  %4226 = vmatmul.msk.f32.gmra.mxu1 %vm1434_vm15, %v5556_v55  ;;  %v753_v26 = vsel %vm743_vm6, %v4644_v11, %v4643_v53  ;;  %v7937_v49 = vunpack.i.h.bf16 %v5378_v14  ;;  %v7938_v39 = vunpack.i.h.bf16 %v5272_v15  ;;  %v7939_v59 = vunpack.i.h.bf16 %v5417_v43 }
 0x11f   : > { %v1334_v57 = vsel %vm1327_vm11, %v1317_v23, %v1137_v28  ;;  %4237 = vmatmul.msk.f32.gmra.mxu2 %vm1434_vm15, %v5685_v16  ;;  %v415_v35 = vsel %vm403_vm2, %v7936_v17, %v4468_v40  ;;  %v1136_v15 = vrot.slane %v753_v26, 3  ;;  %v1391_v23 = vld [vmem:[%s7828_s3 + $0x28] sm:$0xff]  ;;  %v4484_v63 = vunpack.i.h.bf16 %v5159_v51 }
 0x120   : > { %v5817_v56 = vpop.permute.xlu2 %946  ;;  %v754_v22 = vsel %vm743_vm6, %v7937_v49, %v4644_v11  ;;  %v1351_v30 = vsel %vm1344_vm13, %v1334_v57, %v1185_v47  ;;  %v1264_v32 = vsel %vm1259_vm3, %v415_v35, %v991_v45  ;;  %v1299_v11 = vsel %vm1293_vm8, %v1282_v38, %v1088_v54  ;;  %v5858_v45 = vld [vmem:[%s7827_s2 + $0x38] sm:$0xff]  ;;  %1421 = vperm.xlu1 %4700, %v1391_v23  }
 0x121   : > { %v935_v24 = vpop.permute.xlu0 %934  ;;  %v803_v62 = vpop.permute.xlu1 %802  ;;  %4248 = vmatmul.msk.f32.gmra.mxu3 %vm1434_vm15, %v5805_v4  ;;  %v1281_v1 = vsel %vm1276_vm4, %v1264_v32, %v1039_v46  ;;  %v1368_v28 = vsel %vm1361_vm14, %v1351_v30, %v1233_v33  ;;  %v916_v54 = vsel %vm905_vm12, %v7939_v59, %v5647_v44  ;;  %v1316_v46 = vsel %vm1310_vm10, %v1299_v11, %v4984_v21 }
 0x122   : > { %v834_v40 = vsel %vm824_vm7, %v803_v62, %v805_v60  ;;  %v835_v14 = vsel %vm824_vm7, %v7938_v39, %v803_v62  ;;  %v963_v53 = vsel %vm954_vm9, %v935_v24, %v5710_v50  ;;  %v1135_v60 = vrot.slane %v754_v22, 3 }
 0x123   : > { %4268 = vmatpush.msk.msrb.mxu2 %vm1259_vm3, %v963_v53  ;;  %v1298_v47 = vsel %vm1293_vm8, %v1281_v1, %v1087_v25  ;;  %v915_v50 = vsel %vm905_vm12, %v5647_v44, %v5574_v9  ;;  %v1183_v42 = vrot.slane %v835_v14, 2  ;;  %v1184_v7 = vrot.slane %v834_v40, 2 }
 0x124   : > { %v1315_v9 = vsel %vm1310_vm10, %v1298_v47, %v4980_v20  ;;  %v4524_v57 = vunpack.i.h.bf16 %v5242_v27  ;;  %v1232_v25 = vrot.slane %v915_v50, 1  ;;  %v1333_v33 = vsel %vm1327_vm11, %v1316_v46, %v1136_v15  ;;  %v1387_v20 = vld [vmem:[%s7828_s3 + $0x8] sm:$0xff] }
 0x125   : > { %1768 = vmatpush.msrb.mxu2 %v1368_v28  ;;  %v1332_v44 = vsel %vm1327_vm11, %v1315_v9, %v1135_v60  ;;  %v4523_v38 = vunpack.i.l.bf16 %v5242_v27  ;;  %v4564_v21 = vunpack.i.h.bf16 %v5303_v8  ;;  %v1350_v49 = vsel %vm1344_vm13, %v1333_v33, %v1184_v7  ;;  %1401 = vperm.xlu2 %4701, %v1387_v20  }
 0x126   : > { %4218 = vmatmul.msk.f32.gmra.mxu0 %vm1434_vm15, %v5631_v48  ;;  %4227 = vmatmul.msk.f32.gmra.mxu1 %vm1434_vm15, %v5631_v48  ;;  %v1349_v26 = vsel %vm1344_vm13, %v1332_v44, %v1183_v42  ;;  %v4563_v22 = vunpack.i.l.bf16 %v5303_v8  ;;  %v1231_v62 = vrot.slane %v916_v54, 1  ;;  %v4654_v40 = vunpack.i.h.bf16 %v5701_v3 }
 0x127   : > { %4238 = vmatmul.msk.f32.gmra.mxu2 %vm1434_vm15, %v5746_v19  ;;  %v4653_v39 = vunpack.i.l.bf16 %v5701_v3  ;;  %v1367_v53 = vsel %vm1361_vm14, %v1350_v49, %v1232_v25  ;;  %v4483_v1 = vunpack.i.l.bf16 %v5159_v51  ;;  %v4519_v47 = vunpack.i.h.bf16 %v5244_v10 }
 0x128   : > { %v5879_v43 = vpop.permute.xlu2 %893  ;;  %v1366_v14 = vsel %vm1361_vm14, %v1349_v26, %v1231_v62  ;;  %v4518_v59 = vunpack.i.l.bf16 %v5244_v10  ;;  %v4559_v25 = vunpack.i.h.bf16 %v5223_v61  ;;  %v4558_v44 = vunpack.i.l.bf16 %v5223_v61 }
 0x129   : > { %v933_v17 = vpop.permute.xlu0 %932  ;;  %v5888_v35 = vpop.permute.xlu1 %4646  ;;  %4249 = vmatmul.msk.f32.gmra.mxu3 %vm1434_vm15, %v5858_v45  ;;  %v667_v11 = vsel %vm662_vm5, %v4653_v39, %v4654_v40  ;;  %v408_v28 = vsel %vm403_vm2, %v4483_v1, %v4484_v63  ;;  %v4669_v33 = vunpack.i.h.bf16 %v5762_v52  ;;  %v4479_v26 = vunpack.i.h.bf16 %v5148_v31 }
 0x12a   : > { %v965_v30 = vsel %vm954_vm9, %v5294_v0, %v933_v17  ;;  %v964_v32 = vsel %vm954_vm9, %v933_v17, %v935_v24  ;;  %v505_v0 = vsel %vm500_vm0, %v4523_v38, %v4524_v57  ;;  %v586_v24 = vsel %vm581_vm1, %v4563_v22, %v4564_v21 }
 0x12b   : > { %4250 = vmatpush.msk.msrb.mxu0 %vm1259_vm3, %v965_v30  ;;  %4259 = vmatpush.msk.msrb.mxu1 %vm1259_vm3, %v964_v32  ;;  %v998_v60 = vrot.slane %v505_v0, 7  ;;  %v1046_v50 = vrot.slane %v586_v24, 6  ;;  %v1094_v54 = vrot.slane %v667_v11, 5  ;;  %v507_v61 = vsel %vm500_vm0, %v4518_v59, %v4519_v47 }
 0x12c   : > { %v4478_v62 = vunpack.i.l.bf16 %v5148_v31  ;;  %v588_v30 = vsel %vm581_vm1, %v4558_v44, %v4559_v25  ;;  %v506_v31 = vsel %vm500_vm0, %v4519_v47, %v4523_v38  ;;  %v4649_v24 = vunpack.i.h.bf16 %v5888_v35 }
 0x12d   : > { %1686 = vmatpush.msrb.mxu0 %v1366_v14  ;;  %1727 = vmatpush.msrb.mxu1 %v1367_v53  ;;  %v1271_v20 = vsel %vm1259_vm3, %v408_v28, %v998_v60  ;;  %v7940_v53 = vunpack.i.h.bf16 %v5180_v12  ;;  %v4648_v11 = vunpack.i.l.bf16 %v5888_v35  ;;  %v996_v28 = vrot.slane %v507_v61, 7 }
 0x12e   : > { %4219 = vmatmul.msk.f32.gmra.mxu0 %vm1434_vm15, %v5685_v16  ;;  %4228 = vmatmul.msk.f32.gmra.mxu1 %vm1434_vm15, %v5685_v16  ;;  %v1288_v17 = vsel %vm1276_vm4, %v1271_v20, %v1046_v50  ;;  %v7941_v50 = vunpack.i.h.bf16 %v5276_v6  ;;  %v587_v12 = vsel %vm581_vm1, %v4559_v25, %v4563_v22  ;;  %v410_v25 = vsel %vm403_vm2, %v4478_v62, %v4479_v26 }
 0x12f   : > { %4239 = vmatmul.msk.f32.gmra.mxu2 %vm1434_vm15, %v5805_v4  ;;  %v1305_v49 = vsel %vm1293_vm8, %v1288_v17, %v1094_v54  ;;  %v508_v0 = vsel %vm500_vm0, %v7940_v53, %v4518_v59  ;;  %v668_v17 = vsel %vm662_vm5, %v4649_v24, %v4653_v39  ;;  %v669_v61 = vsel %vm662_vm5, %v4648_v11, %v4649_v24 }
 0x130   : > { %v5928_v15 = vpop.permute.xlu2 %940  ;;  %v589_v38 = vsel %vm581_vm1, %v7941_v50, %v4558_v44  ;;  %v1322_v35 = vsel %vm1310_vm10, %v1305_v49, %v5009_v36  ;;  %v997_v44 = vrot.slane %v506_v31, 7  ;;  %v995_v20 = vrot.slane %v508_v0, 7  ;;  %v1390_v36 = vld [vmem:[%s7828_s3 + $0x20] sm:$0xff] }
 0x131   : > { %v5937_v42 = vpop.permute.xlu0 %4656  ;;  %v5939_v7 = vpop.permute.xlu1 %4661  ;;  %v961_v23 = vsel %vm954_vm9, %v5508_v13, %v5928_v15  ;;  %4278 = vmatmul.msk.f32.vlgmr.msrb.gmra.mxu3 %vm1434_vm15, %v5451_v41  ;;  %v4668_v13 = vunpack.i.l.bf16 %v5762_v52  ;;  %v7942_v49 = vunpack.i.h.bf16 %v5375_v5  ;;  %1416 = vperm.xlu2 %4701, %v1390_v36   ;;  %v1044_v31 = vrot.slane %v588_v30, 6 }
 0x132   : > { %v4664_v9 = vunpack.i.h.bf16 %v5939_v7  ;;  %v4663_v46 = vunpack.i.l.bf16 %v5939_v7  ;;  %4286 = vmatpush.msk.msra.mxu0 %vm1259_vm3, %v961_v23  ;;  %v1043_v53 = vrot.slane %v589_v38, 6  ;;  %v1045_v0 = vrot.slane %v587_v12, 6 }
 0x133   : > { %v828_v32 = vsel %vm824_vm7, %v4668_v13, %v4669_v33  ;;  %v409_v39 = vsel %vm403_vm2, %v4479_v26, %v4483_v1  ;;  %v7943_v5 = vunpack.i.h.bf16 %v5197_v37  ;;  %v1092_v36 = vrot.slane %v669_v61, 5 }
 0x134   : > { %v747_v10 = vsel %vm743_vm6, %v4663_v46, %v4664_v9  ;;  %v1190_v59 = vrot.slane %v828_v32, 2  ;;  %v670_v32 = vsel %vm662_vm5, %v7942_v49, %v4648_v11  ;;  %v1269_v11 = vsel %vm1259_vm3, %v410_v25, %v996_v28 }
 0x135   : > { %v1142_v14 = vrot.slane %v747_v10, 3  ;;  %v411_v24 = vsel %vm403_vm2, %v7943_v5, %v4478_v62  ;;  %v1093_v30 = vrot.slane %v668_v17, 5  ;;  %v1270_v37 = vsel %vm1259_vm3, %v409_v39, %v997_v44 }
 0x136   : > { %4220 = vmatmul.msk.f32.gmra.mxu0 %vm1434_vm15, %v5746_v19  ;;  %4229 = vmatmul.msk.f32.gmra.mxu1 %vm1434_vm15, %v5746_v19  ;;  %v1268_v26 = vsel %vm1259_vm3, %v411_v24, %v995_v20  ;;  %v1287_v38 = vsel %vm1276_vm4, %v1270_v37, %v1045_v0  ;;  %v1286_v44 = vsel %vm1276_vm4, %v1269_v11, %v1044_v31  ;;  %v1392_v31 = vld [vmem:[%s7828_s3 + $0x30] sm:$0xff] }
 0x137   : > { %4240 = vmatmul.msk.f32.gmra.mxu2 %vm1434_vm15, %v5858_v45  ;;  %v1339_v10 = vsel %vm1327_vm11, %v1322_v35, %v1142_v14  ;;  %v1285_v28 = vsel %vm1276_vm4, %v1268_v26, %v1043_v53 }
 0x138   : > { %v5990_v60 = vpop.permute.xlu2 %741  ;;  %v1356_v35 = vsel %vm1344_vm13, %v1339_v10, %v1190_v59 }
 0x139   : > { %v5998_v47 = vpop.permute.xlu0 %4671  ;;  %v6000_v23 = vpop.permute.xlu1 %944  ;;  %4279 = vmatmul.msk.f32.gmra.mxu3 %vm1434_vm15, %v5499_v18  ;;  %1426 = vperm.xlu2 %4701, %v1392_v31  }
 0x13a   : > { %v4674_v54 = vunpack.i.h.bf16 %v5998_v47  ;;  %v4673_v6 = vunpack.i.l.bf16 %v5998_v47  ;;  %v958_v22 = vsel %vm954_vm9, %v6000_v23, %v5817_v56  ;;  %v7970_v47 = vld [vmem:[#allocation15_spill] sm:$0xff] }
 0x13b   : > { %4313 = vmatpush.msk.msra.mxu3 %vm1259_vm3, %v958_v22  ;;  %v1091_v22 = vrot.slane %v670_v32, 5  ;;  %v1304_v32 = vsel %vm1293_vm8, %v1287_v38, %v1093_v30  ;;  %v7948_v38 = vld [vmem:[#allocation11_spill] sm:$0xff] }
 0x13c   : > { %v909_v14 = vsel %vm905_vm12, %v4673_v6, %v4674_v54  ;;  %v910_v49 = vsel %vm905_vm12, %v5879_v43, %v4673_v6  ;;  %v7944_v6 = vunpack.i.h.bf16 %v5651_v58 }
 0x13d   : > { %v1238_v50 = vrot.slane %v909_v14, 1  ;;  %v1302_v14 = vsel %vm1293_vm8, %v1285_v28, %v1091_v22  ;;  %v1237_v28 = vrot.slane %v910_v49, 1 }
 0x13e   : > { %4221 = vmatmul.msk.f32.gmra.mxu0 %vm1434_vm15, %v5805_v4  ;;  %4230 = vmatmul.msk.f32.gmra.mxu1 %vm1434_vm15, %v5805_v4 }
 0x13f   : > { %v1373_v1 = vsel %vm1361_vm14, %v1356_v35, %v1238_v50  ;;  %4269 = vmatmul.msk.f32.vlgmr.msrb.gmra.mxu2 %vm1434_vm15, %v5451_v41  ;;  %v7945_v35 = vunpack.i.h.bf16 %v5463_v34 }
 0x140   : > { %1973 = vmatpush.msra.mxu3 %v1373_v1  ;;  %v6052_v62 = vpop.permute.xlu2 %952  ;;  %v7947_v1 = vld [vmem:[#allocation10_spill] sm:$0xff] }
 0x141   : > { %v4677_v12 = vpop.permute.xlu0 %4676  ;;  %v4682_v59 = vpop.permute.xlu1 %4681  ;;  %v970_v25 = vsel %vm954_vm9, %v6052_v62, %v5411_v29  ;;  %4280 = vmatmul.msk.f32.gmra.mxu3 %vm1434_vm15, %v5556_v55  ;;  %v1303_v29 = vsel %vm1293_vm8, %v1286_v44, %v1092_v36  ;;  %v7946_v36 = vld [vmem:[#allocation12_spill] sm:$0xff]  ;;  %v1319_v37 = vsel %vm1310_vm10, %v1302_v14, %v7947_v1 }
 0x142   : > { %v4679_v20 = vunpack.i.h.bf16 %v4677_v12  ;;  %v4678_v10 = vunpack.i.l.bf16 %v4677_v12  ;;  %v4684_v17 = vunpack.i.h.bf16 %v4682_v59  ;;  %v4683_v61 = vunpack.i.l.bf16 %v4682_v59  ;;  %4349 = vmatpush.msk.msrb.mxu3 %vm1259_vm3, %v970_v25 }
 0x143   : > { %v1321_v30 = vsel %vm1310_vm10, %v1304_v32, %v7946_v36  ;;  %v1320_v12 = vsel %vm1310_vm10, %v1303_v29, %v7948_v38  ;;  %v7949_v32 = vld [vmem:[#allocation28_spill] sm:$0xff] }
 0x144   : > { %v748_v53 = vsel %vm743_vm6, %v4678_v10, %v4663_v46  ;;  %v749_v0 = vsel %vm743_vm6, %v4679_v20, %v4678_v10  ;;  %v750_v50 = vsel %vm743_vm6, %v7944_v6, %v4679_v20  ;;  %v829_v39 = vsel %vm824_vm7, %v4683_v61, %v4668_v13 }
 0x145   : > { %v1139_v5 = vrot.slane %v750_v50, 3  ;;  %v1140_v24 = vrot.slane %v749_v0, 3  ;;  %v1141_v11 = vrot.slane %v748_v53, 3  ;;  %v830_v46 = vsel %vm824_vm7, %v4684_v17, %v4683_v61  ;;  %v7951_v50 = vld [vmem:[#allocation17_spill] sm:$0xff] }
 0x146   : > { %v831_v58 = vsel %vm824_vm7, %v7945_v35, %v4684_v17  ;;  %v1189_v22 = vrot.slane %v829_v39, 2  ;;  %4222 = vmatmul.msk.f32.gmra.mxu0 %vm1434_vm15, %v5858_v45  ;;  %4231 = vmatmul.msk.f32.gmra.mxu1 %vm1434_vm15, %v5858_v45  ;;  %v1188_v34 = vrot.slane %v830_v46, 2  ;;  %v7950_v14 = vunpack.i.h.bf16 %v7949_v32  ;;  %v7953_v46 = vld [vmem:[#allocation21_spill] sm:$0xff]  ;;  %v7959_v32 = vld [vmem:[#allocation18_spill] sm:$0xff] }
 0x147   : > { %v1338_v13 = vsel %vm1327_vm11, %v1321_v30, %v1141_v11  ;;  %v1187_v26 = vrot.slane %v831_v58, 2  ;;  %4270 = vmatmul.msk.f32.gmra.mxu2 %vm1434_vm15, %v5499_v18  ;;  %v1336_v20 = vsel %vm1327_vm11, %v1319_v37, %v1139_v5  ;;  %v1337_v10 = vsel %vm1327_vm11, %v1320_v12, %v1140_v24  ;;  %v7952_v24 = vld [vmem:[#allocation22_spill] sm:$0xff]  ;;  %v7956_v37 = vld [vmem:[#allocation19_spill] sm:$0xff] }
 0x148   : > { %v1355_v44 = vsel %vm1344_vm13, %v1338_v13, %v1189_v22  ;;  %v4529_v39 = vunpack.i.h.bf16 %v7951_v50  ;;  %v4528_v5 = vunpack.i.l.bf16 %v7951_v50  ;;  %v4569_v11 = vunpack.i.h.bf16 %v7952_v24  ;;  %v7955_v13 = vld [vmem:[#allocation26_spill] sm:$0xff] }
 0x149   : > { %v943_v59 = vpop.permute.xlu0 %942  ;;  %v892_v25 = vpop.permute.xlu1 %891  ;;  %4281 = vmatmul.msk.f32.gmra.mxu3 %vm1434_vm15, %v5631_v48  ;;  %v1353_v0 = vsel %vm1344_vm13, %v1336_v20, %v1187_v26  ;;  %v7954_v35 = vunpack.i.l.bf16 %v7953_v46  ;;  %v4568_v30 = vunpack.i.l.bf16 %v7952_v24  ;;  %v4489_v26 = vunpack.i.h.bf16 %v7956_v37 }
 0x14a   : > { %v959_v17 = vsel %vm954_vm9, %v943_v59, %v6000_v23  ;;  %v960_v61 = vsel %vm954_vm9, %v5928_v15, %v943_v59  ;;  %v911_v49 = vsel %vm905_vm12, %v892_v25, %v5879_v43  ;;  %v912_v29 = vsel %vm905_vm12, %v7950_v14, %v892_v25 }
 0x14b   : > { %v1235_v31 = vrot.slane %v912_v29, 1  ;;  %v1236_v53 = vrot.slane %v911_v49, 1  ;;  %4304 = vmatpush.msk.msra.mxu2 %vm1259_vm3, %v959_v17  ;;  %4295 = vmatpush.msk.msra.mxu1 %vm1259_vm3, %v960_v61  ;;  %v1372_v23 = vsel %vm1361_vm14, %v1355_v44, %v1237_v28  ;;  %v1354_v15 = vsel %vm1344_vm13, %v1337_v10, %v1188_v34  ;;  %v7957_v28 = vld [vmem:[#allocation20_spill] sm:$0xff] }
 0x14c   : > { %v502_v58 = vsel %vm500_vm0, %v4529_v39, %v7954_v35  ;;  %v503_v1 = vsel %vm500_vm0, %v4528_v5, %v4529_v39  ;;  %v4488_v34 = vunpack.i.l.bf16 %v7956_v37  ;;  %v7958_v38 = vunpack.i.l.bf16 %v7957_v28 }
 0x14d   : > { %1932 = vmatpush.msra.mxu2 %v1372_v23  ;;  %v1370_v43 = vsel %vm1361_vm14, %v1353_v0, %v1235_v31  ;;  %v1371_v6 = vsel %vm1361_vm14, %v1354_v15, %v1236_v53  ;;  %v1001_v59 = vrot.slane %v502_v58, 7  ;;  %v504_v44 = vsel %vm500_vm0, %v4524_v57, %v4528_v5  ;;  %v7961_v23 = vld [vmem:[#allocation23_spill] sm:$0xff] }
 0x14e   : > { %1850 = vmatpush.msra.mxu0 %v1370_v43  ;;  %1891 = vmatpush.msra.mxu1 %v1371_v6  ;;  %v583_v12 = vsel %vm581_vm1, %v4569_v11, %v7958_v38  ;;  %v4659_v20 = vunpack.i.h.bf16 %v5937_v42  ;;  %v1000_v10 = vrot.slane %v503_v1, 7  ;;  %v584_v17 = vsel %vm581_vm1, %v4568_v30, %v4569_v11  ;;  %v7962_v43 = vld [vmem:[#allocation24_spill] sm:$0xff]  ;;  %v7965_v1 = vld [vmem:[#allocation25_spill] sm:$0xff] }
 0x14f   : > { %4251 = vmatmul.msk.f32.vlgmr.msrb.gmra.mxu0 %vm1434_vm15, %v5451_v41  ;;  %4260 = vmatmul.msk.f32.vlgmr.msrb.gmra.mxu1 %vm1434_vm15, %v5451_v41  ;;  %v585_v61 = vsel %vm581_vm1, %v4564_v21, %v4568_v30  ;;  %v1049_v49 = vrot.slane %v583_v12, 6  ;;  %v7960_v14 = vunpack.i.l.bf16 %v7959_v32  ;;  %v406_v57 = vsel %vm403_vm2, %v4488_v34, %v4489_v26 }
 0x150   : > { %4271 = vmatmul.msk.f32.gmra.mxu2 %vm1434_vm15, %v5556_v55  ;;  %v4658_v29 = vunpack.i.l.bf16 %v5937_v42  ;;  %v407_v8 = vsel %vm403_vm2, %v4484_v63, %v4488_v34  ;;  %v999_v21 = vrot.slane %v504_v44, 7  ;;  %v1047_v0 = vrot.slane %v585_v61, 6  ;;  %v7967_v34 = vld [vmem:[#allocation27_spill] sm:$0xff] }
 0x151   : > { %v659_v22 = vpop.permute.xlu0 %658  ;;  %v6144_v36 = vpop.permute.xlu1 %4686  ;;  %4282 = vmatmul.msk.f32.gmra.mxu3 %vm1434_vm15, %v5685_v16  ;;  %v405_v27 = vsel %vm403_vm2, %v4489_v26, %v7960_v14  ;;  %v1048_v15 = vrot.slane %v584_v17, 6  ;;  %v7963_v6 = vunpack.i.h.bf16 %v7962_v43  ;;  %v7966_v37 = vunpack.i.h.bf16 %v7965_v1 }
 0x152   : > { %v663_v41 = vsel %vm662_vm5, %v659_v22, %v7955_v13  ;;  %v664_v31 = vsel %vm662_vm5, %v4659_v20, %v659_v22  ;;  %v1274_v53 = vsel %vm1259_vm3, %v405_v27, %v1001_v59  ;;  %v665_v46 = vsel %vm662_vm5, %v4658_v29, %v4659_v20  ;;  %v7964_v22 = vld [vmem:[#allocation14_spill] sm:$0xff]  ;;  %v900_v27 = vpop.permute.xlu2 %899 }
 0x153   : > { %v1098_v25 = vrot.slane %v663_v41, 5  ;;  %v759_v51 = vsel %vm743_vm6, %v5990_v60, %v7963_v6  ;;  %v1097_v39 = vrot.slane %v664_v31, 5  ;;  %v1291_v5 = vsel %vm1276_vm4, %v1274_v53, %v1049_v49 }
 0x154   : > { %v666_v35 = vsel %vm662_vm5, %v4654_v40, %v4658_v29  ;;  %v1146_v13 = vrot.slane %v759_v51, 3  ;;  %v4688_v41 = vunpack.i.l.bf16 %v6144_v36  ;;  %v7968_v28 = vunpack.i.l.bf16 %v7967_v34 }
 0x155   : > { %v1309_v42 = vsel %vm1293_vm8, %v7961_v23, %v1098_v25  ;;  %v1273_v25 = vsel %vm1259_vm3, %v406_v57, %v1000_v10  ;;  %v1308_v44 = vsel %vm1293_vm8, %v1291_v5, %v1097_v39  ;;  %v1095_v17 = vrot.slane %v666_v35, 5  ;;  %v7969_v23 = vld [vmem:[#allocation13_spill] sm:$0xff] }
 0x156   : > { %v1326_v30 = vsel %vm1310_vm10, %v1309_v42, %v7964_v22  ;;  %v1096_v61 = vrot.slane %v665_v46, 5  ;;  %v1290_v32 = vsel %vm1276_vm4, %v1273_v25, %v1048_v15  ;;  %v746_v31 = vsel %vm743_vm6, %v4664_v9, %v4688_v41  ;;  %v7971_v46 = vld [vmem:[#allocation16_spill] sm:$0xff] }
 0x157   : > { %4252 = vmatmul.msk.f32.gmra.mxu0 %vm1434_vm15, %v5499_v18  ;;  %4261 = vmatmul.msk.f32.gmra.mxu1 %vm1434_vm15, %v5499_v18  ;;  %v4689_v18 = vunpack.i.h.bf16 %v6144_v36  ;;  %v1272_v36 = vsel %vm1259_vm3, %v407_v8, %v999_v21  ;;  %v1343_v20 = vsel %vm1327_vm11, %v1326_v30, %v1146_v13  ;;  %v1325_v42 = vsel %vm1310_vm10, %v1308_v44, %v7969_v23 }
 0x158   : > { %4272 = vmatmul.msk.f32.gmra.mxu2 %vm1434_vm15, %v5631_v48  ;;  %v1289_v10 = vsel %vm1276_vm4, %v1272_v36, %v1047_v0  ;;  %v4060_v0 = vld [vmem:[#allocation3] sm:$0x1]  ;;  %v1307_v6 = vsel %vm1293_vm8, %v1290_v32, %v1096_v61  ;;  %v1143_v51 = vrot.slane %v746_v31, 3  ;;  %v6387_v31 = vld [vmem:[%s7827_s2 + $0x10] sm:$0xff] }
 0x159   : > { %v4692_v63 = vpop.permute.xlu0 %4691  ;;  %v4697_v50 = vpop.permute.xlu1 %4696  ;;  %4283 = vmatmul.msk.f32.gmra.mxu3 %vm1434_vm15, %v5746_v19  ;;  %v744_v40 = vsel %vm743_vm6, %v4689_v18, %v5990_v60  ;;  %v745_v29 = vsel %vm743_vm6, %v4688_v41, %v4689_v18  ;;  %4063 = vperm.xlu2 %4701, %v4060_v0   ;;  %v1306_v43 = vsel %vm1293_vm8, %v1289_v10, %v1095_v17 }
 0x15a   : > { %v4694_v24 = vunpack.i.h.bf16 %v4692_v63  ;;  %v4698_v11 = vunpack.i.l.bf16 %v4697_v50  ;;  %v4699_v58 = vunpack.i.h.bf16 %v4697_v50  ;;  %v4693_v38 = vunpack.i.l.bf16 %v4692_v63 }
 0x15b   : > { %v1145_v14 = vrot.slane %v744_v40, 3  ;;  %v1144_v18 = vrot.slane %v745_v29, 3  ;;  %v908_v63 = vsel %vm905_vm12, %v4674_v54, %v900_v27  ;;  %v1323_v54 = vsel %vm1310_vm10, %v1306_v43, %v7970_v47 }
 0x15c   : > { %v840_v26 = vsel %vm824_vm7, %v4694_v24, %v7966_v37  ;;  %v921_v3 = vsel %vm905_vm12, %v4698_v11, %v7968_v28  ;;  %v906_v49 = vsel %vm905_vm12, %v4699_v58, %v4698_v11  ;;  %v827_v8 = vsel %vm824_vm7, %v4669_v33, %v4693_v38 }
 0x15d   : > { %v1194_v12 = vrot.slane %v840_v26, 2  ;;  %v1242_v59 = vrot.slane %v921_v3, 1  ;;  %v1241_v33 = vrot.slane %v906_v49, 1  ;;  %v1342_v50 = vsel %vm1327_vm11, %v1325_v42, %v1145_v14 }
 0x15e   : > { %v1191_v39 = vrot.slane %v827_v8, 2  ;;  %v1324_v35 = vsel %vm1310_vm10, %v1307_v6, %v7971_v46  ;;  %v1239_v22 = vrot.slane %v908_v63, 1 }
 0x15f   : > { %4253 = vmatmul.msk.f32.gmra.mxu0 %vm1434_vm15, %v5556_v55  ;;  %4262 = vmatmul.msk.f32.gmra.mxu1 %vm1434_vm15, %v5556_v55  ;;  %v1360_v60 = vsel %vm1344_vm13, %v1343_v20, %v1194_v12  ;;  %v1341_v13 = vsel %vm1327_vm11, %v1324_v35, %v1144_v18 }
 0x160   : > { %4273 = vmatmul.msk.f32.gmra.mxu2 %vm1434_vm15, %v5685_v16  ;;  %v1377_v57 = vsel %vm1361_vm14, %v1360_v60, %v1242_v59 }
 0x161   : > { %v821_v21 = vpop.permute.xlu0 %820  ;;  %4284 = vmatmul.msk.f32.gmra.mxu3 %vm1434_vm15, %v5805_v4  ;;  %v951_v53 = vpop.permute.xlu1 %950 }
 0x162   : > { %v825_v7 = vsel %vm824_vm7, %v821_v21, %v4694_v24  ;;  %v826_v9 = vsel %vm824_vm7, %v4693_v38, %v821_v21  ;;  %2137 = vmatpush.msrb.mxu3 %v1377_v57  ;;  %v955_v52 = vsel %vm954_vm9, %v951_v53, %v6052_v62  ;;  %v907_v62 = vsel %vm905_vm12, %v900_v27, %v4699_v58  ;;  %v6320_v38 = vld [vmem:[%s7827_s2 + $0x8] sm:$0xff] }
 0x163   : > { %v1193_v15 = vrot.slane %v825_v7, 2  ;;  %4340 = vmatpush.msk.msrb.mxu2 %vm1259_vm3, %v955_v52  ;;  %v1192_v5 = vrot.slane %v826_v9, 2  ;;  %v1240_v30 = vrot.slane %v907_v62, 1  ;;  %v1340_v58 = vsel %vm1327_vm11, %v1323_v54, %v1143_v51 }
 0x164   : > { %v1357_v1 = vsel %vm1344_vm13, %v1340_v58, %v1191_v39 }
 0x165   : > { %v1359_v24 = vsel %vm1344_vm13, %v1342_v50, %v1193_v15  ;;  %v1358_v37 = vsel %vm1344_vm13, %v1341_v13, %v1192_v5  ;;  %v1374_v28 = vsel %vm1361_vm14, %v1357_v1, %v1239_v22 }
 0x166   : > { %v1376_v11 = vsel %vm1361_vm14, %v1359_v24, %v1241_v33  ;;  %v1375_v3 = vsel %vm1361_vm14, %v1358_v37, %v1240_v30 }
 0x167   : > { %4254 = vmatmul.msk.f32.gmra.mxu0 %vm1434_vm15, %v5631_v48  ;;  %4263 = vmatmul.msk.f32.gmra.mxu1 %vm1434_vm15, %v5631_v48 }
 0x168   : > { %4274 = vmatmul.msk.f32.gmra.mxu2 %vm1434_vm15, %v5746_v19 }
 0x169   : > { %2096 = vmatpush.msrb.mxu2 %v1376_v11  ;;  %v949_v41 = vpop.permute.xlu0 %948  ;;  %4285 = vmatmul.msk.f32.gmra.mxu3 %vm1434_vm15, %v5858_v45 }
 0x16a   : > { %v956_v26 = vsel %vm954_vm9, %v949_v41, %v951_v53  ;;  %v957_v34 = vsel %vm954_vm9, %v5817_v56, %v949_v41  ;;  %v6305_v56 = vld [vmem:[%s7827_s2] sm:$0xff] }
 0x16b   : > { %4322 = vmatpush.msk.msrb.mxu0 %vm1259_vm3, %v957_v34  ;;  %4331 = vmatpush.msk.msrb.mxu1 %vm1259_vm3, %v956_v26  ;;  %vm2549_vm3 = vcmask 523264  }
 0x16d   : > { %2014 = vmatpush.msrb.mxu0 %v1374_v28  ;;  %2055 = vmatpush.msrb.mxu1 %v1375_v3 }
 0x16f   : > { %4255 = vmatmul.msk.f32.gmra.mxu0 %vm1434_vm15, %v5685_v16  ;;  %4264 = vmatmul.msk.f32.gmra.mxu1 %vm1434_vm15, %v5685_v16 }
 0x170   : > { %4275 = vmatmul.msk.f32.gmra.mxu2 %vm1434_vm15, %v5805_v4 }
 0x171   : > { %4314 = vmatmul.msk.f32.vlgmr.msra.gmra.mxu3 %vm1434_vm15, %v6305_v56  ;;  %v6378_v14 = vpop.permute.xlu1 %1396 }
 0x174   : > { %v6309_v40 = vpop.f32.mrf.mxu3 }
 0x175   : > { %v1648_v41 = vadd.f32 %v6309_v40, %v6378_v14 }
 0x177   : > { %4256 = vmatmul.msk.f32.gmra.mxu0 %vm1434_vm15, %v5746_v19  ;;  %4265 = vmatmul.msk.f32.gmra.mxu1 %vm1434_vm15, %v5746_v19 }
 0x178   : > { %4276 = vmatmul.msk.f32.gmra.mxu2 %vm1434_vm15, %v5858_v45 }
 0x179   : > { %4315 = vmatmul.msk.f32.gmra.mxu3 %vm1434_vm15, %v6320_v38 }
 0x17c   : > { %v6324_v12 = vpop.f32.mrf.mxu3 }
 0x17e   : > { %v6399_v21 = vpop.permute.xlu0 %1406 }
 0x17f   : > { %4257 = vmatmul.msk.f32.gmra.mxu0 %vm1434_vm15, %v5805_v4  ;;  %4266 = vmatmul.msk.f32.gmra.mxu1 %vm1434_vm15, %v5805_v4  ;;  %v6370_v32 = vpop.permute.xlu2 %1401 }
 0x180   : > { %4305 = vmatmul.msk.f32.vlgmr.msra.gmra.mxu2 %vm1434_vm15, %v6305_v56  ;;  %v1651_v30 = vadd.f32 %v6324_v12, %v6370_v32 }
 0x181   : > { %v6332_v59 = vpop.f32.mrf.mxu2  ;;  %4316 = vmatmul.msk.f32.gmra.mxu3 %vm1434_vm15, %v5556_v55 }
 0x182   : > { %v2182_v13 = vmax.f32 %v1651_v30, 0.0 }
 0x183   : > { %v6403_v23 = vpop.permute.xlu1 %1411 }
 0x184   : > { %v6336_v25 = vpop.f32.mrf.mxu3 }
 0x187   : > { %4258 = vmatmul.msk.f32.gmra.mxu0 %vm1434_vm15, %v5858_v45  ;;  %4267 = vmatmul.msk.f32.gmra.mxu1 %vm1434_vm15, %v5858_v45 }
 0x188   : > { %4306 = vmatmul.msk.f32.gmra.mxu2 %vm1434_vm15, %v6320_v38 }
 0x189   : > { %v6344_v36 = vpop.f32.mrf.mxu2  ;;  %4317 = vmatmul.msk.f32.gmra.mxu3 %vm1434_vm15, %v5631_v48 }
 0x18b   : > { %v6348_v44 = vpop.f32.mrf.mxu0  ;;  %v6350_v20 = vpop.f32.mrf.mxu1 }
 0x18c   : > { %v1656_v17 = vpop.f32.mrf.mxu3  ;;  %v6393_v8 = vpop.permute.xlu2 %1416 }
 0x18d   : > { %v1657_v24 = vadd.f32 %v1656_v17, %v6403_v23 }
 0x18f   : > { %4287 = vmatmul.msk.f32.vlgmr.msra.gmra.mxu0 %vm1434_vm15, %v6305_v56  ;;  %4296 = vmatmul.msk.f32.vlgmr.msra.gmra.mxu1 %vm1434_vm15, %v6305_v56  ;;  %v6419_v52 = vpop.permute.xlu0 %1431  ;;  %v2214_v22 = vmax.f32 %v1657_v24, 0.0 }
 0x190   : > { %4307 = vmatmul.msk.f32.gmra.mxu2 %vm1434_vm15, %v5556_v55 }
 0x191   : > { %4318 = vmatmul.msk.f32.gmra.mxu3 %vm1434_vm15, %v5685_v16 }
 0x192   : > { %v6360_v61 = vpop.f32.mrf.mxu2  ;;  %v6421_v15 = vpop.permute.xlu1 %1421 }
 0x193   : > { %v6362_v49 = vpop.f32.mrf.mxu0  ;;  %v6364_v60 = vpop.f32.mrf.mxu1 }
 0x194   : > { %v1659_v10 = vpop.f32.mrf.mxu3  ;;  %v6417_v9 = vpop.permute.xlu2 %1426 }
 0x195   : > { %v1660_v62 = vadd.f32 %v1659_v10, %v6393_v8 }
 0x197   : > { %4288 = vmatmul.msk.f32.gmra.mxu0 %vm1434_vm15, %v6320_v38  ;;  %4297 = vmatmul.msk.f32.gmra.mxu1 %vm1434_vm15, %v6320_v38  ;;  %v2230_v46 = vmax.f32 %v1660_v62, 0.0 }
 0x198   : > { %4308 = vmatmul.msk.f32.gmra.mxu2 %vm1434_vm15, %v5631_v48 }
 0x199   : > { %4319 = vmatmul.msk.f32.gmra.mxu3 %vm1434_vm15, %v5746_v19 }
 0x19a   : > { %v6376_v55 = vpop.f32.mrf.mxu2 }
 0x19b   : > { %v6380_v27 = vpop.f32.mrf.mxu0  ;;  %v6382_v57 = vpop.f32.mrf.mxu1 }
 0x19c   : > { %v1662_v29 = vpop.f32.mrf.mxu3 }
 0x19d   : > { %v1663_v63 = vadd.f32 %v1662_v29, %v6421_v15 }
 0x19f   : > { %4289 = vmatmul.msk.f32.gmra.mxu0 %vm1434_vm15, %v6387_v31  ;;  %4298 = vmatmul.msk.f32.gmra.mxu1 %vm1434_vm15, %v6387_v31  ;;  %v2246_v5 = vmax.f32 %v1663_v63, 0.0 }
 0x1a0   : > { %4309 = vmatmul.msk.f32.gmra.mxu2 %vm1434_vm15, %v5685_v16 }
 0x1a1   : > { %4320 = vmatmul.msk.f32.gmra.mxu3 %vm1434_vm15, %v5805_v4 }
 0x1a2   : > { %v6401_v53 = vpop.f32.mrf.mxu2 }
 0x1a3   : > { %v6405_v42 = vpop.f32.mrf.mxu0  ;;  %v6407_v0 = vpop.f32.mrf.mxu1  ;;  %v1619_v10 = vadd.f32 %v6401_v53, %v6393_v8 }
 0x1a4   : > { %v1665_v7 = vpop.f32.mrf.mxu3 }
 0x1a5   : > { %v1666_v51 = vadd.f32 %v1665_v7, %v6417_v9  ;;  %v1616_v7 = vadd.f32 %v6376_v55, %v6403_v23  ;;  %v2229_v63 = vmax.f32 %v1619_v10, 0.0  ;;  %v1525_v10 = vadd.f32 %v6348_v44, %v6378_v14 }
 0x1a7   : > { %4290 = vmatmul.msk.f32.gmra.mxu0 %vm1434_vm15, %v5631_v48  ;;  %4299 = vmatmul.msk.f32.gmra.mxu1 %vm1434_vm15, %v5631_v48  ;;  %v2262_v39 = vmax.f32 %v1666_v51, 0.0  ;;  %v2213_v55 = vmax.f32 %v1616_v7, 0.0 }
 0x1a8   : > { %4310 = vmatmul.msk.f32.gmra.mxu2 %vm1434_vm15, %v5746_v19 }
 0x1a9   : > { %4321 = vmatmul.msk.f32.gmra.mxu3 %vm1434_vm15, %v5858_v45 }
 0x1aa   : > { %v1621_v33 = vpop.f32.mrf.mxu2 }
 0x1ab   : > { %v6423_v43 = vpop.f32.mrf.mxu0  ;;  %v6425_v6 = vpop.f32.mrf.mxu1  ;;  %v1622_v3 = vadd.f32 %v1621_v33, %v6421_v15 }
 0x1ac   : > { %v1668_v48 = vpop.f32.mrf.mxu3  ;;  %v1537_v30 = vadd.f32 %v6423_v43, %v6393_v8  ;;  %v1534_v43 = vadd.f32 %v6405_v42, %v6403_v23 }
 0x1ad   : > { %v1669_v18 = vadd.f32 %v1668_v48, %v6419_v52  ;;  %v2245_v17 = vmax.f32 %v1622_v3, 0.0  ;;  %v1572_v3 = vadd.f32 %v6382_v57, %v6399_v21  ;;  %v4707_v57 = vld [vmem:[%s7827_s2 + $0x20] sm:$0xff] }
 0x1af   : > { %4291 = vmatmul.msk.f32.gmra.mxu0 %vm1434_vm15, %v5685_v16  ;;  %4300 = vmatmul.msk.f32.gmra.mxu1 %vm1434_vm15, %v5685_v16  ;;  %v2278_v50 = vmax.f32 %v1669_v18, 0.0  ;;  %v1654_v16 = vadd.f32 %v6336_v25, %v6399_v21  ;;  %v2166_v25 = vmax.f32 %v1648_v41, 0.0 }
 0x1b0   : > { %4311 = vmatmul.msk.f32.gmra.mxu2 %vm1434_vm15, %v5805_v4 }
 0x1b1   : > { %4350 = vmatmul.msk.f32.vlgmr.msrb.gmra.mxu3 %vm1434_vm15, %v6305_v56  ;;  %v2198_v58 = vmax.f32 %v1654_v16, 0.0  ;;  %v6496_v16 = vld [vmem:[%s7827_s2 + $0x18] sm:$0xff] }
 0x1b2   : > { %2633 = vmatpush.msra.mxu3 %v2278_v50  ;;  %v1624_v11 = vpop.f32.mrf.mxu2 }
 0x1b3   : > { %v1539_v47 = vpop.f32.mrf.mxu0  ;;  %v1580_v54 = vpop.f32.mrf.mxu1  ;;  %v1625_v37 = vadd.f32 %v1624_v11, %v6417_v9 }
 0x1b4   : > { %2634 = vmatpush.msra.mxu3 %v2262_v39  ;;  %v6442_v35 = vpop.f32.mrf.mxu3  ;;  %v1613_v39 = vadd.f32 %v6360_v61, %v6399_v21  ;;  %v1540_v24 = vadd.f32 %v1539_v47, %v6421_v15  ;;  %v1581_v11 = vadd.f32 %v1580_v54, %v6421_v15  ;;  %v1610_v61 = vadd.f32 %v6344_v36, %v6370_v32 }
 0x1b5   : > { %v2261_v40 = vmax.f32 %v1625_v37, 0.0  ;;  %v1578_v36 = vadd.f32 %v6425_v6, %v6393_v8  ;;  %v1575_v6 = vadd.f32 %v6407_v0, %v6403_v23  ;;  %v2211_v0 = vmax.f32 %v1534_v43, 0.0 }
 0x1b6   : > { %2635 = vmatpush.msra.mxu3 %v2246_v5  ;;  %v2197_v54 = vmax.f32 %v1613_v39, 0.0  ;;  %v2244_v41 = vmax.f32 %v1581_v11, 0.0 }
 0x1b7   : > { %4292 = vmatmul.msk.f32.gmra.mxu0 %vm1434_vm15, %v5746_v19  ;;  %4301 = vmatmul.msk.f32.gmra.mxu1 %vm1434_vm15, %v5746_v19 }
 0x1b8   : > { %4312 = vmatmul.msk.f32.gmra.mxu2 %vm1434_vm15, %v5858_v45  ;;  %2636 = vmatpush.msra.mxu3 %v2230_v46 }
 0x1b9   : > { %4351 = vmatmul.msk.f32.gmra.mxu3 %vm1434_vm15, %v6320_v38 }
 0x1ba   : > { %2637 = vmatpush.msra.mxu3 %v2214_v22  ;;  %v1627_v1 = vpop.f32.mrf.mxu2  ;;  %v2243_v22 = vmax.f32 %v1540_v24, 0.0 }
 0x1bb   : > { %v1542_v26 = vpop.f32.mrf.mxu0  ;;  %v1583_v34 = vpop.f32.mrf.mxu1  ;;  %v1628_v19 = vadd.f32 %v1627_v1, %v6419_v52  ;;  %v1607_v1 = vadd.f32 %v6332_v59, %v6378_v14  ;;  %v1531_v59 = vadd.f32 %v6380_v27, %v6399_v21  ;;  %v1569_v27 = vadd.f32 %v6364_v60, %v6370_v32 }
 0x1bc   : > { %2638 = vmatpush.msra.mxu3 %v2198_v58  ;;  %v6458_v28 = vpop.f32.mrf.mxu3  ;;  %v1543_v50 = vadd.f32 %v1542_v26, %v6417_v9  ;;  %v1584_v53 = vadd.f32 %v1583_v34, %v6417_v9  ;;  %v2181_v26 = vmax.f32 %v1610_v61, 0.0  ;;  %v2227_v34 = vmax.f32 %v1537_v30, 0.0 }
 0x1bd   : > { %v2277_v12 = vmax.f32 %v1628_v19, 0.0  ;;  %v2228_v19 = vmax.f32 %v1578_v36, 0.0  ;;  %v2165_v42 = vmax.f32 %v1607_v1, 0.0  ;;  %v1566_v60 = vadd.f32 %v6350_v20, %v6378_v14  ;;  %v4708_v20 = vld [vmem:[%s7827_s2 + $0x28] sm:$0xff] }
 0x1be   : > { %2639 = vmatpush.msra.mxu3 %v2182_v13  ;;  %v2259_v46 = vmax.f32 %v1543_v50, 0.0 }
 0x1bf   : > { %4293 = vmatmul.msk.f32.gmra.mxu0 %vm1434_vm15, %v5805_v4  ;;  %4302 = vmatmul.msk.f32.gmra.mxu1 %vm1434_vm15, %v5805_v4  ;;  %v2164_v44 = vmax.f32 %v1566_v60, 0.0 }
 0x1c0   : > { %4341 = vmatmul.msk.f32.vlgmr.msrb.gmra.mxu2 %vm1434_vm15, %v6305_v56  ;;  %2640 = vmatpush.msra.mxu3 %v2166_v25  ;;  %v1528_v25 = vadd.f32 %v6362_v49, %v6370_v32 }
 0x1c1   : > { %4352 = vmatmul.msk.f32.gmra.mxu3 %vm1434_vm15, %v6387_v31  ;;  %2610 = vmatpush.msra.mxu2 %v2277_v12  ;;  %v2212_v12 = vmax.f32 %v1575_v6, 0.0 }
 0x1c2   : > { %v6471_v29 = vpop.f32.mrf.mxu2 }
 0x1c3   : > { %2611 = vmatpush.msra.mxu2 %v2261_v40  ;;  %v1545_v4 = vpop.f32.mrf.mxu0  ;;  %v1586_v33 = vpop.f32.mrf.mxu1  ;;  %v2195_v40 = vmax.f32 %v1531_v59, 0.0 }
 0x1c4   : > { %v1546_v51 = vadd.f32 %v1545_v4, %v6419_v52  ;;  %v1587_v48 = vadd.f32 %v1586_v33, %v6419_v52  ;;  %v6477_v18 = vpop.f32.mrf.mxu3  ;;  %v2179_v33 = vmax.f32 %v1528_v25, 0.0 }
 0x1c5   : > { %2612 = vmatpush.msra.mxu2 %v2245_v17  ;;  %v2196_v17 = vmax.f32 %v1572_v3, 0.0  ;;  %v1818_v3 = vadd.f32 %v6477_v18, %v6399_v21 }
 0x1c6   : > { %v2275_v62 = vmax.f32 %v1546_v51, 0.0  ;;  %v2276_v5 = vmax.f32 %v1587_v48, 0.0  ;;  %v2180_v51 = vmax.f32 %v1569_v27, 0.0  ;;  %v2163_v48 = vmax.f32 %v1525_v10, 0.0 }
 0x1c7   : > { %4294 = vmatmul.msk.f32.gmra.mxu0 %vm1434_vm15, %v5858_v45  ;;  %4303 = vmatmul.msk.f32.gmra.mxu1 %vm1434_vm15, %v5858_v45  ;;  %v2260_v45 = vmax.f32 %v1584_v53, 0.0  ;;  %v2202_v25 = vmax.f32 %v1818_v3, 0.0 }
 0x1c8   : > { %4342 = vmatmul.msk.f32.gmra.mxu2 %vm1434_vm15, %v6320_v38  ;;  %2564 = vmatpush.msra.mxu0 %v2275_v62 }
 0x1c9   : > { %2613 = vmatpush.msra.mxu2 %v2229_v63  ;;  %2587 = vmatpush.msra.mxu1 %v2276_v5 }
 0x1ca   : > { %4353 = vmatmul.msk.f32.gmra.mxu3 %vm1434_vm15, %v6496_v16  ;;  %v6500_v47 = vpop.f32.mrf.mxu2  ;;  %2565 = vmatpush.msra.mxu0 %v2259_v46 }
 0x1cb   : > { %2614 = vmatpush.msra.mxu2 %v2213_v55  ;;  %2588 = vmatpush.msra.mxu1 %v2260_v45 }
 0x1cc   : > { %v6506_v58 = vpop.f32.mrf.mxu0  ;;  %v6508_v13 = vpop.f32.mrf.mxu1  ;;  %2566 = vmatpush.msra.mxu0 %v2243_v22 }
 0x1cd   : > { %2615 = vmatpush.msra.mxu2 %v2197_v54  ;;  %v6512_v37 = vpop.f32.mrf.mxu3  ;;  %2589 = vmatpush.msra.mxu1 %v2244_v41  ;;  %v6600_v41 = vld [vmem:[%s7829_s4] sm:$0xff] }
 0x1ce   : > { %2567 = vmatpush.msra.mxu0 %v2227_v34 }
 0x1cf   : > { %2616 = vmatpush.msra.mxu2 %v2181_v26  ;;  %4323 = vmatmul.msk.f32.vlgmr.msrb.gmra.mxu0 %vm1434_vm15, %v6305_v56 }
 0x1d0   : > { %4332 = vmatmul.msk.f32.vlgmr.msrb.gmra.mxu1 %vm1434_vm15, %v6305_v56  ;;  %4343 = vmatmul.msk.f32.gmra.mxu2 %vm1434_vm15, %v6387_v31 }
 0x1d1   : > { %2590 = vmatpush.msra.mxu1 %v2228_v19  ;;  %2617 = vmatpush.msra.mxu2 %v2165_v42  ;;  %v1821_v19 = vadd.f32 %v6512_v37, %v6403_v23  ;;  %v1812_v37 = vadd.f32 %v6442_v35, %v6378_v14 }
 0x1d2   : > { %4354 = vmatmul.msk.f32.gmra.mxu3 %vm1434_vm15, %v4707_v57  ;;  %2568 = vmatpush.msra.mxu0 %v2211_v0  ;;  %v1815_v0 = vadd.f32 %v6458_v28, %v6370_v32 }
 0x1d3   : > { %2591 = vmatpush.msra.mxu1 %v2212_v12  ;;  %v6536_v56 = vpop.f32.mrf.mxu2  ;;  %v2218_v12 = vmax.f32 %v1821_v19, 0.0 }
 0x1d4   : > { %v6540_v49 = vpop.f32.mrf.mxu0  ;;  %v6542_v7 = vpop.f32.mrf.mxu1  ;;  %2569 = vmatpush.msra.mxu0 %v2195_v40 }
 0x1d5   : > { %2592 = vmatpush.msra.mxu1 %v2196_v17  ;;  %v1823_v4 = vpop.f32.mrf.mxu3  ;;  %v2186_v17 = vmax.f32 %v1815_v0, 0.0 }
 0x1d6   : > { %2570 = vmatpush.msra.mxu0 %v2179_v33  ;;  %v1824_v1 = vadd.f32 %v1823_v4, %v6393_v8  ;;  %v2170_v4 = vmax.f32 %v1812_v37, 0.0 }
 0x1d7   : > { %2593 = vmatpush.msra.mxu1 %v2180_v51  ;;  %4324 = vmatmul.msk.f32.gmra.mxu0 %vm1434_vm15, %v6320_v38 }
 0x1d8   : > { %4333 = vmatmul.msk.f32.gmra.mxu1 %vm1434_vm15, %v6320_v38  ;;  %4344 = vmatmul.msk.f32.gmra.mxu2 %vm1434_vm15, %v6496_v16  ;;  %v4709_v38 = vld [vmem:[%s7827_s2 + $0x30] sm:$0xff]  ;;  %v2234_v42 = vmax.f32 %v1824_v1, 0.0 }
 0x1d9   : > { %2571 = vmatpush.msra.mxu0 %v2163_v48  ;;  %2594 = vmatpush.msra.mxu1 %v2164_v44 }
 0x1da   : > { %4355 = vmatmul.msk.f32.gmra.mxu3 %vm1434_vm15, %v4708_v20 }
 0x1db   : > { %v6556_v63 = vpop.f32.mrf.mxu2 }
 0x1dc   : > { %v6558_v50 = vpop.f32.mrf.mxu0  ;;  %v6560_v53 = vpop.f32.mrf.mxu1  ;;  %v1780_v48 = vadd.f32 %v6556_v63, %v6403_v23  ;;  %v1774_v63 = vadd.f32 %v6500_v47, %v6370_v32 }
 0x1dd   : > { %v1826_v39 = vpop.f32.mrf.mxu3 }
 0x1de   : > { %v1827_v22 = vadd.f32 %v1826_v39, %v6421_v15  ;;  %v1777_v39 = vadd.f32 %v6536_v56, %v6399_v21 }
 0x1df   : > { %4325 = vmatmul.msk.f32.gmra.mxu0 %vm1434_vm15, %v6387_v31 }
 0x1e0   : > { %4334 = vmatmul.msk.f32.gmra.mxu1 %vm1434_vm15, %v6387_v31  ;;  %4345 = vmatmul.msk.f32.gmra.mxu2 %vm1434_vm15, %v4707_v57  ;;  %v6583_v31 = vld [vmem:[%s7827_s2 + $0x38] sm:$0xff]  ;;  %v2250_v43 = vmax.f32 %v1827_v22, 0.0  ;;  %v2201_v47 = vmax.f32 %v1777_v39, 0.0 }
 0x1e2   : > { %4356 = vmatmul.msk.f32.gmra.mxu3 %vm1434_vm15, %v4709_v38 }
 0x1e3   : > { %v1782_v62 = vpop.f32.mrf.mxu2 }
 0x1e4   : > { %v6571_v5 = vpop.f32.mrf.mxu0  ;;  %v6573_v55 = vpop.f32.mrf.mxu1  ;;  %v1783_v35 = vadd.f32 %v1782_v62, %v6393_v8 }
 0x1e5   : > { %v1829_v24 = vpop.f32.mrf.mxu3 }
 0x1e6   : > { %v1830_v54 = vadd.f32 %v1829_v24, %v6417_v9 }
 0x1e7   : > { %4326 = vmatmul.msk.f32.gmra.mxu0 %vm1434_vm15, %v6496_v16 }
 0x1e8   : > { %4335 = vmatmul.msk.f32.gmra.mxu1 %vm1434_vm15, %v6496_v16  ;;  %4346 = vmatmul.msk.f32.gmra.mxu2 %vm1434_vm15, %v4708_v20  ;;  %v2266_v36 = vmax.f32 %v1830_v54, 0.0 }
 0x1ea   : > { %4357 = vmatmul.msk.f32.gmra.mxu3 %vm1434_vm15, %v6583_v31 }
 0x1eb   : > { %v1785_v11 = vpop.f32.mrf.mxu2 }
 0x1ec   : > { %v6587_v46 = vpop.f32.mrf.mxu0  ;;  %v6589_v61 = vpop.f32.mrf.mxu1  ;;  %v1786_v33 = vadd.f32 %v1785_v11, %v6421_v15  ;;  %v2233_v11 = vmax.f32 %v1783_v35, 0.0 }
 0x1ed   : > { %v1832_v45 = vpop.f32.mrf.mxu3  ;;  %v1701_v19 = vadd.f32 %v6587_v46, %v6393_v8  ;;  %v1742_v0 = vadd.f32 %v6589_v61, %v6393_v8 }
 0x1ee   : > { %v1833_v16 = vadd.f32 %v1832_v45, %v6419_v52  ;;  %v2249_v44 = vmax.f32 %v1786_v33, 0.0 }
 0x1ef   : > { %4327 = vmatmul.msk.f32.gmra.mxu0 %vm1434_vm15, %v4707_v57 }
 0x1f0   : > { %v2282_v30 = vmax.f32 %v1833_v16, 0.0  ;;  %4336 = vmatmul.msk.f32.gmra.mxu1 %vm1434_vm15, %v4707_v57  ;;  %4347 = vmatmul.msk.f32.gmra.mxu2 %vm1434_vm15, %v4709_v38 }
 0x1f2   : > { %2725 = vmatpush.msrb.mxu3 %v2282_v30  ;;  %v2217_v30 = vmax.f32 %v1780_v48, 0.0 }
 0x1f3   : > { %v1788_v26 = vpop.f32.mrf.mxu2  ;;  %4364 = vmatmul.msk.f32.vlgmr.msra.gmra.mxu3 %vm2549_vm3, %v6600_v41 }
 0x1f4   : > { %v1703_v6 = vpop.f32.mrf.mxu0  ;;  %v1744_v34 = vpop.f32.mrf.mxu1  ;;  %2726 = vmatpush.msrb.mxu3 %v2266_v36  ;;  %v1789_v10 = vadd.f32 %v1788_v26, %v6417_v9 }
 0x1f5   : > { %v6607_v59 = vpop.f32.mrf.mxu3  ;;  %v1704_v56 = vadd.f32 %v1703_v6, %v6421_v15  ;;  %v1745_v26 = vadd.f32 %v1744_v34, %v6421_v15  ;;  %v1698_v34 = vadd.f32 %v6571_v5, %v6403_v23  ;;  %v1739_v5 = vadd.f32 %v6573_v55, %v6403_v23 }
 0x1f6   : > { %2727 = vmatpush.msrb.mxu3 %v2250_v43  ;;  %v2265_v51 = vmax.f32 %v1789_v10, 0.0  ;;  %v1771_v43 = vadd.f32 %v6471_v29, %v6378_v14  ;;  %v2232_v10 = vmax.f32 %v1742_v0, 0.0  ;;  %v1733_v55 = vadd.f32 %v6542_v7, %v6370_v32 }
 0x1f7   : > { %4328 = vmatmul.msk.f32.gmra.mxu0 %vm1434_vm15, %v4708_v20  ;;  %v2248_v29 = vmax.f32 %v1745_v26, 0.0 }
 0x1f8   : > { %4337 = vmatmul.msk.f32.gmra.mxu1 %vm1434_vm15, %v4708_v20  ;;  %4348 = vmatmul.msk.f32.gmra.mxu2 %vm1434_vm15, %v6583_v31 }
 0x1f9   : > { %2728 = vmatpush.msrb.mxu3 %v2234_v42  ;;  %v2185_v42 = vmax.f32 %v1774_v63, 0.0 }
 0x1fb   : > { %v1791_v27 = vpop.f32.mrf.mxu2  ;;  %2729 = vmatpush.msrb.mxu3 %v2218_v12 }
 0x1fc   : > { %v1792_v18 = vadd.f32 %v1791_v27, %v6419_v52  ;;  %v1706_v57 = vpop.f32.mrf.mxu0  ;;  %v1747_v40 = vpop.f32.mrf.mxu1  ;;  %v1695_v27 = vadd.f32 %v6558_v50, %v6399_v21  ;;  %v1689_v50 = vadd.f32 %v6506_v58, %v6378_v14 }
 0x1fd   : > { %2730 = vmatpush.msrb.mxu3 %v2202_v25  ;;  %v6621_v28 = vpop.f32.mrf.mxu3  ;;  %v1707_v62 = vadd.f32 %v1706_v57, %v6417_v9  ;;  %v1748_v22 = vadd.f32 %v1747_v40, %v6417_v9  ;;  %v2169_v25 = vmax.f32 %v1771_v43, 0.0  ;;  %v1692_v57 = vadd.f32 %v6540_v49, %v6370_v32 }
 0x1fe   : > { %v2281_v60 = vmax.f32 %v1792_v18, 0.0  ;;  %v2231_v18 = vmax.f32 %v1701_v19, 0.0  ;;  %v1736_v40 = vadd.f32 %v6560_v53, %v6399_v21  ;;  %v2199_v49 = vmax.f32 %v1695_v27, 0.0 }
 0x1ff   : > { %2731 = vmatpush.msrb.mxu3 %v2186_v17  ;;  %4329 = vmatmul.msk.f32.gmra.mxu0 %vm1434_vm15, %v4709_v38  ;;  %v2263_v3 = vmax.f32 %v1707_v62, 0.0  ;;  %v2264_v6 = vmax.f32 %v1748_v22, 0.0  ;;  %v2215_v17 = vmax.f32 %v1698_v34, 0.0  ;;  %v1730_v53 = vadd.f32 %v6508_v13, %v6378_v14 }
 0x200   : > { %4338 = vmatmul.msk.f32.gmra.mxu1 %vm1434_vm15, %v4709_v38  ;;  %2702 = vmatpush.msrb.mxu2 %v2281_v60  ;;  %v2216_v60 = vmax.f32 %v1739_v5, 0.0  ;;  %v2200_v33 = vmax.f32 %v1736_v40, 0.0  ;;  %v2167_v58 = vmax.f32 %v1689_v50, 0.0  ;;  %v1979_v5 = vadd.f32 %v6621_v28, %v6370_v32 }
 0x201   : > { %2732 = vmatpush.msrb.mxu3 %v2170_v4  ;;  %4362 = vmatmul.msk.f32.vlgmr.msra.gmra.mxu2 %vm2549_vm3, %v6600_v41  ;;  %v2183_v4 = vmax.f32 %v1692_v57, 0.0  ;;  %v2168_v39 = vmax.f32 %v1730_v53, 0.0  ;;  %v1976_v57 = vadd.f32 %v6607_v59, %v6378_v14 }
 0x202   : > { %2703 = vmatpush.msrb.mxu2 %v2265_v51  ;;  %v2190_v28 = vmax.f32 %v1979_v5, 0.0 }
 0x203   : > { %v6631_v20 = vpop.f32.mrf.mxu2 }
 0x204   : > { %v1709_v24 = vpop.f32.mrf.mxu0  ;;  %v1750_v38 = vpop.f32.mrf.mxu1  ;;  %2704 = vmatpush.msrb.mxu2 %v2249_v44  ;;  %v2184_v44 = vmax.f32 %v1733_v55, 0.0 }
 0x205   : > { %v1710_v45 = vadd.f32 %v1709_v24, %v6419_v52  ;;  %v1751_v54 = vadd.f32 %v1750_v38, %v6419_v52  ;;  %v6638_v16 = vpop.f32.mrf.mxu3 }
 0x206   : > { %2705 = vmatpush.msrb.mxu2 %v2233_v11 }
 0x207   : > { %v2279_v36 = vmax.f32 %v1710_v45, 0.0  ;;  %v2280_v1 = vmax.f32 %v1751_v54, 0.0  ;;  %4330 = vmatmul.msk.f32.gmra.mxu0 %vm1434_vm15, %v6583_v31 }
 0x208   : > { %4339 = vmatmul.msk.f32.gmra.mxu1 %vm1434_vm15, %v6583_v31  ;;  %2706 = vmatpush.msrb.mxu2 %v2217_v30  ;;  %v2247_v31 = vmax.f32 %v1704_v56, 0.0 }
 0x209   : > { %2656 = vmatpush.msrb.mxu0 %v2279_v36  ;;  %2679 = vmatpush.msrb.mxu1 %v2280_v1 }
 0x20a   : > { %2707 = vmatpush.msrb.mxu2 %v2201_v47 }
 0x20b   : > { %v6657_v12 = vpop.f32.mrf.mxu2  ;;  %2657 = vmatpush.msrb.mxu0 %v2263_v3  ;;  %2680 = vmatpush.msrb.mxu1 %v2264_v6 }
 0x20c   : > { %v6659_v46 = vpop.f32.mrf.mxu0  ;;  %v6661_v37 = vpop.f32.mrf.mxu1  ;;  %2708 = vmatpush.msrb.mxu2 %v2185_v42 }
 0x20d   : > { %v1984_v61 = vpop.f32.mrf.mxu3  ;;  %2658 = vmatpush.msrb.mxu0 %v2247_v31  ;;  %2681 = vmatpush.msrb.mxu1 %v2248_v29 }
 0x20e   : > { %2709 = vmatpush.msrb.mxu2 %v2169_v25  ;;  %v1985_v42 = vadd.f32 %v1984_v61, %v6403_v23  ;;  %v1982_v25 = vadd.f32 %v6638_v16, %v6399_v21  ;;  %v6713_v61 = vld [vmem:[%s7829_s4 + $0x8] sm:$0x1] }
 0x20f   : > { %2659 = vmatpush.msrb.mxu0 %v2231_v18  ;;  %2682 = vmatpush.msrb.mxu1 %v2232_v10 }
 0x210   : > { %4358 = vmatmul.msk.f32.vlgmr.msra.gmra.mxu0 %vm2549_vm3, %v6600_v41  ;;  %4360 = vmatmul.msk.f32.vlgmr.msra.gmra.mxu1 %vm2549_vm3, %v6600_v41  ;;  %v2222_v18 = vmax.f32 %v1985_v42, 0.0  ;;  %v2206_v40 = vmax.f32 %v1982_v25, 0.0  ;;  %v1935_v42 = vadd.f32 %v6631_v20, %v6378_v14 }
 0x211   : > { %2660 = vmatpush.msrb.mxu0 %v2215_v17  ;;  %2683 = vmatpush.msrb.mxu1 %v2216_v60 }
 0x212   : > { %4363 = vmatmul.msk.f32.gmra.mxu2 %vm2549_vm3, %v6713_v61  ;;  %4365 = vmatmul.msk.f32.gmra.mxu3 %vm2549_vm3, %v6713_v61 }
 0x213   : > { %v6681_v35 = vpop.f32.mrf.mxu2  ;;  %2661 = vmatpush.msrb.mxu0 %v2199_v49  ;;  %2684 = vmatpush.msrb.mxu1 %v2200_v33  ;;  %v2174_v49 = vmax.f32 %v1976_v57, 0.0 }
 0x214   : > { %v6683_v51 = vpop.f32.mrf.mxu0  ;;  %v6685_v48 = vpop.f32.mrf.mxu1 }
 0x215   : > { %v1987_v7 = vpop.f32.mrf.mxu3  ;;  %2662 = vmatpush.msrb.mxu0 %v2183_v4  ;;  %2685 = vmatpush.msrb.mxu1 %v2184_v44 }
 0x216   : > { %v1988_v19 = vadd.f32 %v1987_v7, %v6393_v8 }
 0x217   : > { %2663 = vmatpush.msrb.mxu0 %v2167_v58  ;;  %2686 = vmatpush.msrb.mxu1 %v2168_v39  ;;  %v1941_v39 = vadd.f32 %v6681_v35, %v6399_v21  ;;  %v1938_v35 = vadd.f32 %v6657_v12, %v6370_v32 }
 0x218   : > { %v2238_v27 = vmax.f32 %v1988_v19, 0.0  ;;  %4359 = vmatmul.msk.f32.gmra.mxu0 %vm2549_vm3, %v6713_v61  ;;  %4361 = vmatmul.msk.f32.gmra.mxu1 %vm2549_vm3, %v6713_v61 }
 0x21a   : > { %4370 = vmatmul.msk.f32.vlgmr.msrb.gmra.mxu2 %vm2549_vm3, %v6600_v41  ;;  %4372 = vmatmul.msk.f32.vlgmr.msrb.gmra.mxu3 %vm2549_vm3, %v6600_v41 }
 0x21b   : > { %v1943_v13 = vpop.f32.mrf.mxu2 }
 0x21c   : > { %v6687_v24 = vpop.f32.mrf.mxu0  ;;  %v6689_v38 = vpop.f32.mrf.mxu1  ;;  %v1944_v58 = vadd.f32 %v1943_v13, %v6403_v23 }
 0x21d   : > { %v1990_v11 = vpop.f32.mrf.mxu3 }
 0x21e   : > { %v1991_v43 = vadd.f32 %v1990_v11, %v6421_v15 }
 0x220   : > { %v2254_v34 = vmax.f32 %v1991_v43, 0.0  ;;  %4366 = vmatmul.msk.f32.vlgmr.msrb.gmra.mxu0 %vm2549_vm3, %v6600_v41  ;;  %4368 = vmatmul.msk.f32.vlgmr.msrb.gmra.mxu1 %vm2549_vm3, %v6600_v41  ;;  %v2221_v43 = vmax.f32 %v1944_v58, 0.0 }
 0x222   : > { %4373 = vmatmul.msk.f32.gmra.mxu3 %vm2549_vm3, %v6713_v61  ;;  %4371 = vmatmul.msk.f32.gmra.mxu2 %vm2549_vm3, %v6713_v61 }
 0x223   : > { %v1946_v62 = vpop.f32.mrf.mxu2 }
 0x224   : > { %v6691_v45 = vpop.f32.mrf.mxu0  ;;  %v6693_v54 = vpop.f32.mrf.mxu1  ;;  %v1947_v4 = vadd.f32 %v1946_v62, %v6393_v8 }
 0x225   : > { %v1993_v63 = vpop.f32.mrf.mxu3  ;;  %v1862_v20 = vadd.f32 %v6691_v45, %v6403_v23  ;;  %v1900_v45 = vadd.f32 %v6689_v38, %v6399_v21  ;;  %v1853_v38 = vadd.f32 %v6659_v46, %v6378_v14 }
 0x226   : > { %v1994_v1 = vadd.f32 %v1993_v63, %v6417_v9  ;;  %v2237_v11 = vmax.f32 %v1947_v4, 0.0 }
 0x227   : > { %v2204_v4 = vmax.f32 %v1900_v45, 0.0  ;;  %v2171_v58 = vmax.f32 %v1853_v38, 0.0 }
 0x228   : > { %v2270_v3 = vmax.f32 %v1994_v1, 0.0  ;;  %4367 = vmatmul.msk.f32.gmra.mxu0 %vm2549_vm3, %v6713_v61  ;;  %4369 = vmatmul.msk.f32.gmra.mxu1 %vm2549_vm3, %v6713_v61 }
 0x22b   : > { %v1949_v22 = vpop.f32.mrf.mxu2 }
 0x22c   : > { %v6695_v30 = vpop.f32.mrf.mxu0  ;;  %v6697_v56 = vpop.f32.mrf.mxu1  ;;  %v1950_v60 = vadd.f32 %v1949_v22, %v6421_v15 }
 0x22d   : > { %v1996_v36 = vpop.f32.mrf.mxu3  ;;  %v1865_v25 = vadd.f32 %v6695_v30, %v6393_v8 }
 0x22e   : > { %v1997_v26 = vadd.f32 %v1996_v36, %v6419_v52  ;;  %v2253_v44 = vmax.f32 %v1950_v60, 0.0  ;;  %v1894_v60 = vadd.f32 %v6661_v37, %v6378_v14 }
 0x230   : > { %v2286_v47 = vmax.f32 %v1997_v26, 0.0 }
 0x232   : > { %2817 = vmatpush.msra.mxu3 %v2286_v47 }
 0x233   : > { %v1952_v6 = vpop.f32.mrf.mxu2 }
 0x234   : > { %v1867_v0 = vpop.f32.mrf.mxu0  ;;  %v1908_v31 = vpop.f32.mrf.mxu1  ;;  %2818 = vmatpush.msra.mxu3 %v2270_v3  ;;  %v1953_v17 = vadd.f32 %v1952_v6, %v6417_v9 }
 0x235   : > { %v6704_v29 = vpop.f32.mrf.mxu3  ;;  %v1868_v47 = vadd.f32 %v1867_v0, %v6421_v15  ;;  %v1909_v19 = vadd.f32 %v1908_v31, %v6421_v15  ;;  %v2189_v0 = vmax.f32 %v1938_v35, 0.0  ;;  %v1903_v31 = vadd.f32 %v6693_v54, %v6403_v23 }
 0x236   : > { %2819 = vmatpush.msra.mxu3 %v2254_v34  ;;  %v2269_v33 = vmax.f32 %v1953_v17, 0.0  ;;  %v2205_v34 = vmax.f32 %v1941_v39, 0.0  ;;  %v2235_v54 = vmax.f32 %v1865_v25, 0.0 }
 0x237   : > { %v2252_v30 = vmax.f32 %v1909_v19, 0.0 }
 0x238   : > { %2820 = vmatpush.msra.mxu3 %v2238_v27  ;;  %v1906_v27 = vadd.f32 %v6697_v56, %v6393_v8  ;;  %v2173_v56 = vmax.f32 %v1935_v42, 0.0 }
 0x23a   : > { %2821 = vmatpush.msra.mxu3 %v2222_v18  ;;  %v2251_v18 = vmax.f32 %v1868_v47, 0.0 }
 0x23b   : > { %v1955_v16 = vpop.f32.mrf.mxu2 }
 0x23c   : > { %v1956_v10 = vadd.f32 %v1955_v16, %v6419_v52  ;;  %v1870_v50 = vpop.f32.mrf.mxu0  ;;  %v1911_v55 = vpop.f32.mrf.mxu1  ;;  %2822 = vmatpush.msra.mxu3 %v2206_v40  ;;  %v1859_v16 = vadd.f32 %v6687_v24, %v6399_v21  ;;  %v1897_v24 = vadd.f32 %v6685_v48, %v6370_v32 }
 0x23d   : > { %v6725_v59 = vpop.f32.mrf.mxu3  ;;  %v1871_v63 = vadd.f32 %v1870_v50, %v6417_v9  ;;  %v1912_v22 = vadd.f32 %v1911_v55, %v6417_v9  ;;  %v1856_v50 = vadd.f32 %v6683_v51, %v6370_v32  ;;  %v2219_v55 = vmax.f32 %v1862_v20, 0.0 }
 0x23e   : > { %v2285_v53 = vmax.f32 %v1956_v10, 0.0  ;;  %2823 = vmatpush.msra.mxu3 %v2190_v28  ;;  %v2236_v28 = vmax.f32 %v1906_v27, 0.0 }
 0x23f   : > { %v2267_v12 = vmax.f32 %v1871_v63, 0.0  ;;  %v2268_v5 = vmax.f32 %v1912_v22, 0.0  ;;  %v2187_v51 = vmax.f32 %v1856_v50, 0.0 }
 0x240   : > { %2794 = vmatpush.msra.mxu2 %v2285_v53  ;;  %2824 = vmatpush.msra.mxu3 %v2174_v49  ;;  %v2220_v49 = vmax.f32 %v1903_v31, 0.0  ;;  %v2203_v53 = vmax.f32 %v1859_v16, 0.0  ;;  %v2143_v16 = vadd.f32 %v6725_v59, %v6370_v32 }
 0x241   : > { %4380 = vmatmul.msk.f32.vlgmr.msra.gmra.mxu3 %vm2549_vm3, %v6600_v41 }
 0x242   : > { %2795 = vmatpush.msra.mxu2 %v2269_v33  ;;  %v2188_v33 = vmax.f32 %v1897_v24, 0.0  ;;  %v2194_v50 = vmax.f32 %v2143_v16, 0.0  ;;  %v4712_v16 = vld [vmem:[#allocation4 + $0x8] sm:$0xff] }
 0x243   : > { %v6734_v7 = vpop.f32.mrf.mxu2 }
 0x244   : > { %2796 = vmatpush.msra.mxu2 %v2253_v44  ;;  %v1873_v62 = vpop.f32.mrf.mxu0  ;;  %v1914_v13 = vpop.f32.mrf.mxu1  ;;  %v2172_v44 = vmax.f32 %v1894_v60, 0.0 }
 0x245   : > { %v1874_v36 = vadd.f32 %v1873_v62, %v6419_v52  ;;  %v1915_v1 = vadd.f32 %v1914_v13, %v6419_v52  ;;  %v6746_v26 = vpop.f32.mrf.mxu3 }
 0x246   : > { %2797 = vmatpush.msra.mxu2 %v2237_v11 }
 0x247   : > { %v2283_v3 = vmax.f32 %v1874_v36, 0.0  ;;  %v2284_v6 = vmax.f32 %v1915_v1, 0.0 }
 0x248   : > { %2798 = vmatpush.msra.mxu2 %v2221_v43 }
 0x249   : > { %2748 = vmatpush.msra.mxu0 %v2283_v3  ;;  %2771 = vmatpush.msra.mxu1 %v2284_v6 }
 0x24a   : > { %2799 = vmatpush.msra.mxu2 %v2205_v34  ;;  %4381 = vmatmul.msk.f32.gmra.mxu3 %vm2549_vm3, %v6713_v61 }
 0x24b   : > { %v6766_v57 = vpop.f32.mrf.mxu2  ;;  %2749 = vmatpush.msra.mxu0 %v2267_v12  ;;  %2772 = vmatpush.msra.mxu1 %v2268_v5 }
 0x24c   : > { %2800 = vmatpush.msra.mxu2 %v2189_v0  ;;  %v6768_v40 = vpop.f32.mrf.mxu0 }
 0x24d   : > { %v6776_v17 = vpop.f32.mrf.mxu1  ;;  %v2148_v10 = vpop.f32.mrf.mxu3  ;;  %2750 = vmatpush.msra.mxu0 %v2251_v18  ;;  %2773 = vmatpush.msra.mxu1 %v2252_v30  ;;  %v2146_v30 = vadd.f32 %v6746_v26, %v6399_v21 }
 0x24e   : > { %2801 = vmatpush.msra.mxu2 %v2173_v56  ;;  %v2149_v0 = vadd.f32 %v2148_v10, %v6403_v23 }
 0x24f   : > { %2751 = vmatpush.msra.mxu0 %v2235_v54  ;;  %2774 = vmatpush.msra.mxu1 %v2236_v28  ;;  %v2140_v54 = vadd.f32 %v6704_v29, %v6378_v14  ;;  %v2210_v28 = vmax.f32 %v2146_v30, 0.0  ;;  %v4711_v30 = vld [vmem:[#allocation4] sm:$0xff] }
 0x250   : > { %4378 = vmatmul.msk.f32.vlgmr.msra.gmra.mxu2 %vm2549_vm3, %v6600_v41  ;;  %v2226_v45 = vmax.f32 %v2149_v0, 0.0 }
 0x251   : > { %2752 = vmatpush.msra.mxu0 %v2219_v55  ;;  %2775 = vmatpush.msra.mxu1 %v2220_v49  ;;  %v2178_v38 = vmax.f32 %v2140_v54, 0.0 }
 0x253   : > { %v6790_v48 = vpop.f32.mrf.mxu2  ;;  %2753 = vmatpush.msra.mxu0 %v2203_v53  ;;  %2776 = vmatpush.msra.mxu1 %v2204_v4 }
 0x254   : > { %v6792_v39 = vpop.f32.mrf.mxu0 }
 0x255   : > { %v6794_v11 = vpop.f32.mrf.mxu1  ;;  %2754 = vmatpush.msra.mxu0 %v2187_v51  ;;  %2777 = vmatpush.msra.mxu1 %v2188_v33  ;;  %v2151_v46 = vpop.f32.mrf.mxu3  ;;  %v2105_v33 = vadd.f32 %v6790_v48, %v6399_v21 }
 0x256   : > { %v2152_v27 = vadd.f32 %v2151_v46, %v6393_v8 }
 0x257   : > { %2755 = vmatpush.msra.mxu0 %v2171_v58  ;;  %2778 = vmatpush.msra.mxu1 %v2172_v44 }
 0x258   : > { %4376 = vmatmul.msk.f32.vlgmr.msra.gmra.mxu1 %vm2549_vm3, %v6600_v41  ;;  %4374 = vmatmul.msk.f32.vlgmr.msra.gmra.mxu0 %vm2549_vm3, %v6600_v41  ;;  %v2242_v56 = vmax.f32 %v2152_v27, 0.0  ;;  %v2209_v27 = vmax.f32 %v2105_v33, 0.0 }
 0x259   : > { %4379 = vmatmul.msk.f32.gmra.mxu2 %vm2549_vm3, %v6713_v61 }
 0x25b   : > { %v2107_v37 = vpop.f32.mrf.mxu2 }
 0x25c   : > { %v6804_v62 = vpop.f32.mrf.mxu0  ;;  %v2108_v29 = vadd.f32 %v2107_v37, %v6403_v23  ;;  %v2102_v37 = vadd.f32 %v6766_v57, %v6370_v32 }
 0x25d   : > { %v6806_v13 = vpop.f32.mrf.mxu1  ;;  %v2154_v63 = vpop.f32.mrf.mxu3 }
 0x25e   : > { %v2155_v34 = vadd.f32 %v2154_v63, %v6421_v15  ;;  %v2193_v57 = vmax.f32 %v2102_v37, 0.0 }
 0x260   : > { %4375 = vmatmul.msk.f32.gmra.mxu0 %vm2549_vm3, %v6713_v61  ;;  %4377 = vmatmul.msk.f32.gmra.mxu1 %vm2549_vm3, %v6713_v61  ;;  %v2258_v20 = vmax.f32 %v2155_v34, 0.0 }
 0x263   : > { %v2110_v22 = vpop.f32.mrf.mxu2 }
 0x264   : > { %v6816_v36 = vpop.f32.mrf.mxu0  ;;  %v2111_v53 = vadd.f32 %v2110_v22, %v6393_v8 }
 0x265   : > { %v6818_v1 = vpop.f32.mrf.mxu1  ;;  %v2157_v35 = vpop.f32.mrf.mxu3 }
 0x266   : > { %v2158_v6 = vadd.f32 %v2157_v35, %v6417_v9  ;;  %v2241_v58 = vmax.f32 %v2111_v53, 0.0 }
 0x268   : > { %v2274_v12 = vmax.f32 %v2158_v6, 0.0 }
 0x26b   : > { %v2113_v43 = vpop.f32.mrf.mxu2 }
 0x26c   : > { %v6820_v47 = vpop.f32.mrf.mxu0  ;;  %v2114_v60 = vadd.f32 %v2113_v43, %v6421_v15 }
 0x26d   : > { %v6822_v19 = vpop.f32.mrf.mxu1  ;;  %v2160_v3 = vpop.f32.mrf.mxu3 }
 0x26e   : > { %v2161_v42 = vadd.f32 %v2160_v3, %v6419_v52  ;;  %v2257_v51 = vmax.f32 %v2114_v60, 0.0  ;;  %v2225_v3 = vmax.f32 %v2108_v29, 0.0 }
 0x270   : > { %v2290_v25 = vmax.f32 %v2161_v42, 0.0 }
 0x272   : > { %2909 = vmatpush.msrb.mxu3 %v2290_v25  ;;  %v2099_v25 = vadd.f32 %v6734_v7, %v6378_v14 }
 0x273   : > { %v2116_v5 = vpop.f32.mrf.mxu2 }
 0x274   : > { %v2031_v31 = vpop.f32.mrf.mxu0  ;;  %2910 = vmatpush.msrb.mxu3 %v2274_v12  ;;  %v2117_v24 = vadd.f32 %v2116_v5, %v6417_v9  ;;  %v2070_v5 = vadd.f32 %v6822_v19, %v6393_v8 }
 0x275   : > { %v2072_v18 = vpop.f32.mrf.mxu1  ;;  %v2032_v6 = vadd.f32 %v2031_v31, %v6421_v15 }
 0x276   : > { %2911 = vmatpush.msrb.mxu3 %v2258_v20  ;;  %v2273_v4 = vmax.f32 %v2117_v24, 0.0  ;;  %v2073_v48 = vadd.f32 %v2072_v18, %v6421_v15  ;;  %v2026_v15 = vadd.f32 %v6816_v36, %v6403_v23  ;;  %v2067_v20 = vadd.f32 %v6818_v1, %v6403_v23  ;;  %v2642_v33 = vpop.f32.mrf.mxu3 }
 0x277   : > { %v2255_v7 = vmax.f32 %v2032_v6, 0.0  ;;  %v2240_v54 = vmax.f32 %v2070_v5, 0.0  ;;  %v2020_v23 = vadd.f32 %v6792_v39, %v6370_v32  ;;  %v2058_v39 = vadd.f32 %v6776_v17, %v6378_v14 }
 0x278   : > { %2912 = vmatpush.msrb.mxu3 %v2242_v56  ;;  %v2256_v0 = vmax.f32 %v2073_v48, 0.0  ;;  %v2223_v1 = vmax.f32 %v2026_v15, 0.0 }
 0x27a   : > { %2913 = vmatpush.msrb.mxu3 %v2226_v45  ;;  %v2064_v45 = vadd.f32 %v6806_v13, %v6399_v21 }
 0x27b   : > { %v2119_v10 = vpop.f32.mrf.mxu2 }
 0x27c   : > { %v2120_v55 = vadd.f32 %v2119_v10, %v6419_v52  ;;  %v2034_v49 = vpop.f32.mrf.mxu0  ;;  %2914 = vmatpush.msrb.mxu3 %v2210_v28  ;;  %v2061_v28 = vadd.f32 %v6794_v11, %v6370_v32  ;;  %v2224_v10 = vmax.f32 %v2067_v20, 0.0  ;;  %v2191_v32 = vmax.f32 %v2020_v23, 0.0 }
 0x27d   : > { %v2075_v26 = vpop.f32.mrf.mxu1  ;;  %v2035_v63 = vadd.f32 %v2034_v49, %v6417_v9 }
 0x27e   : > { %v2289_v59 = vmax.f32 %v2120_v55, 0.0  ;;  %2915 = vmatpush.msrb.mxu3 %v2194_v50  ;;  %v2076_v22 = vadd.f32 %v2075_v26, %v6417_v9  ;;  %v2029_v9 = vadd.f32 %v6820_v47, %v6393_v8  ;;  %v2177_v47 = vmax.f32 %v2099_v25, 0.0 }
 0x27f   : > { %v2023_v8 = vadd.f32 %v6804_v62, %v6399_v21  ;;  %v2017_v21 = vadd.f32 %v6768_v40, %v6378_v14  ;;  %v2208_v50 = vmax.f32 %v2064_v45, 0.0  ;;  %v2192_v11 = vmax.f32 %v2061_v28, 0.0 }
 0x280   : > { %2886 = vmatpush.msrb.mxu2 %v2289_v59  ;;  %2916 = vmatpush.msrb.mxu3 %v2178_v38  ;;  %v2272_v12 = vmax.f32 %v2076_v22, 0.0  ;;  %v2239_v19 = vmax.f32 %v2029_v9, 0.0  ;;  %v2176_v55 = vmax.f32 %v2058_v39, 0.0  ;;  %v4715_v9 = vld [vmem:[#allocation4 + $0x80] sm:$0x1] }
 0x281   : > { %4388 = vmatmul.msk.f32.vlgmr.msrb.gmra.mxu3 %vm2549_vm3, %v6600_v41  ;;  %v2207_v13 = vmax.f32 %v2023_v8, 0.0  ;;  %v2175_v24 = vmax.f32 %v2017_v21, 0.0  ;;  %v4719_v8 = vld [vmem:[#allocation4 + $0x28] sm:$0xff] }
 0x282   : > { %2887 = vmatpush.msrb.mxu2 %v2273_v4  ;;  %v4713_v4 = vld [vmem:[#allocation4 + $0x10] sm:$0xff] }
 0x284   : > { %2888 = vmatpush.msrb.mxu2 %v2257_v51  ;;  %v2037_v44 = vpop.f32.mrf.mxu0  ;;  %v2619_v53 = vpop.f32.mrf.mxu2 }
 0x285   : > { %v2078_v46 = vpop.f32.mrf.mxu1  ;;  %v2038_v35 = vadd.f32 %v2037_v44, %v6419_v52  ;;  %v6916_v29 = vmul.f32 %v4713_v4, %v2619_v53  ;;  %v4722_v4 = vld [vmem:[#allocation4 + $0x30] sm:$0xff] }
 0x286   : > { %v2079_v43 = vadd.f32 %v2078_v46, %v6419_v52  ;;  %2889 = vmatpush.msrb.mxu2 %v2241_v58  ;;  %v2271_v52 = vmax.f32 %v2035_v63, 0.0  ;;  %v4714_v58 = vld [vmem:[#allocation4 + $0x18] sm:$0xff] }
 0x287   : > { %v2287_v42 = vmax.f32 %v2038_v35, 0.0  ;;  %v6922_v44 = vmul.f32 %v4714_v58, %v2642_v33  ;;  %v3086_v22 = vrot.slane %v6916_v29, 1  ;;  %v3230_v35 = vrot.slane %v6916_v29, 2 }
 0x288   : > { %v2288_v34 = vmax.f32 %v2079_v43, 0.0  ;;  %2890 = vmatpush.msrb.mxu2 %v2225_v3  ;;  %v3374_v43 = vrot.slane %v6916_v29, 3  ;;  %v3518_v48 = vrot.slane %v6916_v29, 5 }
 0x289   : > { %2840 = vmatpush.msrb.mxu0 %v2287_v42  ;;  %4389 = vmatmul.msk.f32.gmra.mxu3 %vm2549_vm3, %v6713_v61  ;;  %v3087_v46 = vrot.slane %v6922_v44, 1  ;;  %v3231_v63 = vrot.slane %v6922_v44, 2  ;;  %v3375_v37 = vrot.slane %v6922_v44, 3  ;;  %v3519_v3 = vrot.slane %v6922_v44, 5 }
 0x28a   : > { %2863 = vmatpush.msrb.mxu1 %v2288_v34  ;;  %2891 = vmatpush.msrb.mxu2 %v2209_v27  ;;  %v3663_v6 = vrot.slane %v6922_v44, 6  ;;  %v3662_v42 = vrot.slane %v6916_v29, 6  ;;  %v3806_v34 = vrot.slane %v6916_v29, 7  ;;  %v3807_v5 = vrot.slane %v6922_v44, 7 }
 0x28b   : > { %2841 = vmatpush.msrb.mxu0 %v2271_v52 }
 0x28c   : > { %2864 = vmatpush.msrb.mxu1 %v2272_v12  ;;  %2892 = vmatpush.msrb.mxu2 %v2193_v57  ;;  %v4716_v12 = vld [vmem:[#allocation4 + $0x88] sm:$0x1] }
 0x28d   : > { %v2573_v31 = vpop.f32.mrf.mxu0  ;;  %v2596_v18 = vpop.f32.mrf.mxu1  ;;  %2842 = vmatpush.msrb.mxu0 %v2255_v7 }
 0x28e   : > { %v6866_v56 = vmul.f32 %v4711_v30, %v2573_v31  ;;  %v6868_v36 = vmul.f32 %v4712_v16, %v2596_v18  ;;  %2865 = vmatpush.msrb.mxu1 %v2256_v0  ;;  %2893 = vmatpush.msrb.mxu2 %v2177_v47  ;;  %v4717_v47 = vld [vmem:[#allocation4 + $0x90] sm:$0x1]  ;;  %v4718_v31 = vld [vmem:[#allocation4 + $0x98] sm:$0x1]  ;;  %v4720_v16 = vld [vmem:[#allocation4 + $0x20] sm:$0xff] }
 0x28f   : > { %2843 = vmatpush.msrb.mxu0 %v2239_v19  ;;  %4386 = vmatmul.msk.f32.vlgmr.msrb.gmra.mxu2 %vm2549_vm3, %v6600_v41 }
 0x290   : > { %2956 = vrot.lane.b32.xlu1 %v6866_v56, %s4844_s22  ;;  %v3085_v62 = vrot.slane %v6868_v36, 1  ;;  %2866 = vmatpush.msrb.mxu1 %v2240_v54  ;;  %v3229_v40 = vrot.slane %v6868_v36, 2  ;;  %v3084_v49 = vrot.slane %v6866_v56, 1  ;;  %v3228_v14 = vrot.slane %v6866_v56, 2  ;;  %v6962_v54 = vpop.permute.xlu2 %4063 }
 0x291   : > { %2958 = vrot.lane.b32.xlu2 %v6868_v36, %s4844_s22  ;;  %2844 = vmatpush.msrb.mxu0 %v2223_v1  ;;  %v3372_v17 = vrot.slane %v6866_v56, 3  ;;  %v3373_v26 = vrot.slane %v6868_v36, 3  ;;  %v3517_v38 = vrot.slane %v6868_v36, 5  ;;  %v3516_v60 = vrot.slane %v6866_v56, 5 }
 0x292   : > { %3118 = vrot.lane.b32.xlu0 %v3085_v62, %s4845_s5  ;;  %2867 = vmatpush.msrb.mxu1 %v2224_v10  ;;  %v3660_v59 = vrot.slane %v6866_v56, 6  ;;  %v3804_v51 = vrot.slane %v6866_v56, 7 }
 0x293   : > { %2845 = vmatpush.msrb.mxu0 %v2207_v13 }
 0x294   : > { %2868 = vmatpush.msrb.mxu1 %v2208_v50 }
 0x295   : > { %2846 = vmatpush.msrb.mxu0 %v2191_v32  ;;  %v2599_v25 = vpop.f32.mrf.mxu1  ;;  %v2576_v27 = vpop.f32.mrf.mxu0 }
 0x296   : > { %2869 = vmatpush.msrb.mxu1 %v2192_v11  ;;  %v2940_v52 = vmul.f32 %v4715_v9, %v2576_v27  ;;  %v2941_v57 = vmul.f32 %v4716_v12, %v2599_v25  ;;  %v2622_v15 = vpop.f32.mrf.mxu2  ;;  %v2645_v7 = vpop.f32.mrf.mxu3 }
 0x297   : > { %2847 = vmatpush.msrb.mxu0 %v2175_v24  ;;  %4387 = vmatmul.msk.f32.gmra.mxu2 %vm2549_vm3, %v6713_v61  ;;  %v2942_v20 = vmul.f32 %v4717_v47, %v2622_v15  ;;  %v2943_v18 = vmul.f32 %v4718_v31, %v2645_v7  ;;  %v4723_v31 = vld [vmem:[#allocation4 + $0xa0] sm:$0x1] }
 0x298   : > { %3262 = vrot.lane.b32.xlu1 %v3229_v40, %s4846_s27  ;;  %2870 = vmatpush.msrb.mxu1 %v2176_v55 }
 0x299   : > { %3116 = vrot.lane.b32.xlu2 %v3084_v49, %s4845_s5  ;;  %4382 = vmatmul.msk.f32.vlgmr.msrb.gmra.mxu0 %vm2549_vm3, %v6600_v41 }
 0x29a   : > { %3260 = vrot.lane.b32.xlu0 %v3228_v14, %s4846_s27  ;;  %4384 = vmatmul.msk.f32.vlgmr.msrb.gmra.mxu1 %vm2549_vm3, %v6600_v41  ;;  %v3661_v41 = vrot.slane %v6868_v36, 6 }
 0x29d   : > { %v2688_v0 = vpop.f32.mrf.mxu1  ;;  %v2665_v30 = vpop.f32.mrf.mxu0 }
 0x29e   : > { %v6954_v19 = vmul.f32 %v4719_v8, %v2688_v0  ;;  %v6960_v45 = vmul.f32 %v4720_v16, %v2665_v30  ;;  %v2734_v55 = vpop.f32.mrf.mxu3  ;;  %v2711_v14 = vpop.f32.mrf.mxu2 }
 0x2a0   : > { %3404 = vrot.lane.b32.xlu1 %v3372_v17, %s4847_s29  ;;  %v3089_v23 = vrot.slane %v6954_v19, 1  ;;  %v3088_v1 = vrot.slane %v6960_v45, 1  ;;  %v3232_v28 = vrot.slane %v6960_v45, 2  ;;  %v3233_v10 = vrot.slane %v6954_v19, 2 }
 0x2a1   : > { %3406 = vrot.lane.b32.xlu2 %v3373_v26, %s4847_s29  ;;  %4383 = vmatmul.msk.f32.gmra.mxu0 %vm2549_vm3, %v6713_v61  ;;  %v3377_v21 = vrot.slane %v6954_v19, 3  ;;  %v3521_v39 = vrot.slane %v6954_v19, 5  ;;  %v3376_v50 = vrot.slane %v6960_v45, 3  ;;  %v3520_v32 = vrot.slane %v6960_v45, 5  ;;  %v4721_v26 = vld [vmem:[#allocation4 + $0x38] sm:$0xff] }
 0x2a2   : > { %3550 = vrot.lane.b32.xlu0 %v3517_v38, %s4849_s10  ;;  %4385 = vmatmul.msk.f32.gmra.mxu1 %vm2549_vm3, %v6713_v61  ;;  %v3805_v61 = vrot.slane %v6868_v36, 7  ;;  %v3664_v24 = vrot.slane %v6960_v45, 6  ;;  %v3665_v40 = vrot.slane %v6954_v19, 6  ;;  %v3809_v49 = vrot.slane %v6954_v19, 7 }
 0x2a3   : > { %v6996_v38 = vmul.f32 %v4721_v26, %v2734_v55 }
 0x2a5   : > { %v3523_v27 = vrot.slane %v6996_v38, 5  ;;  %v2668_v47 = vpop.f32.mrf.mxu0  ;;  %v2691_v30 = vpop.f32.mrf.mxu1 }
 0x2a8   : > { %3694 = vrot.lane.b32.xlu1 %v3661_v41, %s4848_s30 }
 0x2a9   : > { %3548 = vrot.lane.b32.xlu2 %v3516_v60, %s4849_s10 }
 0x2aa   : > { %3692 = vrot.lane.b32.xlu0 %v3660_v59, %s4848_s30 }
 0x2b0   : > { %3836 = vrot.lane.b32.xlu1 %v3804_v51, %s4851_s12  ;;  %v7006_v51 = vmul.f32 %v4722_v4, %v2711_v14  ;;  %v2714_v4 = vpop.f32.mrf.mxu2 }
 0x2b1   : > { %3838 = vrot.lane.b32.xlu2 %v3805_v61, %s4851_s12 }
 0x2b2   : > { %2960 = vrot.lane.b32.xlu0 %v6916_v29, %s4844_s22  ;;  %v3090_v25 = vrot.slane %v7006_v51, 1  ;;  %v3666_v15 = vrot.slane %v7006_v51, 6  ;;  %v3810_v8 = vrot.slane %v7006_v51, 7  ;;  %v3522_v16 = vrot.slane %v7006_v51, 5 }
 0x2b8   : > { %2962 = vrot.lane.b32.xlu1 %v6922_v44, %s4844_s22 }
 0x2b9   : > { %3122 = vrot.lane.b32.xlu2 %v3087_v46, %s4845_s5  ;;  %v3091_v46 = vrot.slane %v6996_v38, 1 }
 0x2ba   : > { %3266 = vrot.lane.b32.xlu0 %v3231_v63, %s4846_s27  ;;  %v3808_v63 = vrot.slane %v6960_v45, 7 }
 0x2c0   : > { %3120 = vrot.lane.b32.xlu1 %v3086_v22, %s4845_s5 }
 0x2c1   : > { %3264 = vrot.lane.b32.xlu2 %v3230_v35, %s4846_s27 }
 0x2c2   : > { %3408 = vrot.lane.b32.xlu0 %v3374_v43, %s4847_s29 }
 0x2c8   : > { %3410 = vrot.lane.b32.xlu1 %v3375_v37, %s4847_s29 }
 0x2c9   : > { %3554 = vrot.lane.b32.xlu2 %v3519_v3, %s4849_s10  ;;  %v3234_v3 = vrot.slane %v7006_v51, 2 }
 0x2ca   : > { %3698 = vrot.lane.b32.xlu0 %v3663_v6, %s4848_s30 }
 0x2d0   : > { %3552 = vrot.lane.b32.xlu1 %v3518_v48, %s4849_s10 }
 0x2d1   : > { %3696 = vrot.lane.b32.xlu2 %v3662_v42, %s4848_s30 }
 0x2d2   : > { %3840 = vrot.lane.b32.xlu0 %v3806_v34, %s4851_s12  ;;  %v3378_v34 = vrot.slane %v7006_v51, 3 }
 0x2d8   : > { %3842 = vrot.lane.b32.xlu1 %v3807_v5, %s4851_s12  ;;  %v3379_v5 = vrot.slane %v6996_v38, 3 }
 0x2d9   : > { %3948 = vrot.lane.b32.xlu2 %v2940_v52, %s4850_s11 }
 0x2da   : > { %3950 = vrot.lane.b32.xlu0 %v2941_v57, %s4850_s11  ;;  %v3667_v57 = vrot.slane %v6996_v38, 6 }
 0x2e0   : > { %3952 = vrot.lane.b32.xlu1 %v2942_v20, %s4850_s11 }
 0x2e1   : > { %3954 = vrot.lane.b32.xlu2 %v2943_v18, %s4850_s11  ;;  %v2944_v18 = vmul.f32 %v4723_v31, %v2668_v47 }
 0x2e2   : > { %2966 = vrot.lane.b32.xlu0 %v6954_v19, %s4844_s22 }
 0x2e8   : > { %3126 = vrot.lane.b32.xlu1 %v3089_v23, %s4845_s5 }
 0x2e9   : > { %2964 = vrot.lane.b32.xlu2 %v6960_v45, %s4844_s22 }
 0x2ea   : > { %3124 = vrot.lane.b32.xlu0 %v3088_v1, %s4845_s5 }
 0x2eb   : > { %v6970_v62 = vpop.permute.xlu2 %2958 }
 0x2f0   : > { %3268 = vrot.lane.b32.xlu1 %v3232_v28, %s4846_s27 }
 0x2f1   : > { %3270 = vrot.lane.b32.xlu2 %v3233_v10, %s4846_s27  ;;  %v2737_v10 = vpop.f32.mrf.mxu3 }
 0x2f2   : > { %3414 = vrot.lane.b32.xlu0 %v3377_v21, %s4847_s29 }
 0x2f3   : > { %v6978_v13 = vpop.permute.xlu2 %3116 }
 0x2f8   : > { %3558 = vrot.lane.b32.xlu1 %v3521_v39, %s4849_s10  ;;  %v4724_v39 = vld [vmem:[#allocation4 + $0xa8] sm:$0x1] }
 0x2f9   : > { %3412 = vrot.lane.b32.xlu2 %v3376_v50, %s4847_s29  ;;  %v2945_v50 = vmul.f32 %v4724_v39, %v2691_v30 }
 0x2fa   : > { %3556 = vrot.lane.b32.xlu0 %v3520_v32, %s4849_s10 }
 0x2fb   : > { %v6986_v11 = vpop.permute.xlu2 %3406 }
 0x300   : > { %3700 = vrot.lane.b32.xlu1 %v3664_v24, %s4848_s30 }
 0x301   : > { %3702 = vrot.lane.b32.xlu2 %v3665_v40, %s4848_s30  ;;  %v4725_v40 = vld [vmem:[#allocation4 + $0xb8] sm:$0x1] }
 0x302   : > { %v6993_v17 = vpop.permute.xlu1 %2956  ;;  %3846 = vrot.lane.b32.xlu0 %v3809_v49, %s4851_s12  ;;  %v2947_v55 = vmul.f32 %v4725_v40, %v2737_v10  ;;  %v3811_v49 = vrot.slane %v6996_v38, 7 }
 0x303   : > { %v3002_v41 = vsel %vm403_vm2, %v6993_v17, %v6970_v62  ;;  %v7002_v60 = vpop.permute.xlu2 %3548 }
 0x304   : > { %v3021_v59 = vrot.slane %v3002_v41, 4  ;;  %v7004_v53 = vpop.permute.xlu0 %3118  ;;  %v2780_v41 = vpop.f32.mrf.mxu1 }
 0x305   : > { %v3162_v33 = vsel %vm500_vm0, %v6978_v13, %v7004_v53 }
 0x306   : > { %v3053_v61 = vadd.f32 %v3021_v59, %v6868_v36  ;;  %v3181_v58 = vrot.slane %v3162_v33, 4  ;;  %v3235_v36 = vrot.slane %v6996_v38, 2 }
 0x308   : > { %v7015_v22 = vadd.f32 %v3181_v58, %v3053_v61  ;;  %2968 = vrot.lane.b32.xlu1 %v7006_v51, %s4844_s22 }
 0x309   : > { %3844 = vrot.lane.b32.xlu2 %v3808_v63, %s4851_s12 }
 0x30a   : > { %v7020_v35 = vpop.permute.xlu1 %3262  ;;  %3130 = vrot.lane.b32.xlu0 %v3091_v46, %s4845_s5  ;;  %v4726_v46 = vld [vmem:[#allocation4 + $0x48] sm:$0xff] }
 0x30b   : > { %v7023_v43 = vpop.permute.xlu2 %3838  ;;  %v7094_v63 = vmul.f32 %v4726_v46, %v2780_v41 }
 0x30c   : > { %v7025_v37 = vpop.permute.xlu0 %3260 }
 0x30d   : > { %v3381_v46 = vrot.slane %v7094_v63, 3 }
 0x310   : > { %3274 = vrot.lane.b32.xlu1 %v3235_v36, %s4846_s27  ;;  %v2757_v36 = vpop.f32.mrf.mxu0 }
 0x311   : > { %2970 = vrot.lane.b32.xlu2 %v6996_v38, %s4844_s22 }
 0x312   : > { %v7032_v6 = vpop.permute.xlu1 %3404  ;;  %3272 = vrot.lane.b32.xlu0 %v3234_v3, %s4846_s27 }
 0x313   : > { %v7035_v48 = vpop.permute.xlu2 %3122  ;;  %v3450_v41 = vsel %vm662_vm5, %v7032_v6, %v6986_v11 }
 0x314   : > { %v7037_v42 = vpop.permute.xlu0 %3550 }
 0x318   : > { %3416 = vrot.lane.b32.xlu1 %v3378_v34, %s4847_s29 }
 0x319   : > { %3128 = vrot.lane.b32.xlu2 %v3090_v25, %s4845_s5 }
 0x31a   : > { %v7044_v9 = vpop.permute.xlu1 %3694  ;;  %3562 = vrot.lane.b32.xlu0 %v3523_v27, %s4849_s10 }
 0x31b   : > { %v3265_v52 = vpop.permute.xlu2 %3264 }
 0x31c   : > { %v7047_v12 = vpop.permute.xlu0 %3692  ;;  %v3305_v59 = vsel %vm581_vm1, %v7020_v35, %v3265_v52 }
 0x320   : > { %3706 = vrot.lane.b32.xlu1 %v3667_v57, %s4848_s30  ;;  %v3326_v57 = vrot.slane %v3305_v59, 4 }
 0x321   : > { %3418 = vrot.lane.b32.xlu2 %v3379_v5, %s4847_s29 }
 0x322   : > { %v7054_v7 = vpop.permute.xlu1 %3836  ;;  %3704 = vrot.lane.b32.xlu0 %v3666_v15, %s4848_s30  ;;  %v4727_v15 = vld [vmem:[#allocation4 + $0xb0] sm:$0x1] }
 0x323   : > { %v7057_v0 = vpop.permute.xlu2 %3554  ;;  %v2946_v47 = vmul.f32 %v4727_v15, %v2714_v4 }
 0x324   : > { %v2961_v20 = vpop.permute.xlu0 %2960 }
 0x325   : > { %v3001_v32 = vsel %vm403_vm2, %v6970_v62, %v2961_v20 }
 0x326   : > { %v3022_v14 = vrot.slane %v3001_v32, 4 }
 0x328   : > { %3848 = vrot.lane.b32.xlu1 %v3810_v8, %s4851_s12  ;;  %v3054_v3 = vadd.f32 %v3022_v14, %v6916_v29  ;;  %v3306_v14 = vsel %vm581_vm1, %v7025_v37, %v7020_v35 }
 0x329   : > { %3560 = vrot.lane.b32.xlu2 %v3522_v16, %s4849_s10 }
 0x32a   : > { %v7063_v23 = vpop.permute.xlu1 %2962  ;;  %3956 = vrot.lane.b32.xlu0 %v2944_v18, %s4850_s11  ;;  %v4728_v18 = vld [vmem:[#allocation4 + $0x40] sm:$0xff] }
 0x32b   : > { %v7066_v1 = vpop.permute.xlu2 %3696  ;;  %v3000_v28 = vsel %vm403_vm2, %v2961_v20, %v7063_v23  ;;  %v7101_v8 = vmul.f32 %v4728_v18, %v2757_v36 }
 0x32c   : > { %v7071_v21 = vpop.permute.xlu0 %3266  ;;  %v3023_v26 = vrot.slane %v3000_v28, 4 }
 0x32d   : > { %v3304_v24 = vsel %vm581_vm1, %v3265_v52, %v7071_v21  ;;  %v3092_v40 = vrot.slane %v7101_v8, 1  ;;  %v3524_v18 = vrot.slane %v7101_v8, 5 }
 0x32e   : > { %v3055_v34 = vadd.f32 %v3023_v26, %v6922_v44  ;;  %v3327_v20 = vrot.slane %v3304_v24, 4 }
 0x330   : > { %3958 = vrot.lane.b32.xlu1 %v2945_v50, %s4850_s11 }
 0x331   : > { %3850 = vrot.lane.b32.xlu2 %v3811_v49, %s4851_s12  ;;  %v3237_v49 = vrot.slane %v7094_v63, 2 }
 0x332   : > { %v3121_v62 = vpop.permute.xlu1 %3120  ;;  %3962 = vrot.lane.b32.xlu0 %v2947_v55, %s4850_s11  ;;  %v3093_v55 = vrot.slane %v7094_v63, 1 }
 0x333   : > { %v7086_v33 = vpop.permute.xlu2 %3948  ;;  %v3160_v61 = vsel %vm500_vm0, %v3121_v62, %v7035_v48  ;;  %v3161_v58 = vsel %vm500_vm0, %v7004_v53, %v3121_v62  ;;  %v3325_v62 = vrot.slane %v3306_v14, 4 }
 0x334   : > { %v3182_v25 = vrot.slane %v3161_v58, 4  ;;  %v3183_v27 = vrot.slane %v3160_v61, 4  ;;  %v3409_v52 = vpop.permute.xlu0 %3408  ;;  %v3469_v58 = vrot.slane %v3450_v41, 4 }
 0x335   : > { %v3449_v5 = vsel %vm662_vm5, %v6986_v11, %v3409_v52  ;;  %v3236_v11 = vrot.slane %v7101_v8, 2 }
 0x336   : > { %v3214_v53 = vadd.f32 %v3182_v25, %v3054_v3  ;;  %v3215_v31 = vadd.f32 %v3183_v27, %v3055_v34  ;;  %v3470_v29 = vrot.slane %v3449_v5, 4  ;;  %v3357_v3 = vadd.f32 %v3325_v62, %v7015_v22 }
 0x338   : > { %v3358_v30 = vadd.f32 %v3326_v57, %v3214_v53  ;;  %2974 = vrot.lane.b32.xlu1 %v7094_v63, %s4844_s22  ;;  %v3359_v44 = vadd.f32 %v3327_v20, %v3215_v31  ;;  %v3501_v25 = vadd.f32 %v3469_v58, %v3357_v3  ;;  %v3737_v57 = vsel %vm824_vm7, %v7044_v9, %v7066_v1 }
 0x339   : > { %3960 = vrot.lane.b32.xlu2 %v2946_v47, %s4850_s11  ;;  %v3757_v53 = vrot.slane %v3737_v57, 4  ;;  %v3812_v57 = vrot.slane %v7101_v8, 7 }
 0x33a   : > { %v3502_v16 = vadd.f32 %v3470_v29, %v3358_v30  ;;  %v7106_v28 = vpop.permute.xlu1 %3410  ;;  %2972 = vrot.lane.b32.xlu0 %v7101_v8, %s4844_s22  ;;  %v3525_v29 = vrot.slane %v7094_v63, 5 }
 0x33b   : > { %v7110_v10 = vpop.permute.xlu2 %3954  ;;  %v3448_v39 = vsel %vm662_vm5, %v3409_v52, %v7106_v28 }
 0x33c   : > { %v3471_v50 = vrot.slane %v3448_v39, 4  ;;  %v7115_v32 = vpop.permute.xlu0 %3698 }
 0x33d   : > { %v3736_v47 = vsel %vm824_vm7, %v7066_v1, %v7115_v32  ;;  %v3669_v1 = vrot.slane %v7094_v63, 6 }
 0x33e   : > { %v7117_v24 = vadd.f32 %v3471_v50, %v3359_v44  ;;  %v3758_v44 = vrot.slane %v3736_v47, 4 }
 0x340   : > { %3132 = vrot.lane.b32.xlu1 %v3092_v40, %s4845_s5 }
 0x341   : > { %3134 = vrot.lane.b32.xlu2 %v3093_v55, %s4845_s5 }
 0x342   : > { %v3553_v26 = vpop.permute.xlu1 %3552  ;;  %3278 = vrot.lane.b32.xlu0 %v3237_v49, %s4846_s27 }
 0x343   : > { %v2965_v59 = vpop.permute.xlu2 %2964  ;;  %v3593_v35 = vsel %vm743_vm6, %v7037_v42, %v3553_v26  ;;  %v3592_v36 = vsel %vm743_vm6, %v3553_v26, %v7057_v0 }
 0x344   : > { %v7136_v4 = vsel %vm403_vm2, %v7063_v23, %v2965_v59  ;;  %v3841_v61 = vpop.permute.xlu0 %3840  ;;  %v3613_v34 = vrot.slane %v3593_v35, 4  ;;  %v3380_v23 = vrot.slane %v7101_v8, 3  ;;  %v3614_v27 = vrot.slane %v3592_v36, 4 }
 0x345   : > { %v3881_v30 = vsel %vm905_vm12, %v7023_v43, %v3841_v61  ;;  %v7193_v36 = vperm.slane %v6962_v54, 0 }
 0x346   : > { %v3645_v22 = vadd.f32 %v3613_v34, %v3501_v25  ;;  %v3646_v31 = vadd.f32 %v3614_v27, %v3502_v16  ;;  %v3901_v40 = vrot.slane %v3881_v30, 4  ;;  %v3813_v34 = vrot.slane %v7094_v63, 7 }
 0x348   : > { %3422 = vrot.lane.b32.xlu1 %v3381_v46, %s4847_s29  ;;  %v3789_v39 = vadd.f32 %v3757_v53, %v3645_v22  ;;  %v3790_v55 = vadd.f32 %v3758_v44, %v3646_v31  ;;  %v2803_v22 = vpop.f32.mrf.mxu2  ;;  %v4729_v31 = vld [vmem:[#allocation4 + $0xc0] sm:$0x1] }
 0x349   : > { %3276 = vrot.lane.b32.xlu2 %v3236_v11, %s4846_s27 }
 0x34a   : > { %v7150_v52 = vpop.permute.xlu1 %3842  ;;  %3420 = vrot.lane.b32.xlu0 %v3380_v23, %s4847_s29  ;;  %v3933_v41 = vadd.f32 %v3901_v40, %v3789_v39  ;;  %v3668_v23 = vrot.slane %v7101_v8, 6  ;;  %v2826_v39 = vpop.f32.mrf.mxu3 }
 0x34b   : > { %v7157_v5 = vpop.permute.xlu2 %3270  ;;  %v3880_v20 = vsel %vm905_vm12, %v3841_v61, %v7150_v52 }
 0x34c   : > { %v7159_v15 = vpop.permute.xlu0 %3950  ;;  %v3902_v50 = vrot.slane %v3880_v20, 4  ;;  %v2783_v20 = vpop.f32.mrf.mxu1 }
 0x34e   : > { %v3934_v62 = vadd.f32 %v3902_v50, %v3790_v55  ;;  %v3024_v50 = vrot.slane %v7136_v4, 4 }
 0x350   : > { %3564 = vrot.lane.b32.xlu1 %v3524_v18, %s4849_s10 }
 0x351   : > { %3566 = vrot.lane.b32.xlu2 %v3525_v29, %s4849_s10  ;;  %v4730_v29 = vld [vmem:[#allocation4 + $0x50] sm:$0xff] }
 0x352   : > { %v3953_v16 = vpop.permute.xlu1 %3952  ;;  %3710 = vrot.lane.b32.xlu0 %v3669_v1, %s4848_s30  ;;  %v7213_v44 = vmul.f32 %v4730_v29, %v2803_v22  ;;  %v4731_v1 = vld [vmem:[#allocation4 + $0xc8] sm:$0x1] }
 0x353   : > { %v3992_v49 = vsel %vm954_vm9, %v3953_v16, %v7110_v10  ;;  %v3993_v14 = vsel %vm954_vm9, %v7159_v15, %v3953_v16  ;;  %v7183_v26 = vpop.permute.xlu2 %3412  ;;  %v2949_v40 = vmul.f32 %v4731_v1, %v2783_v20  ;;  %v4732_v16 = vld [vmem:[#allocation4 + $0x58] sm:$0xff] }
 0x354   : > { %v4013_v61 = vrot.slane %v3993_v14, 4  ;;  %v4014_v35 = vrot.slane %v3992_v49, 4  ;;  %v7185_v58 = vpop.permute.xlu0 %2966  ;;  %v7217_v49 = vmul.f32 %v4732_v16, %v2826_v39  ;;  %v3056_v14 = vadd.f32 %v3024_v50, %v6960_v45 }
 0x355   : > { %v7190_v46 = vsel %vm403_vm2, %v2965_v59, %v7185_v58  ;;  %v2760_v59 = vpop.f32.mrf.mxu0  ;;  %v3447_v4 = vsel %vm662_vm5, %v7106_v28, %v7183_v26  ;;  %v3382_v22 = vrot.slane %v7213_v44, 3  ;;  %v3094_v20 = vrot.slane %v7213_v44, 1 }
 0x356   : > { %v4045_v11 = vadd.f32 %v4013_v61, %v3933_v41  ;;  %v4046_v3 = vadd.f32 %v4014_v35, %v3934_v62  ;;  %v2948_v18 = vmul.f32 %v4729_v31, %v2760_v59  ;;  %v3095_v45 = vrot.slane %v7217_v49, 1 }
 0x357   : > { %v3527_v16 = vrot.slane %v7217_v49, 5 }
 0x358   : > { %v4068_v25 = vadd.f32 %v7193_v36, %v4045_v11  ;;  %v4069_v27 = vadd.f32 %v7193_v36, %v4046_v3  ;;  %3854 = vrot.lane.b32.xlu1 %v3813_v34, %s4851_s12  ;;  %v3239_v3 = vrot.slane %v7217_v49, 2  ;;  %v3472_v34 = vrot.slane %v3447_v4, 4 }
 0x359   : > { %3708 = vrot.lane.b32.xlu2 %v3668_v23, %s4848_s30 }
 0x35a   : > { %4100 = vst [vmem:[#allocation1 + $0x9] sm:$0xff] %v4068_v25  ;;  %v7202_v54 = vpop.permute.xlu1 %3126  ;;  %3852 = vrot.lane.b32.xlu0 %v3812_v57, %s4851_s12  ;;  %v3238_v57 = vrot.slane %v7213_v44, 2 }
 0x35b   : > { %4101 = vst [vmem:[#allocation1 + $0x12] sm:$0xff] %v4069_v27  ;;  %v7205_v47 = vpop.permute.xlu2 %3702 }
 0x35c   : > { %v7207_v53 = vpop.permute.xlu0 %3124 }
 0x35d   : > { %v3159_v30 = vsel %vm500_vm0, %v7035_v48, %v7207_v53 }
 0x35e   : > { %v3184_v55 = vrot.slane %v3159_v30, 4 }
 0x360   : > { %3964 = vrot.lane.b32.xlu1 %v2948_v18, %s4850_s11  ;;  %v3216_v61 = vadd.f32 %v3184_v55, %v3056_v14  ;;  %v3671_v14 = vrot.slane %v7217_v49, 6 }
 0x361   : > { %2976 = vrot.lane.b32.xlu2 %v7213_v44, %s4844_s22 }
 0x362   : > { %v7222_v48 = vpop.permute.xlu1 %3268  ;;  %3966 = vrot.lane.b32.xlu0 %v2949_v40, %s4850_s11 }
 0x363   : > { %v7229_v41 = vpop.permute.xlu2 %3844  ;;  %v3303_v62 = vsel %vm581_vm1, %v7071_v21, %v7222_v48 }
 0x364   : > { %v3328_v35 = vrot.slane %v3303_v62, 4  ;;  %v7235_v11 = vpop.permute.xlu0 %3414  ;;  %v3879_v30 = vsel %vm905_vm12, %v7150_v52, %v7229_v41  ;;  %v3383_v52 = vrot.slane %v7217_v49, 3 }
 0x365   : > { %v3903_v40 = vrot.slane %v3879_v30, 4  ;;  %v2829_v30 = vpop.f32.mrf.mxu3 }
 0x366   : > { %v3360_v23 = vadd.f32 %v3328_v35, %v3216_v61 }
 0x368   : > { %3138 = vrot.lane.b32.xlu1 %v3095_v45, %s4845_s5  ;;  %v7240_v28 = vadd.f32 %v3472_v34, %v3360_v23  ;;  %v3670_v23 = vrot.slane %v7213_v44, 6 }
 0x369   : > { %3282 = vrot.lane.b32.xlu2 %v3239_v3, %s4846_s27 }
 0x36a   : > { %v7243_v25 = vpop.permute.xlu1 %3558  ;;  %2978 = vrot.lane.b32.xlu0 %v7217_v49, %s4844_s22 }
 0x36b   : > { %v7247_v21 = vpop.permute.xlu2 %2970 }
 0x36c   : > { %v7249_v27 = vpop.permute.xlu0 %3556 }
 0x36d   : > { %v3591_v59 = vsel %vm743_vm6, %v7057_v0, %v7249_v27 }
 0x36e   : > { %v3615_v31 = vrot.slane %v3591_v59, 4 }
 0x370   : > { %3280 = vrot.lane.b32.xlu1 %v3238_v57, %s4846_s27  ;;  %v3647_v39 = vadd.f32 %v3615_v31, %v7117_v24  ;;  %v3814_v57 = vrot.slane %v7213_v44, 7 }
 0x371   : > { %3424 = vrot.lane.b32.xlu2 %v3382_v22, %s4847_s29  ;;  %v3526_v22 = vrot.slane %v7213_v44, 5 }
 0x372   : > { %v7260_v18 = vpop.permute.xlu1 %3700  ;;  %3136 = vrot.lane.b32.xlu0 %v3094_v20, %s4845_s5  ;;  %v2806_v20 = vpop.f32.mrf.mxu2 }
 0x373   : > { %v7267_v29 = vpop.permute.xlu2 %3128  ;;  %v3735_v0 = vsel %vm824_vm7, %v7115_v32, %v7260_v18 }
 0x374   : > { %v3759_v50 = vrot.slane %v3735_v0, 4  ;;  %v7274_v1 = vpop.permute.xlu0 %3846 }
 0x376   : > { %v3791_v55 = vadd.f32 %v3759_v50, %v3647_v39  ;;  %v4733_v39 = vld [vmem:[#allocation4 + $0xd0] sm:$0x1] }
 0x377   : > { %v2950_v50 = vmul.f32 %v4733_v39, %v2806_v20 }
 0x378   : > { %3570 = vrot.lane.b32.xlu1 %v3527_v16, %s4849_s10  ;;  %v7280_v4 = vadd.f32 %v3903_v40, %v3791_v55  ;;  %v4734_v55 = vld [vmem:[#allocation4 + $0xd8] sm:$0x1] }
 0x379   : > { %3714 = vrot.lane.b32.xlu2 %v3671_v14, %s4848_s30  ;;  %v2951_v16 = vmul.f32 %v4734_v55, %v2829_v30  ;;  %v4736_v30 = vld [vmem:[#allocation4 + $0x60] sm:$0xff] }
 0x37a   : > { %v2969_v32 = vpop.permute.xlu1 %2968  ;;  %3426 = vrot.lane.b32.xlu0 %v3383_v52, %s4847_s29  ;;  %v2872_v52 = vpop.f32.mrf.mxu1 }
 0x37b   : > { %v7284_v24 = vpop.permute.xlu2 %3418  ;;  %v2996_v62 = vsel %vm403_vm2, %v2969_v32, %v7247_v21  ;;  %v2997_v55 = vsel %vm403_vm2, %v7185_v58, %v2969_v32 }
 0x37c   : > { %v3027_v61 = vrot.slane %v2996_v62, 4  ;;  %v7289_v35 = vpop.permute.xlu0 %3130 }
 0x37d   : > { %v3156_v45 = vsel %vm500_vm0, %v7267_v29, %v7289_v35 }
 0x37e   : > { %v3059_v3 = vadd.f32 %v3027_v61, %v6996_v38  ;;  %v3187_v34 = vrot.slane %v3156_v45, 4  ;;  %v3815_v61 = vrot.slane %v7217_v49, 7  ;;  %v2849_v45 = vpop.f32.mrf.mxu0 }
 0x37f   : > { %v7322_v39 = vmul.f32 %v4736_v30, %v2849_v45 }
 0x380   : > { %v3219_v59 = vadd.f32 %v3187_v34, %v3059_v3  ;;  %3712 = vrot.lane.b32.xlu1 %v3670_v23, %s4848_s30  ;;  %v4735_v34 = vld [vmem:[#allocation4 + $0x68] sm:$0xff] }
 0x381   : > { %3856 = vrot.lane.b32.xlu2 %v3814_v57, %s4851_s12  ;;  %v7313_v23 = vmul.f32 %v4735_v34, %v2872_v52  ;;  %v3302_v52 = vsel %vm581_vm1, %v7222_v48, %v7157_v5  ;;  %v3446_v48 = vsel %vm662_vm5, %v7183_v26, %v7235_v11  ;;  %v3157_v34 = vsel %vm500_vm0, %v7202_v54, %v7267_v29 }
 0x382   : > { %v7301_v31 = vpop.permute.xlu1 %3274  ;;  %3568 = vrot.lane.b32.xlu0 %v3526_v22, %s4849_s10  ;;  %v3329_v58 = vrot.slane %v3302_v52, 4  ;;  %v3186_v29 = vrot.slane %v3157_v34, 4 }
 0x383   : > { %v7304_v0 = vpop.permute.xlu2 %3560 }
 0x384   : > { %v3273_v38 = vpop.permute.xlu0 %3272 }
 0x385   : > { %v3300_v40 = vsel %vm581_vm1, %v3273_v38, %v7301_v31 }
 0x386   : > { %v3331_v14 = vrot.slane %v3300_v40, 4  ;;  %v3025_v40 = vrot.slane %v7190_v46, 4 }
 0x388   : > { %v3363_v62 = vadd.f32 %v3331_v14, %v3219_v59  ;;  %3968 = vrot.lane.b32.xlu1 %v2950_v50, %s4850_s11  ;;  %v3158_v50 = vsel %vm500_vm0, %v7207_v53, %v7202_v54  ;;  %v3097_v14 = vrot.slane %v7313_v23, 1  ;;  %v3026_v53 = vrot.slane %v2997_v55, 4 }
 0x389   : > { %3970 = vrot.lane.b32.xlu2 %v2951_v16, %s4850_s11  ;;  %v3057_v46 = vadd.f32 %v3025_v40, %v6954_v19  ;;  %v3301_v19 = vsel %vm581_vm1, %v7157_v5, %v3273_v38  ;;  %v3241_v54 = vrot.slane %v7313_v23, 2  ;;  %v3734_v5 = vsel %vm824_vm7, %v7260_v18, %v7205_v47 }
 0x38a   : > { %v3417_v3 = vpop.permute.xlu1 %3416  ;;  %3858 = vrot.lane.b32.xlu0 %v3815_v61, %s4851_s12  ;;  %v3185_v61 = vrot.slane %v3158_v50, 4  ;;  %v3058_v26 = vadd.f32 %v3026_v53, %v7006_v51  ;;  %v3473_v50 = vrot.slane %v3446_v48, 4  ;;  %v3330_v38 = vrot.slane %v3301_v19, 4 }
 0x38b   : > { %v7315_v57 = vpop.permute.xlu2 %3850  ;;  %v3444_v22 = vsel %vm662_vm5, %v3417_v3, %v7284_v24  ;;  %v3445_v40 = vsel %vm662_vm5, %v7235_v11, %v3417_v3  ;;  %v3096_v55 = vrot.slane %v7322_v39, 1  ;;  %v3240_v51 = vrot.slane %v7322_v39, 2 }
 0x38c   : > { %v3475_v59 = vrot.slane %v3444_v22, 4  ;;  %v7320_v20 = vpop.permute.xlu0 %3562  ;;  %v3217_v45 = vadd.f32 %v3185_v61, %v3057_v46  ;;  %v3589_v11 = vsel %vm743_vm6, %v7243_v25, %v7304_v0  ;;  %v3218_v3 = vadd.f32 %v3186_v29, %v3058_v26 }
 0x38d   : > { %v3760_v52 = vrot.slane %v3734_v5, 4  ;;  %v3588_v18 = vsel %vm743_vm6, %v7304_v0, %v7320_v20  ;;  %v3617_v34 = vrot.slane %v3589_v11, 4  ;;  %v3385_v5 = vrot.slane %v7313_v23, 3 }
 0x38e   : > { %v7332_v16 = vadd.f32 %v3475_v59, %v3363_v62  ;;  %v3590_v59 = vsel %vm743_vm6, %v7249_v27, %v7243_v25  ;;  %v3361_v30 = vadd.f32 %v3329_v58, %v3217_v45  ;;  %v3362_v46 = vadd.f32 %v3330_v38, %v3218_v3 }
 0x38f   : > { %v3616_v27 = vrot.slane %v3590_v59, 4  ;;  %v3878_v45 = vsel %vm905_vm12, %v7229_v41, %v7274_v1  ;;  %v3618_v26 = vrot.slane %v3588_v18, 4  ;;  %v3384_v41 = vrot.slane %v7322_v39, 3 }
 0x390   : > { %2980 = vrot.lane.b32.xlu1 %v7322_v39, %s4844_s22  ;;  %v3505_v53 = vadd.f32 %v3473_v50, %v3361_v30 }
 0x391   : > { %2982 = vrot.lane.b32.xlu2 %v7313_v23, %s4844_s22  ;;  %v3648_v48 = vadd.f32 %v3616_v27, %v7240_v28 }
 0x392   : > { %v7344_v32 = vpop.permute.xlu1 %3706  ;;  %3142 = vrot.lane.b32.xlu0 %v3097_v14, %s4845_s5  ;;  %v3474_v14 = vrot.slane %v3445_v40, 4  ;;  %v3649_v38 = vadd.f32 %v3617_v34, %v3505_v53 }
 0x393   : > { %v7351_v62 = vpop.permute.xlu2 %3960  ;;  %v3792_v30 = vadd.f32 %v3760_v52, %v3648_v48 }
 0x394   : > { %v3705_v22 = vpop.permute.xlu0 %3704  ;;  %v3506_v59 = vadd.f32 %v3474_v14, %v3362_v46 }
 0x395   : > { %v3733_v58 = vsel %vm824_vm7, %v7205_v47, %v3705_v22  ;;  %v3732_v0 = vsel %vm824_vm7, %v3705_v22, %v7344_v32 }
 0x396   : > { %v3761_v50 = vrot.slane %v3733_v58, 4  ;;  %v3762_v29 = vrot.slane %v3732_v0, 4  ;;  %v3650_v27 = vadd.f32 %v3618_v26, %v3506_v59  ;;  %v3673_v59 = vrot.slane %v7313_v23, 6 }
 0x398   : > { %3286 = vrot.lane.b32.xlu1 %v3241_v54, %s4846_s27  ;;  %v3904_v54 = vrot.slane %v3878_v45, 4  ;;  %v3794_v18 = vadd.f32 %v3762_v29, %v3650_v27 }
 0x399   : > { %3140 = vrot.lane.b32.xlu2 %v3096_v55, %s4845_s5 }
 0x39a   : > { %v3849_v61 = vpop.permute.xlu1 %3848  ;;  %3284 = vrot.lane.b32.xlu0 %v3240_v51, %s4846_s27  ;;  %v3793_v51 = vadd.f32 %v3761_v50, %v3649_v38  ;;  %v3936_v52 = vadd.f32 %v3904_v54, %v3792_v30  ;;  %v2918_v30 = vpop.f32.mrf.mxu3  ;;  %v3528_v50 = vrot.slane %v7322_v39, 5  ;;  %v3672_v54 = vrot.slane %v7322_v39, 6 }
 0x39b   : > { %v7389_v25 = vpop.permute.xlu2 %3134  ;;  %v3877_v47 = vsel %vm905_vm12, %v7274_v1, %v3849_v61  ;;  %v3876_v22 = vsel %vm905_vm12, %v3849_v61, %v7315_v57 }
 0x39c   : > { %v3957_v19 = vpop.permute.xlu0 %3956  ;;  %v3905_v55 = vrot.slane %v3877_v47, 4  ;;  %v3906_v11 = vrot.slane %v3876_v22, 4 }
 0x39d   : > { %v3991_v28 = vsel %vm954_vm9, %v7110_v10, %v3957_v19  ;;  %v3529_v10 = vrot.slane %v7313_v23, 5 }
 0x39e   : > { %v4015_v40 = vrot.slane %v3991_v28, 4  ;;  %v3937_v46 = vadd.f32 %v3905_v55, %v3793_v51  ;;  %v3938_v26 = vadd.f32 %v3906_v11, %v3794_v18  ;;  %v3816_v51 = vrot.slane %v7322_v39, 7  ;;  %v2895_v11 = vpop.f32.mrf.mxu2  ;;  %v4738_v18 = vld [vmem:[#allocation4 + $0x70] sm:$0xff] }
 0x3a0   : > { %v4047_v1 = vadd.f32 %v4015_v40, %v7280_v4  ;;  %3428 = vrot.lane.b32.xlu1 %v3384_v41, %s4847_s29 }
 0x3a1   : > { %3430 = vrot.lane.b32.xlu2 %v3385_v5, %s4847_s29 }
 0x3a2   : > { %v4070_v3 = vadd.f32 %v7193_v36, %v4047_v1  ;;  %v3959_v14 = vpop.permute.xlu1 %3958  ;;  %3574 = vrot.lane.b32.xlu0 %v3529_v10, %s4849_s10 }
 0x3a3   : > { %v3989_v4 = vsel %vm954_vm9, %v3959_v14, %v7351_v62  ;;  %v3990_v61 = vsel %vm954_vm9, %v3957_v19, %v3959_v14  ;;  %v3277_v53 = vpop.permute.xlu2 %3276 }
 0x3a4   : > { %4102 = vst [vmem:[#allocation1 + $0x1b] sm:$0xff] %v4070_v3  ;;  %v4016_v58 = vrot.slane %v3990_v61, 4  ;;  %v4017_v48 = vrot.slane %v3989_v4, 4  ;;  %v3299_v45 = vsel %vm581_vm1, %v7301_v31, %v3277_v53  ;;  %v7424_v34 = vpop.permute.xlu0 %3962  ;;  %v7453_v4 = vmul.f32 %v4738_v18, %v2895_v11 }
 0x3a5   : > { %v3988_v0 = vsel %vm954_vm9, %v7351_v62, %v7424_v34  ;;  %v4737_v62 = vld [vmem:[#allocation4 + $0x78] sm:$0xff] }
 0x3a6   : > { %v4048_v19 = vadd.f32 %v4016_v58, %v3936_v52  ;;  %v4049_v47 = vadd.f32 %v4017_v48, %v3937_v46  ;;  %v4018_v28 = vrot.slane %v3988_v0, 4  ;;  %v7437_v29 = vmul.f32 %v4737_v62, %v2918_v30  ;;  %v4739_v30 = vld [vmem:[#allocation4 + $0xe0] sm:$0x1] }
 0x3a7   : > { %v3817_v52 = vrot.slane %v7313_v23, 7 }
 0x3a8   : > { %v4071_v40 = vadd.f32 %v7193_v36, %v4048_v19  ;;  %v4072_v31 = vadd.f32 %v7193_v36, %v4049_v47  ;;  %v4050_v41 = vadd.f32 %v4018_v28, %v3938_v26  ;;  %3718 = vrot.lane.b32.xlu1 %v3673_v59, %s4848_s30  ;;  %v3099_v27 = vrot.slane %v7437_v29, 1 }
 0x3a9   : > { %3572 = vrot.lane.b32.xlu2 %v3528_v50, %s4849_s10  ;;  %v3531_v11 = vrot.slane %v7437_v29, 5 }
 0x3aa   : > { %4103 = vst [vmem:[#allocation1 + $0x24] sm:$0xff] %v4071_v40  ;;  %v4073_v22 = vadd.f32 %v7193_v36, %v4050_v41  ;;  %v2975_v5 = vpop.permute.xlu1 %2974  ;;  %3716 = vrot.lane.b32.xlu0 %v3672_v54, %s4848_s30  ;;  %v3242_v40 = vrot.slane %v7453_v4, 2 }
 0x3ab   : > { %4104 = vst [vmem:[#allocation1 + $0x2d] sm:$0xff] %v4072_v31  ;;  %v7441_v38 = vpop.permute.xlu2 %3566  ;;  %v3332_v31 = vrot.slane %v3299_v45, 4 }
 0x3ac   : > { %4105 = vst [vmem:[#allocation1 + $0x36] sm:$0xff] %v4073_v22  ;;  %v2973_v55 = vpop.permute.xlu0 %2972 }
 0x3ad   : > { %v2994_v1 = vsel %vm403_vm2, %v2973_v55, %v2975_v5  ;;  %v2995_v10 = vsel %vm403_vm2, %v7247_v21, %v2973_v55  ;;  %v2852_v21 = vpop.f32.mrf.mxu0  ;;  %v3098_v55 = vrot.slane %v7453_v4, 1 }
 0x3ae   : > { %v3028_v3 = vrot.slane %v2995_v10, 4  ;;  %v3029_v14 = vrot.slane %v2994_v1, 4  ;;  %v2952_v50 = vmul.f32 %v4739_v30, %v2852_v21 }
 0x3b0   : > { %3860 = vrot.lane.b32.xlu1 %v3816_v51, %s4851_s12  ;;  %v3060_v0 = vadd.f32 %v3028_v3, %v7101_v8  ;;  %v3061_v59 = vadd.f32 %v3029_v14, %v7094_v63 }
 0x3b1   : > { %3146 = vrot.lane.b32.xlu2 %v3099_v27, %s4845_s5 }
 0x3b2   : > { %v3133_v61 = vpop.permute.xlu1 %3132  ;;  %3862 = vrot.lane.b32.xlu0 %v3817_v52, %s4851_s12 }
 0x3b3   : > { %v3154_v46 = vsel %vm500_vm0, %v3133_v61, %v7389_v25  ;;  %v3155_v58 = vsel %vm500_vm0, %v7289_v35, %v3133_v61  ;;  %v3709_v48 = vpop.permute.xlu2 %3708 }
 0x3b4   : > { %v3188_v26 = vrot.slane %v3155_v58, 4  ;;  %v3189_v19 = vrot.slane %v3154_v46, 4  ;;  %v7464_v47 = vpop.permute.xlu0 %3278 }
 0x3b5   : > { %v3298_v28 = vsel %vm581_vm1, %v3277_v53, %v7464_v47 }
 0x3b6   : > { %v3220_v41 = vadd.f32 %v3188_v26, %v3060_v0  ;;  %v3221_v35 = vadd.f32 %v3189_v19, %v3061_v59  ;;  %v3333_v54 = vrot.slane %v3298_v28, 4  ;;  %v3387_v19 = vrot.slane %v7437_v29, 3 }
 0x3b7   : > { %v3674_v28 = vrot.slane %v7453_v4, 6 }
 0x3b8   : > { %v3365_v62 = vadd.f32 %v3333_v54, %v3221_v35  ;;  %2986 = vrot.lane.b32.xlu1 %v7437_v29, %s4844_s22  ;;  %v3364_v63 = vadd.f32 %v3332_v31, %v3220_v41  ;;  %v3731_v41 = vsel %vm824_vm7, %v7344_v32, %v3709_v48 }
 0x3b9   : > { %3288 = vrot.lane.b32.xlu2 %v3242_v40, %s4846_s27 }
 0x3ba   : > { %v3423_v8 = vpop.permute.xlu1 %3422  ;;  %3972 = vrot.lane.b32.xlu0 %v2952_v50, %s4850_s11 }
 0x3bb   : > { %v7474_v22 = vpop.permute.xlu2 %2976 }
 0x3bc   : > { %v7479_v53 = vsel %vm403_vm2, %v2975_v5, %v7474_v22  ;;  %v3421_v45 = vpop.permute.xlu0 %3420 }
 0x3bd   : > { %v3442_v1 = vsel %vm662_vm5, %v3421_v45, %v3423_v8  ;;  %v3443_v10 = vsel %vm662_vm5, %v7284_v24, %v3421_v45  ;;  %v3819_v45 = vrot.slane %v7437_v29, 7 }
 0x3be   : > { %v3476_v27 = vrot.slane %v3443_v10, 4  ;;  %v3477_v51 = vrot.slane %v3442_v1, 4  ;;  %v3386_v10 = vrot.slane %v7453_v4, 3 }
 0x3c0   : > { %v3508_v3 = vadd.f32 %v3476_v27, %v3364_v63  ;;  %v7488_v14 = vadd.f32 %v3477_v51, %v3365_v62  ;;  %3144 = vrot.lane.b32.xlu1 %v3098_v55, %s4845_s5  ;;  %v3530_v63 = vrot.slane %v7453_v4, 5  ;;  %v3763_v55 = vrot.slane %v3731_v41, 4 }
 0x3c1   : > { %3578 = vrot.lane.b32.xlu2 %v3531_v11, %s4849_s10 }
 0x3c2   : > { %v3565_v5 = vpop.permute.xlu1 %3564  ;;  %2984 = vrot.lane.b32.xlu0 %v7453_v4, %s4844_s22  ;;  %s260_s22 = sand.u32 1, %s4831_s24  }
 0x3c3   : > { %v3586_v52 = vsel %vm743_vm6, %v3565_v5, %v7441_v38  ;;  %v3587_v24 = vsel %vm743_vm6, %v7320_v20, %v3565_v5  ;;  %v7500_v18 = vpop.permute.xlu2 %3282  ;;  %v3243_v20 = vrot.slane %v7437_v29, 2  ;;  %s4212_s5 = sshll.u32 %s260_s22, 4  ;;  %s4123_s18 = scalar_lea.sflag [#allocation6], %s260_s22 }
 0x3c4   : > { %v3619_v61 = vrot.slane %v3587_v24, 4  ;;  %v3620_v21 = vrot.slane %v3586_v52, 4  ;;  %v7502_v46 = vpop.permute.xlu0 %3710 }
 0x3c5   : > { %v3730_v58 = vsel %vm824_vm7, %v3709_v48, %v7502_v46 }
 0x3c6   : > { %v3651_v0 = vadd.f32 %v3619_v61, %v7332_v16  ;;  %v3652_v59 = vadd.f32 %v3620_v21, %v3508_v3  ;;  %v3764_v26 = vrot.slane %v3730_v58, 4  ;;  %v3818_v61 = vrot.slane %v7453_v4, 7 }
 0x3c8   : > { %v3796_v30 = vadd.f32 %v3764_v26, %v3652_v59  ;;  %3434 = vrot.lane.b32.xlu1 %v3387_v19, %s4847_s29  ;;  %v3795_v32 = vadd.f32 %v3763_v55, %v3651_v0  ;;  %v2875_v0 = vpop.f32.mrf.mxu1  ;;  %v2898_v26 = vpop.f32.mrf.mxu2  ;;  %v3030_v55 = vrot.slane %v7479_v53, 4 }
 0x3c9   : > { %3720 = vrot.lane.b32.xlu2 %v3674_v28, %s4848_s30  ;;  %v2921_v28 = vpop.f32.mrf.mxu3 }
 0x3ca   : > { %v3855_v50 = vpop.permute.xlu1 %3854  ;;  %3290 = vrot.lane.b32.xlu0 %v3243_v20, %s4846_s27 }
 0x3cb   : > { %v7514_v40 = vpop.permute.xlu2 %3424 }
 0x3cc   : > { %v7519_v16 = vsel %vm662_vm5, %v3423_v8, %v7514_v40  ;;  %v3853_v31 = vpop.permute.xlu0 %3852 }
 0x3cd   : > { %v3874_v35 = vsel %vm905_vm12, %v3853_v31, %v3855_v50  ;;  %v3875_v54 = vsel %vm905_vm12, %v7315_v57, %v3853_v31 }
 0x3ce   : > { %v3908_v62 = vrot.slane %v3874_v35, 4  ;;  %v3907_v8 = vrot.slane %v3875_v54, 4  ;;  %v4741_v35 = vld [vmem:[#allocation4 + $0xe8] sm:$0x1] }
 0x3cf   : > { %v2953_v54 = vmul.f32 %v4741_v35, %v2875_v0 }
 0x3d0   : > { %v3940_v1 = vadd.f32 %v3908_v62, %v3796_v30  ;;  %3576 = vrot.lane.b32.xlu1 %v3530_v63, %s4849_s10  ;;  %v3939_v51 = vadd.f32 %v3907_v8, %v3795_v32  ;;  %v4740_v30 = vld [vmem:[#allocation4 + $0xf0] sm:$0x1]  ;;  %v4742_v63 = vld [vmem:[#allocation4 + $0xf8] sm:$0x1]  ;;  %s262_s10 = scalar_lea.vmem [#allocation7], %s4212_s5 }
 0x3d1   : > { %3866 = vrot.lane.b32.xlu2 %v3819_v45, %s4851_s12  ;;  %v2954_v20 = vmul.f32 %v4740_v30, %v2898_v26  ;;  %v2955_v45 = vmul.f32 %v4742_v63, %v2921_v28 }
 0x3d2   : > { %v3965_v48 = vpop.permute.xlu1 %3964  ;;  %3432 = vrot.lane.b32.xlu0 %v3386_v10, %s4847_s29 }
 0x3d3   : > { %v3987_v57 = vsel %vm954_vm9, %v7424_v34, %v3965_v48  ;;  %v7538_v27 = vpop.permute.xlu2 %3714  ;;  %v3675_v34 = vrot.slane %v7437_v29, 6 }
 0x3d4   : > { %v4019_v11 = vrot.slane %v3987_v57, 4  ;;  %v7540_v3 = vpop.permute.xlu0 %3966  ;;  %v3062_v57 = vadd.f32 %v3030_v55, %v7213_v44 }
 0x3d5   : > { %v3986_v5 = vsel %vm954_vm9, %v3965_v48, %v7540_v3 }
 0x3d6   : > { %v4051_v52 = vadd.f32 %v4019_v11, %v3939_v51  ;;  %v4020_v24 = vrot.slane %v3986_v5, 4 }
 0x3d8   : > { %v4074_v21 = vadd.f32 %v7193_v36, %v4051_v52  ;;  %v7547_v58 = vadd.f32 %v4020_v24, %v3940_v1  ;;  %3864 = vrot.lane.b32.xlu1 %v3818_v61, %s4851_s12 }
 0x3d9   : > { %3976 = vrot.lane.b32.xlu2 %v2954_v20, %s4850_s11 }
 0x3da   : > { %4106 = vst [vmem:[#allocation1 + $0x3f] sm:$0xff] %v4074_v21  ;;  %v7551_v59 = vpop.permute.xlu1 %3138  ;;  %3722 = vrot.lane.b32.xlu0 %v3675_v34, %s4848_s30  ;;  %v3478_v21 = vrot.slane %v7519_v16, 4  ;;  %s4133_s30 = scalar_lea.hbm %s7831_s6, %s4950_s17  ;;  %s4793_s17 = scalar_lea.hbm %s7831_s6, 32 }
 0x3db   : > { %v7554_v19 = vpop.permute.xlu2 %3856  ;;  %s4137_s12 = sshll.u32 %s4133_s30, 4  ;;  %s4138_s12 = int_to_ptr.hbm [resolvable:$true] %s4137_s12 }
 0x3dc   : > { %v3873_v31 = vsel %vm905_vm12, %v3855_v50, %v7554_v19  ;;  %v7559_v41 = vpop.permute.xlu0 %2978  ;;  %s4787_s19 = sshra.s32 %s4138_s12, 4  ;;  %s4788_s19 = int_to_ptr.hbm [resolvable:$true] %s4787_s19 }
 0x3dd   : > { %v2992_v62 = vsel %vm403_vm2, %v7474_v22, %v7559_v41  ;;  %s4789_s20 = scalar_lea.hbm %s4788_s19, 16  ;;  %p4794_p3 = scmp.lt.s32.totalorder %s4788_s19, %s7831_s6 }
 0x3de   : > { %v3031_v8 = vrot.slane %v2992_v62, 4  ;;  %p4790_p0 = scmp.ne.s32.totalorder %s4788_s19, %s4789_s20  ;;  %p4795_p4 = scmp.lt.s32.totalorder %s4793_s17, %s4789_s20 }
 0x3e0   : > { %3974 = vrot.lane.b32.xlu1 %v2953_v54, %s4850_s11  ;;  %v3063_v51 = vadd.f32 %v3031_v8, %v7217_v49  ;;  %p4791_p1 = pnand %p4790_p0, %p4929_p5  ;;  %p4796_p7 = por %p4795_p4, %p4794_p3 }
 0x3e2   : > { %v3281_v1 = vpop.permute.xlu1 %3280  ;;  %3978 = vrot.lane.b32.xlu0 %v2955_v45, %s4850_s11  ;;  %s4135_s11 = sshll.u32 %s262_s10, 4  ;;  %p4792_p2 = pneg %p4791_p1  ;;  %s4136_s11 = int_to_ptr.vmem [resolvable:$true] %s4135_s11 }
 0x3e3   : > { %v3297_v50 = vsel %vm581_vm1, %v7464_v47, %v3281_v1  ;;  %v7572_v10 = vpop.permute.xlu2 %3970  ;;  %v3296_v22 = vsel %vm581_vm1, %v3281_v1, %v7500_v18 }
 0x3e4   : > { %v3137_v32 = vpop.permute.xlu0 %3136  ;;  %v3334_v5 = vrot.slane %v3297_v50, 4  ;;  %v3335_v52 = vrot.slane %v3296_v22, 4  ;;  %v3909_v22 = vrot.slane %v3873_v31, 4  ;;  %p4797_p8 = pnand %p4796_p7, %p4792_p2 }
 0x3e5   : > { %v3152_v48 = vsel %vm500_vm0, %v3137_v32, %v7551_v59  ;;  %v3153_v53 = vsel %vm500_vm0, %v7389_v25, %v3137_v32 }
 0x3e6   : > { %v3190_v47 = vrot.slane %v3153_v53, 4  ;;  %v3191_v11 = vrot.slane %v3152_v48, 4 }
 0x3e8   : > { %v3222_v24 = vadd.f32 %v3190_v47, %v3062_v57  ;;  %v3223_v61 = vadd.f32 %v3191_v11, %v3063_v51 }
 0x3ea   : > { %v3366_v34 = vadd.f32 %v3334_v5, %v3222_v24  ;;  %v3571_v0 = vpop.permute.xlu1 %3570  ;;  %v3367_v26 = vadd.f32 %v3335_v52, %v3223_v61 }
 0x3eb   : > { %v7586_v28 = vpop.permute.xlu2 %2982 }
 0x3ec   : > { %v3427_v30 = vpop.permute.xlu0 %3426  ;;  %v3510_v20 = vadd.f32 %v3478_v21, %v3366_v34 }
 0x3ed   : > { %v3440_v44 = vsel %vm662_vm5, %v7514_v40, %v3427_v30 }
 0x3ee   : > { %v3479_v49 = vrot.slane %v3440_v44, 4 }
 0x3f0   : > { %v3511_v25 = vadd.f32 %v3479_v49, %v3367_v26 }
 0x3f2   : > { %v3713_v35 = vpop.permute.xlu1 %3712 }
 0x3f3   : > { %v3729_v54 = vsel %vm824_vm7, %v7502_v46, %v3713_v35  ;;  %v3141_v62 = vpop.permute.xlu2 %3140  ;;  %v3728_v63 = vsel %vm824_vm7, %v3713_v35, %v7538_v27 }
 0x3f4   : > { %v3569_v16 = vpop.permute.xlu0 %3568  ;;  %v3765_v1 = vrot.slane %v3729_v54, 4  ;;  %v3766_v50 = vrot.slane %v3728_v63, 4  ;;  %v3151_v26 = vsel %vm500_vm0, %v7551_v59, %v3141_v62 }
 0x3f5   : > { %v3584_v45 = vsel %vm743_vm6, %v3569_v16, %v3571_v0  ;;  %v3585_v40 = vsel %vm743_vm6, %v7441_v38, %v3569_v16 }
 0x3f6   : > { %v3621_v55 = vrot.slane %v3585_v40, 4  ;;  %v3622_v8 = vrot.slane %v3584_v45, 4  ;;  %v3192_v45 = vrot.slane %v3151_v26, 4 }
 0x3f8   : > { %v3653_v32 = vadd.f32 %v3621_v55, %v7488_v14  ;;  %v3654_v46 = vadd.f32 %v3622_v8, %v3510_v20 }
 0x3fa   : > { %v3797_v48 = vadd.f32 %v3765_v1, %v3653_v32  ;;  %v3969_v53 = vpop.permute.xlu1 %3968  ;;  %v3798_v57 = vadd.f32 %v3766_v50, %v3654_v46 }
 0x3fb   : > { %v3985_v51 = vsel %vm954_vm9, %v7540_v3, %v3969_v53  ;;  %v7606_v47 = vpop.permute.xlu2 %3430  ;;  %v3984_v52 = vsel %vm954_vm9, %v3969_v53, %v7572_v10 }
 0x3fc   : > { %v3941_v11 = vadd.f32 %v3909_v22, %v3797_v48  ;;  %v4021_v5 = vrot.slane %v3985_v51, 4  ;;  %v3859_v38 = vpop.permute.xlu0 %3858  ;;  %v4022_v61 = vrot.slane %v3984_v52, 4 }
 0x3fd   : > { %v3872_v14 = vsel %vm905_vm12, %v7554_v19, %v3859_v38 }
 0x3fe   : > { %v7614_v31 = vadd.f32 %v4021_v5, %v3941_v11  ;;  %v3910_v24 = vrot.slane %v3872_v14, 4 }
 0x400   : > { %v3942_v21 = vadd.f32 %v3910_v24, %v3798_v57 }
 0x402   : > { %v7616_v34 = vadd.f32 %v4022_v61, %v3942_v21  ;;  %v2981_v3 = vpop.permute.xlu1 %2980 }
 0x403   : > { %v2990_v20 = vsel %vm403_vm2, %v2981_v3, %v7586_v28  ;;  %v2991_v19 = vsel %vm403_vm2, %v7559_v41, %v2981_v3  ;;  %v7627_v44 = vpop.permute.xlu2 %3572 }
 0x404   : > { %v3032_v49 = vrot.slane %v2991_v19, 4  ;;  %v3033_v35 = vrot.slane %v2990_v20, 4  ;;  %v3583_v54 = vsel %vm743_vm6, %v3571_v0, %v7627_v44  ;;  %v3143_v16 = vpop.permute.xlu0 %3142 }
 0x405   : > { %v3623_v63 = vrot.slane %v3583_v54, 4  ;;  %v3150_v59 = vsel %vm500_vm0, %v3141_v62, %v3143_v16 }
 0x406   : > { %v3064_v40 = vadd.f32 %v3032_v49, %v7322_v39  ;;  %v3065_v55 = vadd.f32 %v3033_v35, %v7313_v23  ;;  %v3193_v8 = vrot.slane %v3150_v59, 4 }
 0x407   : > { %v3655_v41 = vadd.f32 %v3623_v63, %v3511_v25 }
 0x408   : > { %v7636_v1 = vadd.f32 %v3193_v8, %v3065_v55  ;;  %v3224_v50 = vadd.f32 %v3192_v45, %v3064_v40 }
 0x40a   : > { %v3287_v32 = vpop.permute.xlu1 %3286 }
 0x40b   : > { %v3147_v11 = vpop.permute.xlu2 %3146 }
 0x40c   : > { %v3285_v46 = vpop.permute.xlu0 %3284 }
 0x40d   : > { %v3295_v0 = vsel %vm581_vm1, %v7500_v18, %v3285_v46 }
 0x40e   : > { %v3336_v22 = vrot.slane %v3295_v0, 4 }
 0x410   : > { %v3368_v53 = vadd.f32 %v3336_v22, %v3224_v50 }
 0x412   : > { %v3429_v48 = vpop.permute.xlu1 %3428 }
 0x413   : > { %v3439_v62 = vsel %vm662_vm5, %v3427_v30, %v3429_v48  ;;  %v3289_v3 = vpop.permute.xlu2 %3288 }
 0x414   : > { %v3480_v39 = vrot.slane %v3439_v62, 4  ;;  %v7643_v57 = vpop.permute.xlu0 %3574  ;;  %v3293_v45 = vsel %vm581_vm1, %v3287_v32, %v3289_v3 }
 0x415   : > { %v3338_v8 = vrot.slane %v3293_v45, 4 }
 0x416   : > { %v7645_v23 = vadd.f32 %v3480_v39, %v3368_v53 }
 0x41a   : > { %v7647_v25 = vpop.permute.xlu1 %3718 }
 0x41b   : > { %v7669_v49 = vpop.permute.xlu2 %3578 }
 0x41c   : > { %v7649_v51 = vpop.permute.xlu0 %3716 }
 0x41d   : > { %v3727_v18 = vsel %vm824_vm7, %v7538_v27, %v7649_v51 }
 0x41e   : > { %v3767_v5 = vrot.slane %v3727_v18, 4 }
 0x420   : > { %v3799_v14 = vadd.f32 %v3767_v5, %v3655_v41  ;;  %v3294_v5 = vsel %vm581_vm1, %v3285_v46, %v3287_v32 }
 0x422   : > { %v7655_v52 = vpop.permute.xlu1 %3860 }
 0x423   : > { %v3871_v30 = vsel %vm905_vm12, %v3859_v38, %v7655_v52 }
 0x424   : > { %v3911_v24 = vrot.slane %v3871_v30, 4  ;;  %v7660_v61 = vpop.permute.xlu0 %3862 }
 0x426   : > { %v7662_v21 = vadd.f32 %v3911_v24, %v3799_v14 }
 0x42a   : > { %v2987_v26 = vpop.permute.xlu1 %2986 }
 0x42b   : > { %v3003_v27 = vsel %vm403_vm2, %v2987_v26, %v6993_v17  ;;  %v3163_v17 = vsel %vm500_vm0, %v3147_v11, %v6978_v13  ;;  %v3721_v13 = vpop.permute.xlu2 %3720 }
 0x42c   : > { %v7664_v20 = vpop.permute.xlu0 %3972  ;;  %v3020_v63 = vrot.slane %v3003_v27, 4  ;;  %v3180_v0 = vrot.slane %v3163_v17, 4 }
 0x42e   : > { %v3052_v41 = vadd.f32 %v3020_v63, %v6866_v56  ;;  %v3594_v56 = vsel %vm743_vm6, %v7002_v60, %v7037_v42  ;;  %v3337_v42 = vrot.slane %v3294_v5, 4  ;;  %v3726_v5 = vsel %vm824_vm7, %v7649_v51, %v7647_v25 }
 0x430   : > { %v3212_v39 = vadd.f32 %v3180_v0, %v3052_v41 }
 0x432   : > { %v3145_v19 = vpop.permute.xlu1 %3144 }
 0x433   : > { %v3149_v38 = vsel %vm500_vm0, %v3143_v16, %v3145_v19  ;;  %v3148_v27 = vsel %vm500_vm0, %v3145_v19, %v3147_v11  ;;  %v3994_v11 = vsel %vm954_vm9, %v7086_v33, %v7159_v15 }
 0x434   : > { %v2985_v35 = vpop.permute.xlu0 %2984  ;;  %v3194_v40 = vrot.slane %v3149_v38, 4  ;;  %v3882_v38 = vsel %vm905_vm12, %v7054_v7, %v7023_v43  ;;  %v4012_v0 = vrot.slane %v3994_v11, 4 }
 0x435   : > { %v2989_v54 = vsel %vm403_vm2, %v7586_v28, %v2985_v35  ;;  %v2988_v28 = vsel %vm403_vm2, %v2985_v35, %v2987_v26  ;;  %v3612_v26 = vrot.slane %v3594_v56, 4 }
 0x436   : > { %v3034_v59 = vrot.slane %v2989_v54, 4  ;;  %v3035_v30 = vrot.slane %v2988_v28, 4  ;;  %v3867_v28 = vpop.permute.xlu2 %3866 }
 0x438   : > { %v3066_v55 = vadd.f32 %v3034_v59, %v7453_v4  ;;  %v3195_v59 = vrot.slane %v3148_v27, 4  ;;  %v3883_v27 = vsel %vm905_vm12, %v3867_v28, %v7054_v7  ;;  %v4077_v7 = vadd.f32 %v7193_v36, %v7616_v34 }
 0x43a   : > { %v3226_v16 = vadd.f32 %v3194_v40, %v3066_v55  ;;  %v3435_v50 = vpop.permute.xlu1 %3434  ;;  %v3900_v40 = vrot.slane %v3882_v38, 4 }
 0x43b   : > { %v3451_v53 = vsel %vm662_vm5, %v3435_v50, %v7032_v6  ;;  %v3438_v6 = vsel %vm662_vm5, %v3429_v48, %v7606_v47  ;;  %v3067_v48 = vadd.f32 %v3035_v30, %v7437_v29  ;;  %v3369_v29 = vadd.f32 %v3337_v42, %v7636_v1 }
 0x43c   : > { %v3291_v22 = vpop.permute.xlu0 %3290  ;;  %v3370_v62 = vadd.f32 %v3338_v8, %v3226_v16  ;;  %v3468_v14 = vrot.slane %v3451_v53, 4 }
 0x43d   : > { %v3307_v4 = vsel %vm581_vm1, %v3291_v22, %v7025_v37  ;;  %v3738_v37 = vsel %vm824_vm7, %v7047_v12, %v7044_v9  ;;  %v3292_v32 = vsel %vm581_vm1, %v3289_v3, %v3291_v22  ;;  %v3582_v9 = vsel %vm743_vm6, %v7627_v44, %v7643_v57 }
 0x43e   : > { %v3324_v18 = vrot.slane %v3307_v4, 4  ;;  %v3756_v54 = vrot.slane %v3738_v37, 4  ;;  %v3481_v3 = vrot.slane %v3438_v6, 4  ;;  %v3339_v45 = vrot.slane %v3292_v32, 4 }
 0x43f   : > { %v3624_v55 = vrot.slane %v3582_v9, 4  ;;  %v3227_v8 = vadd.f32 %v3195_v59, %v3067_v48  ;;  %v3768_v37 = vrot.slane %v3726_v5, 4  ;;  %v3977_v48 = vpop.permute.xlu2 %3976 }
 0x440   : > { %v3356_v24 = vadd.f32 %v3324_v18, %v3212_v39  ;;  %v3513_v22 = vadd.f32 %v3481_v3, %v3369_v29 }
 0x441   : > { %v3371_v53 = vadd.f32 %v3339_v45, %v3227_v8  ;;  %v3656_v1 = vadd.f32 %v3624_v55, %v7645_v23  ;;  %v3870_v23 = vsel %vm905_vm12, %v7655_v52, %v7660_v61 }
 0x442   : > { %v3500_v46 = vadd.f32 %v3468_v14, %v3356_v24  ;;  %v3577_v35 = vpop.permute.xlu1 %3576  ;;  %v3725_v14 = vsel %vm824_vm7, %v7647_v25, %v3721_v13  ;;  %v3912_v38 = vrot.slane %v3870_v23, 4 }
 0x443   : > { %v3581_v15 = vsel %vm743_vm6, %v7643_v57, %v3577_v35  ;;  %v3580_v56 = vsel %vm743_vm6, %v3577_v35, %v7669_v49 }
 0x444   : > { %v3644_v19 = vadd.f32 %v3612_v26, %v3500_v46  ;;  %v3433_v63 = vpop.permute.xlu0 %3432  ;;  %v3625_v57 = vrot.slane %v3581_v15, 4  ;;  %v3626_v51 = vrot.slane %v3580_v56, 4 }
 0x445   : > { %v3436_v43 = vsel %vm662_vm5, %v3433_v63, %v3435_v50  ;;  %v3437_v44 = vsel %vm662_vm5, %v7606_v47, %v3433_v63  ;;  %v3595_v50 = vsel %vm743_vm6, %v7669_v49, %v7002_v60  ;;  %v3983_v49 = vsel %vm954_vm9, %v7572_v10, %v7664_v20 }
 0x446   : > { %v3788_v17 = vadd.f32 %v3756_v54, %v3644_v19  ;;  %v3482_v41 = vrot.slane %v3437_v44, 4  ;;  %v3483_v16 = vrot.slane %v3436_v43, 4  ;;  %v3627_v18 = vrot.slane %v3595_v50, 4 }
 0x447   : > { %v3657_v6 = vadd.f32 %v3625_v57, %v3513_v22  ;;  %v4023_v32 = vrot.slane %v3983_v49, 4  ;;  %v4076_v54 = vadd.f32 %v7193_v36, %v7614_v31  ;;  %v3800_v19 = vadd.f32 %v3768_v37, %v3656_v1 }
 0x448   : > { %v3932_v47 = vadd.f32 %v3900_v40, %v3788_v17  ;;  %v3514_v60 = vadd.f32 %v3482_v41, %v3370_v62  ;;  %v3515_v30 = vadd.f32 %v3483_v16, %v3371_v53  ;;  %v3915_v63 = vrot.slane %v3883_v27, 4 }
 0x449   : > { %v4055_v43 = vadd.f32 %v4023_v32, %v7662_v21  ;;  %v3944_v31 = vadd.f32 %v3912_v38, %v3800_v19 }
 0x44a   : > { %v4044_v4 = vadd.f32 %v4012_v0, %v3932_v47  ;;  %v3865_v39 = vpop.permute.xlu1 %3864  ;;  %v3658_v46 = vadd.f32 %v3626_v51, %v3514_v60  ;;  %v3659_v35 = vadd.f32 %v3627_v18, %v3515_v30 }
 0x44b   : > { %v3869_v62 = vsel %vm905_vm12, %v7660_v61, %v3865_v39  ;;  %v3769_v61 = vrot.slane %v3725_v14, 4  ;;  %v4078_v47 = vadd.f32 %v7193_v36, %v4055_v43 }
 0x44c   : > { %v4067_v24 = vadd.f32 %v7193_v36, %v4044_v4  ;;  %v3723_v26 = vpop.permute.xlu0 %3722  ;;  %v3913_v9 = vrot.slane %v3869_v62, 4 }
 0x44d   : > { %v3724_v25 = vsel %vm824_vm7, %v3721_v13, %v3723_v26  ;;  %v3739_v52 = vsel %vm824_vm7, %v3723_v26, %v7047_v12  ;;  %v3868_v13 = vsel %vm905_vm12, %v3865_v39, %v3867_v28  ;;  %v4075_v12 = vadd.f32 %v7193_v36, %v7547_v58 }
 0x44e   : > { %4099 = vst [vmem:[#allocation1] sm:$0xff] %v4067_v24  ;;  %v3770_v42 = vrot.slane %v3724_v25, 4  ;;  %v3771_v10 = vrot.slane %v3739_v52, 4  ;;  %v3801_v59 = vadd.f32 %v3769_v61, %v3657_v6  ;;  %v3914_v44 = vrot.slane %v3868_v13, 4 }
 0x450   : > { %v3802_v11 = vadd.f32 %v3770_v42, %v3658_v46  ;;  %v3803_v3 = vadd.f32 %v3771_v10, %v3659_v35  ;;  %v3945_v29 = vadd.f32 %v3913_v9, %v3801_v59 }
 0x452   : > { %v3975_v45 = vpop.permute.xlu1 %3974  ;;  %v3946_v15 = vadd.f32 %v3914_v44, %v3802_v11  ;;  %v3947_v41 = vadd.f32 %v3915_v63, %v3803_v3 }
 0x453   : > { %v3981_v40 = vsel %vm954_vm9, %v3975_v45, %v3977_v48  ;;  %v3982_v58 = vsel %vm954_vm9, %v7664_v20, %v3975_v45 }
 0x454   : > { %v4024_v55 = vrot.slane %v3982_v58, 4  ;;  %v4025_v17 = vrot.slane %v3981_v40, 4  ;;  %v3979_v34 = vpop.permute.xlu0 %3978 }
 0x455   : > { %v4108_v8 = vld [vmem:[#allocation1 + $0x4] ss:$9 sm:$0xff]  ;;  %v3980_v21 = vsel %vm954_vm9, %v3977_v48, %v3979_v34  ;;  %v3995_v16 = vsel %vm954_vm9, %v3979_v34, %v7086_v33 }
 0x456   : > { %4109 = vst [vmem:[#allocation1] sm:$0xff] %v4075_v12  ;;  %v4056_v0 = vadd.f32 %v4024_v55, %v3944_v31  ;;  %v4057_v20 = vadd.f32 %v4025_v17, %v3945_v29  ;;  %v4026_v50 = vrot.slane %v3980_v21, 4  ;;  %v4027_v28 = vrot.slane %v3995_v16, 4 }
 0x457   : > { %4110 = vst [vmem:[#allocation1 + $0x9] sm:$0xff] %v4076_v54 }
 0x458   : > { %4111 = vst [vmem:[#allocation1 + $0x12] sm:$0xff] %v4077_v7  ;;  %v4079_v22 = vadd.f32 %v7193_v36, %v4056_v0  ;;  %v4080_v53 = vadd.f32 %v7193_v36, %v4057_v20  ;;  %v4058_v1 = vadd.f32 %v4026_v50, %v3946_v15  ;;  %v4059_v4 = vadd.f32 %v4027_v28, %v3947_v41 }
 0x459   : > { %4112 = vst [vmem:[#allocation1 + $0x1b] sm:$0xff] %v4078_v47 }
 0x45a   : > { %4113 = vst [vmem:[#allocation1 + $0x24] sm:$0xff] %v4079_v22  ;;  %v4081_v2 = vadd.f32 %v7193_v36, %v4058_v1  ;;  %v4082_v33 = vadd.f32 %v7193_v36, %v4059_v4 }
 0x45b   : > { %4114 = vst [vmem:[#allocation1 + $0x2d] sm:$0xff] %v4080_v53 }
 0x45c   : > { %4115 = vst [vmem:[#allocation1 + $0x36] sm:$0xff] %v4081_v2 }
 0x45d   : > { %4116 = vst [vmem:[#allocation1 + $0x3f] sm:$0xff] %v4082_v33 }
 0x45e   : > { %4120 = vst [vmem:[%s262_s10] sm:$0xff] %v4108_v8 }
 0x464   : > { %v4117_v56 = vld [vmem:[#allocation1 + $0x4] ss:$9 sm:$0xff] }
 0x465   : > { %4121 = vst [vmem:[%s262_s10 + $0x8] sm:$0xff] %v4117_v56 }
 0x466   : > { %4800 = shalt.err (!%p4797_p8)
}
 0x467   : > { %4398 = dma.vmem_to_hbm [thread:$0]  (%p4929_p5), %s4136_s11, 256, %s4138_s12, %s4123_s18  }
 0x468 PF: > { %p4410_p9 = scmp.ge.s32.totalorder %s4839_s26, 2  ;;  %s4149_s16 = sand.u32 1, %s4827_s23  }
 0x469   : > { %s4150_s22 = scalar_lea.sflag [#allocation6], %s4149_s16 }
 0x46a   : > { %p4405_p10 = pnand %p4410_p9, %p4933_p6 }
 0x46c   : > { %p4406_p11 = pneg %p4405_p10 }
 0x46e   : > { %4822 = dma.done.wait (%p4406_p11), %s4150_s22, 256  }
 0x46f   : > { %4824 = vsyncadd (%p4406_p11), %s4150_s22, 4294967040  ;;  %p19_p12 = scmp.ge.s32.totalorder %s4916_s28, 4   ;;  %s7972_s23 = smov %s4831_s24 }
 0x470   : > { %s7973_s24 = smov %s4835_s25  ;;  %s7974_s25 = smov %s4927_s7 }
 0x471   : > { %s7975_s26 = smov %s4916_s28  ;;  %21 = sbr.rel (!%p19_p12) target bundleno = 7 (0x7), region = 85 }
 0x476   :  { %4156 = vsyncpa [#allocation5], 1 }
 0x477   :  { %4158 = vsyncpa [#allocation5 + $0x1], 1 }
 0x478   :  { %4159 = vsyncpa [#allocation6], 1 }
 0x479   :  { %4161 = vsyncpa [#allocation6 + $0x1], 1 }

</bundles_post_ra>
